<compile_context>
chip_gen: v5e
topology: v5e:2x2
jax: 0.10.0
libtpu: 0.0.40
codegen_flags: <defaults>
</compile_context>

<pallas_src>
import jax
import jax.numpy as jnp
from jax.experimental import pallas as pl
from jax.experimental.pallas import tpu as pltpu


def _round_up(a, b):
    return (a + b - 1) // b * b


def _choose_tiles(n, tm_max, tk_max):
    """Pad N to a multiple of 128 and pick tile sizes that divide it.

    tm is a multiple of 8 (sublanes), tk a multiple of 128 (lanes); both
    divide n_pad exactly so the grid has no ragged tiles.
    """
    n_pad = _round_up(max(n, 8), 128)
    tk = min(_round_up(tk_max, 128), n_pad)
    while n_pad % tk:
        tk -= 128
    tm = min(_round_up(tm_max, 8), n_pad)
    while n_pad % tm:
        tm -= 8
    return n_pad, tm, tk


# --------------------------------------------------------------------------- #
# Kernel 1:  g = ReLU((A_hat @ X) @ W1 + b1) @ W2        (output in bf16)
# --------------------------------------------------------------------------- #
def _gcn_layer1_kernel(adj_ref, x_ref, w1_ref, b1_ref, w2_ref, g_ref, acc_ref):
    k = pl.program_id(1)

    @pl.when(k == 0)
    def _():
        acc_ref[...] = jnp.zeros_like(acc_ref)

    # bf16 x bf16 -> f32 accumulate on the MXU
    acc_ref[...] += jnp.dot(adj_ref[...], x_ref[...],
                            preferred_element_type=jnp.float32)

    @pl.when(k == pl.num_programs(1) - 1)
    def _():
        h = jnp.dot(acc_ref[...].astype(jnp.bfloat16), w1_ref[...],
                    preferred_element_type=jnp.float32) + b1_ref[...]
        h = jnp.maximum(h, 0.0)                          # ReLU
        # dropout(p=0.6) in eval mode is the identity.
        # TODO(synk): training-mode dropout would use pltpu.prng_seed +
        #             pltpu.stateful_bernoulli with 1/(1-p) rescale.
        g_ref[...] = jnp.dot(h.astype(jnp.bfloat16), w2_ref[...],
                             preferred_element_type=jnp.float32
                             ).astype(g_ref.dtype)


# --------------------------------------------------------------------------- #
# Kernel 2:  out = log_softmax(A_hat @ g + b2, axis=1)
# --------------------------------------------------------------------------- #
def _gcn_layer2_kernel(adj_ref, g_ref, b2_ref, out_ref, acc_ref):
    k = pl.program_id(1)

    @pl.when(k == 0)
    def _():
        acc_ref[...] = jnp.zeros_like(acc_ref)

    acc_ref[...] += jnp.dot(adj_ref[...], g_ref[...],
                            preferred_element_type=jnp.float32)

    @pl.when(k == pl.num_programs(1) - 1)
    def _():
        y = acc_ref[...] + b2_ref[...]
        m = jnp.max(y, axis=1, keepdims=True)
        s = y - m
        lse = jnp.log(jnp.sum(jnp.exp(s), axis=1, keepdims=True))
        out_ref[...] = s - lse


# --------------------------------------------------------------------------- #
# Host wrapper
# --------------------------------------------------------------------------- #
def gcn_forward(adj_norm, x, w1, b1, w2, b2, *, tm=512, tk=2048):
    n, din = x.shape
    hdim = w1.shape[1]
    dout = w2.shape[1]

    n_pad, tm, tk = _choose_tiles(n, tm, tk)

    # Pad with zeros (zero adj rows/cols contribute nothing; padded output
    # rows are sliced off below) and stream adj / X in bf16.
    adj_b = jnp.zeros((n_pad, n_pad), jnp.bfloat16).at[:n, :n].set(
        adj_norm.astype(jnp.bfloat16))
    x_b = jnp.zeros((n_pad, din), jnp.bfloat16).at[:n, :].set(
        x.astype(jnp.bfloat16))
    w1_b = w1.astype(jnp.bfloat16)
    w2_b = w2.astype(jnp.bfloat16)

    grid = (n_pad // tm, n_pad // tk)
    cparams = pltpu.CompilerParams(
        dimension_semantics=("parallel", "arbitrary"),
        vmem_limit_bytes=32 * 1024 * 1024,   # tiles fit easily on v5e/v6e/v7x
    )

    # ---- layer 1 (adj pass #1) -> tiny bf16 intermediate g = h1 @ W2 ----
    g = pl.pallas_call(
        _gcn_layer1_kernel,
        out_shape=jax.ShapeDtypeStruct((n_pad, dout), jnp.bfloat16),
        grid_spec=pltpu.PrefetchScalarGridSpec(
            num_scalar_prefetch=0,
            grid=grid,
            in_specs=[
                pl.BlockSpec((tm, tk), lambda i, k: (i, k)),      # A_hat tile
                pl.BlockSpec((tk, din), lambda i, k: (k, 0)),     # X k-slab
                pl.BlockSpec((din, hdim), lambda i, k: (0, 0)),   # W1
                pl.BlockSpec((1, hdim), lambda i, k: (0, 0)),     # b1
                pl.BlockSpec((hdim, dout), lambda i, k: (0, 0)),  # W2
            ],
            out_specs=pl.BlockSpec((tm, dout), lambda i, k: (i, 0)),
            scratch_shapes=[pltpu.VMEM((tm, din), jnp.float32)],
        ),
        compiler_params=cparams,
    )(adj_b, x_b, w1_b, b1, w2_b)

    # ---- layer 2 (adj pass #2) -> log_softmax output ----
    out = pl.pallas_call(
        _gcn_layer2_kernel,
        out_shape=jax.ShapeDtypeStruct((n_pad, dout), jnp.float32),
        grid_spec=pltpu.PrefetchScalarGridSpec(
            num_scalar_prefetch=0,
            grid=grid,
            in_specs=[
                pl.BlockSpec((tm, tk), lambda i, k: (i, k)),      # A_hat tile
                pl.BlockSpec((tk, dout), lambda i, k: (k, 0)),    # g k-slab
                pl.BlockSpec((1, dout), lambda i, k: (0, 0)),     # b2
            ],
            out_specs=pl.BlockSpec((tm, dout), lambda i, k: (i, 0)),
            scratch_shapes=[pltpu.VMEM((tm, dout), jnp.float32)],
        ),
        compiler_params=cparams,
    )(adj_b, g, b2)

    return out[:n]


# ------------------------------- glue (JAX) -------------------------------- #
def build_norm_adj(edge_index, num_nodes):
    """Dense D^{-1/2}(A + I)D^{-1/2} matching PyG GCNConv's gcn_norm."""
    src = edge_index[0]
    dst = edge_index[1]
    loop = jnp.arange(num_nodes, dtype=edge_index.dtype)
    src = jnp.concatenate([src, loop])
    dst = jnp.concatenate([dst, loop])
    a = jnp.zeros((num_nodes, num_nodes), jnp.float32).at[dst, src].add(1.0)
    deg = jnp.sum(a, axis=1)
    dinv = jnp.where(deg > 0, jax.lax.rsqrt(deg), 0.0)
    return dinv[:, None] * a * dinv[None, :]


def glorot(key, shape):
    fan_in, fan_out = shape
    limit = jnp.sqrt(6.0 / (fan_in + fan_out))
    return jax.random.uniform(key, shape, jnp.float32, -limit, limit)


class GCNNetPallas:
    def __init__(self, input_dim, output_dim, hidden_dim=16, *, key):
        k1, k2 = jax.random.split(key)
        self.w1 = glorot(k1, (input_dim, hidden_dim))
        self.b1 = jnp.zeros((1, hidden_dim), jnp.float32)
        self.w2 = glorot(k2, (hidden_dim, output_dim))
        self.b2 = jnp.zeros((1, output_dim), jnp.float32)

    def __call__(self, x, edge_index, *, tm=512, tk=2048):
        n = x.shape[0]
        adj = build_norm_adj(edge_index, n)
        return gcn_forward(adj, x, self.w1, self.b1, self.w2, self.b2,
                           tm=tm, tk=tk)


# ------------------------------ references --------------------------------- #
def ref_forward_bf16(model, x, edge_index):
    """Mirrors the kernel's numerics (bf16 streams, f32 accumulation)."""
    adj = build_norm_adj(edge_index, x.shape[0]).astype(jnp.bfloat16)
    xb = x.astype(jnp.bfloat16)
    h = jnp.dot(adj, xb, preferred_element_type=jnp.float32)
    h = jnp.dot(h.astype(jnp.bfloat16), model.w1.astype(jnp.bfloat16),
                preferred_element_type=jnp.float32) + model.b1
    h = jnp.maximum(h, 0.0)
    g = jnp.dot(h.astype(jnp.bfloat16), model.w2.astype(jnp.bfloat16),
                preferred_element_type=jnp.float32).astype(jnp.bfloat16)
    y = jnp.dot(adj, g, preferred_element_type=jnp.float32) + model.b2
    return jax.nn.log_softmax(y, axis=1)


def ref_forward_f32(model, x, edge_index):
    """Pure f32 spec reference (loose tolerance vs the bf16-streaming kernel)."""
    adj = build_norm_adj(edge_index, x.shape[0])
    h = adj @ (x @ model.w1) + model.b1
    h = jnp.maximum(h, 0.0)
    y = adj @ (h @ model.w2) + model.b2
    return jax.nn.log_softmax(y, axis=1)


if __name__ == "__main__":
    key = jax.random.PRNGKey(0)
    k_x, k_p = jax.random.split(key)

    N, INPUT_DIM, OUTPUT_DIM = 1024, 8, 4

    # node features
    x = jax.random.normal(k_x, (N, INPUT_DIM), jnp.float32)

    # deterministic small graph: bidirectional ring -> edge_index [2, 2N]
    src = jnp.arange(N, dtype=jnp.int32)
    dst = (src + 1) % N
    edge_index = jnp.stack(
        [jnp.concatenate([src, dst]), jnp.concatenate([dst, src])], axis=0
    )

    model = GCNNetPallas(INPUT_DIM, OUTPUT_DIM, key=k_p)

    ref_b = ref_forward_bf16(model, x, edge_index)
    ref_f = ref_forward_f32(model, x, edge_index)

    # Default (large) tiles: grid (2, 1) -- single k step per row tile.
    out = model(x, edge_index)
    out = jax.block_until_ready(out)
    assert out.shape == (N, OUTPUT_DIM)
    assert jnp.allclose(out, ref_b, atol=1e-4, rtol=1e-4)
    assert jnp.allclose(out, ref_f, atol=1e-1, rtol=1e-1)

    # Smaller tiles: grid (4, 2) -- exercises the k-accumulation path.
    out2 = model(x, edge_index, tm=256, tk=512)
    out2 = jax.block_until_ready(out2)
    assert jnp.allclose(out2, ref_b, atol=1e-4, rtol=1e-4)
    assert jnp.allclose(out2, ref_f, atol=1e-1, rtol=1e-1)

    print("KERNEL_OK")
</pallas_src>

<mosaic_0001>
module attributes {stable_mosaic.version = 11 : i64} {
  func.func @_gcn_layer1_kernel(%arg0: i32, %arg1: i32, %arg2: memref<512x1024xbf16, #tpu.memory_space<vmem>>, %arg3: memref<1024x8xbf16, #tpu.memory_space<vmem>>, %arg4: memref<8x16xbf16, #tpu.memory_space<vmem>>, %arg5: memref<1x16xf32, #tpu.memory_space<vmem>>, %arg6: memref<16x4xbf16, #tpu.memory_space<vmem>>, %arg7: memref<512x4xbf16, #tpu.memory_space<vmem>>, %arg8: memref<512x8xf32, #tpu.memory_space<vmem>>) attributes {dimension_semantics = [#tpu.dimension_semantics<parallel>, #tpu.dimension_semantics<arbitrary>], iteration_bounds = array<i64: 2, 1>, scalar_prefetch = 0 : i64, scratch_operands = 1 : i64, tpu.core_type = #tpu.core_type<tc>, window_params = [{transform_indices = @transform_0, window_bounds = array<i64: 512, 1024>}, {transform_indices = @transform_1, window_bounds = array<i64: 1024, 8>}, {pipeline_mode = #tpu.pipeline_mode<synchronous>, transform_indices = @transform_2, window_bounds = array<i64: 8, 16>}, {pipeline_mode = #tpu.pipeline_mode<synchronous>, transform_indices = @transform_3, window_bounds = array<i64: 1, 16>}, {pipeline_mode = #tpu.pipeline_mode<synchronous>, transform_indices = @transform_4, window_bounds = array<i64: 16, 4>}, {transform_indices = @transform_5, window_bounds = array<i64: 512, 4>}]} {
    %c0_i32 = arith.constant 0 : i32
    %0 = arith.cmpi eq, %arg1, %c0_i32 : i32
    %1 = arith.extui %0 : i1 to i32
    %c0_i32_0 = arith.constant 0 : i32
    %2 = arith.cmpi ne, %1, %c0_i32_0 : i32
    scf.if %2 {
      %cst_10 = arith.constant 0.000000e+00 : f32
      %12 = vector.broadcast %cst_10 : f32 to vector<512x8xf32>
      %c0_11 = arith.constant 0 : index
      %c0_12 = arith.constant 0 : index
      %13 = vector.load %arg8[%c0_11, %c0_12] : memref<512x8xf32, #tpu.memory_space<vmem>>, vector<512x8xf32>
      tpu.vector_store %arg8[%c0_11, %c0_12], %12 {strides = array<i32>} : memref<512x8xf32, #tpu.memory_space<vmem>>, vector<512x8xf32>,
    } else {
    }
    %c0 = arith.constant 0 : index
    %c0_1 = arith.constant 0 : index
    %3 = vector.load %arg8[%c0, %c0_1] : memref<512x8xf32, #tpu.memory_space<vmem>>, vector<512x8xf32>
    %c0_2 = arith.constant 0 : index
    %c0_3 = arith.constant 0 : index
    %4 = vector.load %arg2[%c0_2, %c0_3] : memref<512x1024xbf16, #tpu.memory_space<vmem>>, vector<512x1024xbf16>
    %c0_4 = arith.constant 0 : index
    %c0_5 = arith.constant 0 : index
    %5 = vector.load %arg3[%c0_4, %c0_5] : memref<1024x8xbf16, #tpu.memory_space<vmem>>, vector<1024x8xbf16>
    %cst = arith.constant dense<0.000000e+00> : vector<512x8xf32>
    %6 = tpu.matmul %4, %5, %cst {dimension_numbers = #tpu.dot_dimension_numbers<[1], [0], [0], [1], [0, 0, 1, 1], [], []>} : vector<512x1024xbf16>, vector<1024x8xbf16>, vector<512x8xf32> -> vector<512x8xf32>
    %7 = arith.addf %3, %6 : vector<512x8xf32>
    %c0_6 = arith.constant 0 : index
    %c0_7 = arith.constant 0 : index
    %8 = vector.load %arg8[%c0_6, %c0_7] : memref<512x8xf32, #tpu.memory_space<vmem>>, vector<512x8xf32>
    tpu.vector_store %arg8[%c0_6, %c0_7], %7 {strides = array<i32>} : memref<512x8xf32, #tpu.memory_space<vmem>>, vector<512x8xf32>,
    %c0_i32_8 = arith.constant 0 : i32
    %9 = arith.cmpi eq, %arg1, %c0_i32_8 : i32
    %10 = arith.extui %9 : i1 to i32
    %c0_i32_9 = arith.constant 0 : i32
    %11 = arith.cmpi ne, %10, %c0_i32_9 : i32
    scf.if %11 {
      %c0_10 = arith.constant 0 : index
      %c0_11 = arith.constant 0 : index
      %12 = vector.load %arg8[%c0_10, %c0_11] : memref<512x8xf32, #tpu.memory_space<vmem>>, vector<512x8xf32>
      %13 = arith.truncf %12 : vector<512x8xf32> to vector<512x8xbf16>
      %c0_12 = arith.constant 0 : index
      %c0_13 = arith.constant 0 : index
      %14 = vector.load %arg4[%c0_12, %c0_13] : memref<8x16xbf16, #tpu.memory_space<vmem>>, vector<8x16xbf16>
      %cst_14 = arith.constant dense<0.000000e+00> : vector<512x16xf32>
      %15 = tpu.matmul %13, %14, %cst_14 {dimension_numbers = #tpu.dot_dimension_numbers<[1], [0], [0], [1], [0, 0, 1, 1], [], []>} : vector<512x8xbf16>, vector<8x16xbf16>, vector<512x16xf32> -> vector<512x16xf32>
      %c0_15 = arith.constant 0 : index
      %c0_16 = arith.constant 0 : index
      %16 = vector.load %arg5[%c0_15, %c0_16] : memref<1x16xf32, #tpu.memory_space<vmem>>, vector<1x16xf32>
      %17 = vector.broadcast %16 : vector<1x16xf32> to vector<512x16xf32>
      %18 = arith.addf %15, %17 : vector<512x16xf32>
      %cst_17 = arith.constant 0.000000e+00 : f32
      %19 = vector.broadcast %cst_17 : f32 to vector<512x16xf32>
      %20 = arith.maximumf %18, %19 : vector<512x16xf32>
      %21 = arith.truncf %20 : vector<512x16xf32> to vector<512x16xbf16>
      %c0_18 = arith.constant 0 : index
      %c0_19 = arith.constant 0 : index
      %22 = vector.load %arg6[%c0_18, %c0_19] : memref<16x4xbf16, #tpu.memory_space<vmem>>, vector<16x4xbf16>
      %cst_20 = arith.constant dense<0.000000e+00> : vector<512x4xf32>
      %23 = tpu.matmul %21, %22, %cst_20 {dimension_numbers = #tpu.dot_dimension_numbers<[1], [0], [0], [1], [0, 0, 1, 1], [], []>} : vector<512x16xbf16>, vector<16x4xbf16>, vector<512x4xf32> -> vector<512x4xf32>
      %24 = arith.truncf %23 : vector<512x4xf32> to vector<512x4xbf16>
      %c0_21 = arith.constant 0 : index
      %c0_22 = arith.constant 0 : index
      %25 = vector.load %arg7[%c0_21, %c0_22] : memref<512x4xbf16, #tpu.memory_space<vmem>>, vector<512x4xbf16>
      tpu.vector_store %arg7[%c0_21, %c0_22], %24 {strides = array<i32>} : memref<512x4xbf16, #tpu.memory_space<vmem>>, vector<512x4xbf16>,
    } else {
    }
    return
  }
  func.func @transform_0(%arg0: i32, %arg1: i32) -> (i32, i32) {
    %c0_i32 = arith.constant 0 : i32
    return %arg0, %arg1 : i32, i32
  }
  func.func @transform_1(%arg0: i32, %arg1: i32) -> (i32, i32) {
    %c0_i32 = arith.constant 0 : i32
    %c0_i32_0 = arith.constant 0 : i32
    return %arg1, %c0_i32 : i32, i32
  }
  func.func @transform_2(%arg0: i32, %arg1: i32) -> (i32, i32) {
    %c0_i32 = arith.constant 0 : i32
    %c0_i32_0 = arith.constant 0 : i32
    %c0_i32_1 = arith.constant 0 : i32
    return %c0_i32, %c0_i32_0 : i32, i32
  }
  func.func @transform_3(%arg0: i32, %arg1: i32) -> (i32, i32) {
    %c0_i32 = arith.constant 0 : i32
    %c0_i32_0 = arith.constant 0 : i32
    %c0_i32_1 = arith.constant 0 : i32
    return %c0_i32, %c0_i32_0 : i32, i32
  }
  func.func @transform_4(%arg0: i32, %arg1: i32) -> (i32, i32) {
    %c0_i32 = arith.constant 0 : i32
    %c0_i32_0 = arith.constant 0 : i32
    %c0_i32_1 = arith.constant 0 : i32
    return %c0_i32, %c0_i32_0 : i32, i32
  }
  func.func @transform_5(%arg0: i32, %arg1: i32) -> (i32, i32) {
    %c0_i32 = arith.constant 0 : i32
    %c0_i32_0 = arith.constant 0 : i32
    return %arg0, %c0_i32 : i32, i32
  }
}

</mosaic_0001>

<bundles_post_ra>
// kernel: tpu_custom_call.1
= control target key start
LH: loop header
LB: loop body
LE: loop exit
PB: predicated region body
PF: predicated region fallthrough
CT: control target
= control target key end

     0   :  { %10 = vsyncpa [#allocation4], 0  ;;  %s8674_s0 = inlined_call_operand.hbm [shape: bf16[1024,1024], index: 0, kind: input, shape index: {}]   ;;  %s8675_s1 = inlined_call_operand.vmem [shape: bf16[1024,8], index: 1, kind: input, shape index: {}]   ;;  %s8676_s2 = inlined_call_operand.hbm [shape: bf16[8,16], index: 2, kind: input, shape index: {}]   ;;  %s8677_s3 = inlined_call_operand.hbm [shape: f32[1,16], index: 3, kind: input, shape index: {}]   ;;  %s8678_s4 = inlined_call_operand.vmem [shape: bf16[16,4], index: 4, kind: input, shape index: {}]   ;;  %s8679_s5 = inlined_call_operand.vmem [shape: bf16[1024,4], index: 5, kind: output, shape index: {}]  }
   0x1   :  { %12 = vsyncpa [#allocation4 + $0x1], 0 }
   0x2   :  { %13 = vsyncpa [#allocation6], 0  ;;  %s6934_s18 = smov 0   ;;  %s6936_s19 = smov 0  }
   0x3   :  { %s6938_s20 = smov 0   ;;  %s6940_s21 = smov 0  }
   0x4   :  { %s6942_s22 = smov 0   ;;  %s6944_s23 = smov 0  }
   0x5 LB: > { %s4966_s24 = sadd.s32 4294967295, %s6897_s23   ;;  %s40_s25 = sadd.s32 1, %s6885_s20  ;;  %s6897_s23 = sphi %s6944_s23, %s19_s23   ;;  %s6893_s22 = sphi %s6942_s22, %s8809_s22   ;;  %s6889_s21 = sphi %s6940_s21, %s8808_s21   ;;  %s6885_s20 = sphi %s6938_s20, %s8807_s20   ;;  %s6881_s19 = sphi %s6936_s19, %s8806_s19   ;;  %s6877_s18 = sphi %s6934_s18, %s8805_s18  }
   0x6   : > { %p47_p0 = scmp.ne.s32.totalorder %s6885_s20, %s6881_s19  ;;  %p48_p1 = scmp.eq.s32.totalorder %s6897_s23, 0 }
   0x7   : > { %p53_p2 = scmp.ne.s32.totalorder %s6881_s19, %s6877_s18  ;;  %p6968_p3 = scmp.eq.s32.totalorder %s4966_s24, 0 }
   0x8   : > { %p6972_p4 = por %p48_p1, %p47_p0  ;;  %p4968_p5 = scmp.ge.s32.totalorder %s6897_s23, 1 }
   0x9   : > { %p6979_p6 = por %p6968_p3, %p53_p2  ;;  %p179_p7 = scmp.lt.s32.totalorder %s6897_s23, 3 }
   0xa   : > { %s200_s6 = sshll.u32 %s8676_s2, 4  ;;  %s6899_s8 = smov [#allocation5]   ;;  %s201_s6 = int_to_ptr.hbm [resolvable:$true] %s200_s6 }
   0xb   : > { %p6987_p8 = pnand %p4968_p5, %p179_p7  ;;  %s202_s9 = sshll.u32 %s6899_s8, 4  ;;  %s203_s9 = int_to_ptr.vmem [resolvable:$true] %s202_s9 }
   0xc   : > { %p6695_p10 = scmp.lt.s32.totalorder %s6897_s23, 2  ;;  %s212_s12 = sshll.u32 %s8677_s3, 4  ;;  %s213_s12 = int_to_ptr.hbm [resolvable:$true] %s212_s12 }
   0xd   : > { %p6682_p9 = pneg %p6987_p8  ;;  %s6900_s14 = smov [#allocation7]  }
   0xe   : > { %p7001_p12 = pnand %p6695_p10, %p6972_p4  ;;  %s214_s15 = sshll.u32 %s6900_s14, 4  ;;  %s215_s15 = int_to_ptr.vmem [resolvable:$true] %s214_s15 }
   0xf   : > { %p6683_p11 = pnand %p6682_p9, %p6968_p3  ;;  %s228_s16 = sand.u32 1, %s6885_s20  }
  0x10   : > { %s31_s17 = sadd.s32 1, %s6893_s22  ;;  %s4973_s18 = sshll.u32 %s228_s16, 11 }
  0x11   : > { %6685 = dma.hbm_to_vmem [thread:$0]  (!%p6683_p11), %s201_s6, 64, %s203_s9, [#allocation6]  }
  0x12   : > { %6688 = dma.hbm_to_vmem [thread:$0]  (!%p6683_p11), %s213_s12, 16, %s215_s15, [#allocation6]  }
  0x13   : > { %p33_p13 = scmp.ge.s32.totalorder %s31_s17, 2  ;;  %s6334_s24 = sshll.u32 %s6893_s22, 11 }
  0x14   : > { %s240_s30 = scalar_lea.hbm %s8674_s0, %s6334_s24  ;;  %s232_s6 = scalar_lea.vmem [#allocation3], %s4973_s18 }
  0x15   : > { %s8811_s17 = smov (%p33_p13, %s31_s17), 0  ;;  %s243_s8 = sshll.u32 %s232_s6, 4  ;;  %s244_s8 = int_to_ptr.vmem [resolvable:$true] %s243_s8 }
  0x16   : > { %s35_s9 = ssub.s32 %s6893_s22, %s8811_s17  ;;  %s241_s10 = sshll.u32 %s240_s30, 4  ;;  %s242_s10 = int_to_ptr.hbm [resolvable:$true] %s241_s10 }
  0x17   : > { %p38_p0 = scmp.eq.s32.totalorder %s35_s9, 0  ;;  %s229_s12 = scalar_lea.sflag [#allocation4], %s228_s16 }
  0x18   : > { %s6901_s14 = smov 512   ;;  %s6902_s15 = smov 32  }
  0x19   : > { %s7018_s11 = scalar_select %p38_p0, %s6885_s20, %s40_s25  }
  0x1a   : > { %6692 = dma.hbm_to_vmem [thread:$0]  (!%p7001_p12), %s242_s10, 32768, %s244_s8, %s229_s12, %s6901_s14, %s6901_s14, %s6902_s15  }
  0x1b   : > { %255 = sbr.rel (%p6987_p8) target bundleno = 1779 (0x6f3), region = 40 }
  0x20   : > { %s257_s18 = sand.u32 1, %s6881_s19  }
  0x21   : > { %s4978_s24 = sshll.u32 %s257_s18, 11  ;;  %s258_s27 = scalar_lea.sflag [#allocation4], %s257_s18 }
  0x22   : > { %s7025_s29 = scalar_lea.vmem [#allocation3], %s4978_s24 }
  0x23   : > { %6868 = dma.done.wait (%p6979_p6), %s258_s27, 32768  }
  0x24   : > { %6870 = vsyncadd (%p6979_p6), %s258_s27, 4294934528 }
  0x25   : > { %6872 = dma.done.wait (%p6968_p3), [#allocation6], 80  }
  0x26   : > { %6874 = vsyncadd (%p6968_p3), [#allocation6], 4294967216  ;;  %v6598_v0 = vld [vmem:[%s8675_s1 + $0x38] sm:$0xff]  ;;  %v6597_v2 = vld [vmem:[%s8675_s1 + $0x30] sm:$0xff]  ;;  %vm4181_vm0 = vcmask 1043456   ;;  %vm323_vm1 = vcmask 64512  }
  0x27   : > { %v6606_v1 = vld [vmem:[%s8675_s1 + $0x78] sm:$0xff]  ;;  %6656 = vmatpush.bf16.msra.mxu2 %v6598_v0  ;;  %v6605_v3 = vld [vmem:[%s8675_s1 + $0x70] sm:$0xff]  ;;  %2500 = vmatpush.bf16.msra.mxu0 %v6598_v0  ;;  %v6596_v4 = vld [vmem:[%s8675_s1 + $0x28] sm:$0xff]  ;;  %vm4458_vm2 = vcmask 130048   ;;  %s4981_s12 = sshll.u32 %s6889_s21, 6  ;;  %vm4788_vm3 = vcmask 27648  }
  0x28   : > { %6664 = vmatpush.bf16.msra.mxu3 %v6606_v1  ;;  %2669 = vmatpush.bf16.msra.mxu1 %v6606_v1  ;;  %v6604_v5 = vld [vmem:[%s8675_s1 + $0x68] sm:$0xff]  ;;  %v6595_v6 = vld [vmem:[%s8675_s1 + $0x20] sm:$0xff]  ;;  %v6594_v8 = vld [vmem:[%s8675_s1 + $0x18] sm:$0xff]  ;;  %p313_p1 = scmp.lt.s32.totalorder %s4981_s12, 127 }
  0x29   : > { %v6603_v7 = vld [vmem:[%s8675_s1 + $0x60] sm:$0xff]  ;;  %v6602_v9 = vld [vmem:[%s8675_s1 + $0x58] sm:$0xff]  ;;  %v6593_v10 = vld [vmem:[%s8675_s1 + $0x10] sm:$0xff] }
  0x2a   : > { %v6601_v11 = vld [vmem:[%s8675_s1 + $0x50] sm:$0xff]  ;;  %v6592_v12 = vld [vmem:[%s8675_s1 + $0x8] sm:$0xff]  ;;  %v6591_v14 = vld [vmem:[%s8675_s1] sm:$0xff]  ;;  %s8813_s12 = smov (!%p313_p1, %s4981_s12), 127 }
  0x2b   : > { %6657 = vmatpush.bf16.msra.mxu2 %v6597_v2  ;;  %2501 = vmatpush.bf16.msra.mxu0 %v6597_v2  ;;  %v6600_v13 = vld [vmem:[%s8675_s1 + $0x48] sm:$0xff]  ;;  %v6599_v15 = vld [vmem:[%s8675_s1 + $0x40] sm:$0xff]  ;;  %v6614_v20 = vld [vmem:[%s8675_s1 + $0xb8] sm:$0xff]  ;;  %s4982_s21 = sshll.u32 %s8813_s12, 2 }
  0x2c   : > { %6665 = vmatpush.bf16.msra.mxu3 %v6605_v3  ;;  %2670 = vmatpush.bf16.msra.mxu1 %v6605_v3  ;;  %v5497_v16 = vld [vmem:[%s7025_s29 + $0x400] sm:$0xf]  ;;  %v6463_v18 = vld [vmem:[%s7025_s29 + $0x404] sm:$0xf]  ;;  %v6622_v21 = vld [vmem:[%s8675_s1 + $0xf8] sm:$0xff]  ;;  %s8347_s18 = scalar_lea.vmem %s8679_s5, %s4982_s21 }
  0x2d   : > { %v6467_v17 = vld [vmem:[%s7025_s29 + $0x41c] sm:$0xf0]  ;;  %v5499_v19 = vld [vmem:[%s7025_s29 + $0x420] sm:$0xf0]  ;;  %v6613_v30 = vld [vmem:[%s8675_s1 + $0xb0] sm:$0xff] }
  0x2e   : > { %v4985_v22 = vld [vmem:[%s7025_s29] sm:$0xf]  ;;  %v6335_v24 = vld [vmem:[%s7025_s29 + $0x4] sm:$0xf]  ;;  %v5498_v26 = vor.u32 %v6467_v17, %v5497_v16  ;;  %v5502_v27 = vor.u32 %v6463_v18, %v5499_v19  ;;  %v6621_v31 = vld [vmem:[%s8675_s1 + $0xf0] sm:$0xff] }
  0x2f   : > { %6658 = vmatpush.bf16.msra.mxu2 %v6596_v4  ;;  %2502 = vmatpush.bf16.msra.mxu0 %v6596_v4  ;;  %v6339_v23 = vld [vmem:[%s7025_s29 + $0x1c] sm:$0xf0]  ;;  %v4987_v25 = vld [vmem:[%s7025_s29 + $0x20] sm:$0xf0]  ;;  %v6612_v56 = vld [vmem:[%s8675_s1 + $0xa8] sm:$0xff] }
  0x30   : > { %6666 = vmatpush.bf16.msra.mxu3 %v6604_v5  ;;  %2671 = vmatpush.bf16.msra.mxu1 %v6604_v5  ;;  %v4986_v28 = vor.u32 %v6339_v23, %v4985_v22  ;;  %v4990_v29 = vor.u32 %v6335_v24, %v4987_v25  ;;  %v5529_v32 = vld [vmem:[%s7025_s29 + $0x440] sm:$0xf]  ;;  %v6471_v34 = vld [vmem:[%s7025_s29 + $0x444] sm:$0xf]  ;;  %v6620_v57 = vld [vmem:[%s8675_s1 + $0xe8] sm:$0xff] }
  0x31   : > { %v6475_v33 = vld [vmem:[%s7025_s29 + $0x45c] sm:$0xf0]  ;;  %v5531_v35 = vld [vmem:[%s7025_s29 + $0x460] sm:$0xf0] }
  0x32   : > { %v5017_v36 = vld [vmem:[%s7025_s29 + $0x40] sm:$0xf]  ;;  %v6343_v38 = vld [vmem:[%s7025_s29 + $0x44] sm:$0xf]  ;;  %v5530_v40 = vor.u32 %v6475_v33, %v5529_v32  ;;  %v5534_v41 = vor.u32 %v6471_v34, %v5531_v35 }
  0x33   : > { %6659 = vmatpush.bf16.msra.mxu2 %v6595_v6  ;;  %2503 = vmatpush.bf16.msra.mxu0 %v6595_v6  ;;  %v6347_v37 = vld [vmem:[%s7025_s29 + $0x5c] sm:$0xf0]  ;;  %v5019_v39 = vld [vmem:[%s7025_s29 + $0x60] sm:$0xf0] }
  0x34   : > { %6667 = vmatpush.bf16.msra.mxu3 %v6603_v7  ;;  %2672 = vmatpush.bf16.msra.mxu1 %v6603_v7  ;;  %v5018_v42 = vor.u32 %v6347_v37, %v5017_v36  ;;  %v5022_v43 = vor.u32 %v6343_v38, %v5019_v39  ;;  %v5561_v44 = vld [vmem:[%s7025_s29 + $0x480] sm:$0xf]  ;;  %v6479_v46 = vld [vmem:[%s7025_s29 + $0x484] sm:$0xf] }
  0x35   : > { %v6483_v45 = vld [vmem:[%s7025_s29 + $0x49c] sm:$0xf0]  ;;  %v5563_v47 = vld [vmem:[%s7025_s29 + $0x4a0] sm:$0xf0] }
  0x36   : > { %v5049_v48 = vld [vmem:[%s7025_s29 + $0x80] sm:$0xf]  ;;  %v6351_v50 = vld [vmem:[%s7025_s29 + $0x84] sm:$0xf]  ;;  %v5562_v52 = vor.u32 %v6483_v45, %v5561_v44  ;;  %v5566_v53 = vor.u32 %v6479_v46, %v5563_v47  ;;  %v6610_v44 = vld [vmem:[%s8675_s1 + $0x98] sm:$0xff] }
  0x37   : > { %6660 = vmatpush.bf16.msra.mxu2 %v6594_v8  ;;  %2504 = vmatpush.bf16.msra.mxu0 %v6594_v8  ;;  %v6355_v49 = vld [vmem:[%s7025_s29 + $0x9c] sm:$0xf0]  ;;  %v5051_v51 = vld [vmem:[%s7025_s29 + $0xa0] sm:$0xf0]  ;;  %v6618_v45 = vld [vmem:[%s8675_s1 + $0xd8] sm:$0xff] }
  0x38   : > { %6668 = vmatpush.bf16.msra.mxu3 %v6602_v9  ;;  %2673 = vmatpush.bf16.msra.mxu1 %v6602_v9  ;;  %v5050_v54 = vor.u32 %v6355_v49, %v5049_v48  ;;  %v5054_v55 = vor.u32 %v6351_v50, %v5051_v51  ;;  %v5593_v58 = vld [vmem:[%s7025_s29 + $0x4c0] sm:$0xf]  ;;  %v6487_v60 = vld [vmem:[%s7025_s29 + $0x4c4] sm:$0xf] }
  0x39   : > { %v6491_v59 = vld [vmem:[%s7025_s29 + $0x4dc] sm:$0xf0]  ;;  %v5595_v61 = vld [vmem:[%s7025_s29 + $0x4e0] sm:$0xf0] }
  0x3a   : > { %v5081_v62 = vld [vmem:[%s7025_s29 + $0xc0] sm:$0xf]  ;;  %v6359_v0 = vld [vmem:[%s7025_s29 + $0xc4] sm:$0xf]  ;;  %v5594_v2 = vor.u32 %v6491_v59, %v5593_v58  ;;  %v5598_v3 = vor.u32 %v6487_v60, %v5595_v61 }
  0x3b   : > { %6661 = vmatpush.bf16.msra.mxu2 %v6593_v10  ;;  %2505 = vmatpush.bf16.msra.mxu0 %v6593_v10  ;;  %v6363_v63 = vld [vmem:[%s7025_s29 + $0xdc] sm:$0xf0]  ;;  %v5083_v1 = vld [vmem:[%s7025_s29 + $0xe0] sm:$0xf0] }
  0x3c   : > { %6669 = vmatpush.bf16.msra.mxu3 %v6601_v11  ;;  %2674 = vmatpush.bf16.msra.mxu1 %v6601_v11  ;;  %v5082_v4 = vor.u32 %v6363_v63, %v5081_v62  ;;  %v5086_v5 = vor.u32 %v6359_v0, %v5083_v1  ;;  %v5625_v6 = vld [vmem:[%s7025_s29 + $0x500] sm:$0xf]  ;;  %v6495_v8 = vld [vmem:[%s7025_s29 + $0x504] sm:$0xf] }
  0x3d   : > { %v6499_v7 = vld [vmem:[%s7025_s29 + $0x51c] sm:$0xf0]  ;;  %v5627_v9 = vld [vmem:[%s7025_s29 + $0x520] sm:$0xf0] }
  0x3e   : > { %v5113_v10 = vld [vmem:[%s7025_s29 + $0x100] sm:$0xf]  ;;  %v6503_v22 = vld [vmem:[%s7025_s29 + $0x544] sm:$0xf] }
  0x3f   : > { %6662 = vmatpush.bf16.msra.mxu2 %v6592_v12  ;;  %2506 = vmatpush.bf16.msra.mxu0 %v6592_v12  ;;  %v6371_v11 = vld [vmem:[%s7025_s29 + $0x11c] sm:$0xf0]  ;;  %v6367_v12 = vld [vmem:[%s7025_s29 + $0x104] sm:$0xf] }
  0x40   : > { %6670 = vmatpush.bf16.msra.mxu3 %v6600_v13  ;;  %2675 = vmatpush.bf16.msra.mxu1 %v6600_v13  ;;  %v5115_v13 = vld [vmem:[%s7025_s29 + $0x120] sm:$0xf0]  ;;  %v5114_v16 = vor.u32 %v6371_v11, %v5113_v10  ;;  %v5145_v24 = vld [vmem:[%s7025_s29 + $0x140] sm:$0xf]  ;;  %v6609_v10 = vld [vmem:[%s8675_s1 + $0x90] sm:$0xff] }
  0x41   : > { %v5118_v17 = vor.u32 %v6367_v12, %v5115_v13  ;;  %v6611_v18 = vld [vmem:[%s8675_s1 + $0xa0] sm:$0xff]  ;;  %v6617_v11 = vld [vmem:[%s8675_s1 + $0xd0] sm:$0xff] }
  0x42   : > { %v6619_v19 = vld [vmem:[%s8675_s1 + $0xe0] sm:$0xff] }
  0x43   : > { %6663 = vmatpush.bf16.msra.mxu2 %v6591_v14  ;;  %2507 = vmatpush.bf16.msra.mxu0 %v6591_v14  ;;  %v5626_v14 = vor.u32 %v6499_v7, %v5625_v6  ;;  %v5659_v23 = vld [vmem:[%s7025_s29 + $0x560] sm:$0xf0]  ;;  %v6379_v25 = vld [vmem:[%s7025_s29 + $0x15c] sm:$0xf0] }
  0x44   : > { %6671 = vmatpush.bf16.msra.mxu3 %v6599_v15  ;;  %2676 = vmatpush.bf16.msra.mxu1 %v6599_v15  ;;  %v5630_v15 = vor.u32 %v6495_v8, %v5627_v9  ;;  %v5689_v32 = vld [vmem:[%s7025_s29 + $0x580] sm:$0xf]  ;;  %v6511_v34 = vld [vmem:[%s7025_s29 + $0x584] sm:$0xf] }
  0x45   : > { %v6515_v33 = vld [vmem:[%s7025_s29 + $0x59c] sm:$0xf0]  ;;  %v5691_v35 = vld [vmem:[%s7025_s29 + $0x5a0] sm:$0xf0] }
  0x46   : > { %2588 = vmatmul.bf16.vlgmr.msra.gmra.mxu2 %v5498_v26  ;;  %2508 = vmatmul.bf16.vlgmr.msra.gmra.mxu0 %v4986_v28  ;;  %v6375_v26 = vld [vmem:[%s7025_s29 + $0x144] sm:$0xf]  ;;  %v5177_v36 = vld [vmem:[%s7025_s29 + $0x180] sm:$0xf] }
  0x47   : > { %2838 = vmatpush.bf16.msrb.mxu2 %v6614_v20  ;;  %2757 = vmatmul.bf16.vlgmr.msra.gmra.mxu3 %v5502_v27  ;;  %v5657_v20 = vld [vmem:[%s7025_s29 + $0x540] sm:$0xf]  ;;  %v5147_v27 = vld [vmem:[%s7025_s29 + $0x160] sm:$0xf0] }
  0x48   : > { %3007 = vmatpush.bf16.msrb.mxu3 %v6622_v21  ;;  %2677 = vmatmul.bf16.vlgmr.msra.gmra.mxu1 %v4990_v29  ;;  %v6507_v21 = vld [vmem:[%s7025_s29 + $0x55c] sm:$0xf0]  ;;  %v5662_v29 = vor.u32 %v6503_v22, %v5659_v23  ;;  %v6383_v38 = vld [vmem:[%s7025_s29 + $0x184] sm:$0xf] }
  0x49   : > { %v5658_v28 = vor.u32 %v6507_v21, %v5657_v20  ;;  %v6387_v37 = vld [vmem:[%s7025_s29 + $0x19c] sm:$0xf0]  ;;  %v5179_v39 = vld [vmem:[%s7025_s29 + $0x1a0] sm:$0xf0] }
  0x4a   : > { %v5721_v46 = vld [vmem:[%s7025_s29 + $0x5c0] sm:$0xf]  ;;  %v6519_v48 = vld [vmem:[%s7025_s29 + $0x5c4] sm:$0xf] }
  0x4b   : > { %2839 = vmatpush.bf16.msrb.mxu2 %v6613_v30  ;;  %v5146_v30 = vor.u32 %v6379_v25, %v5145_v24  ;;  %v6523_v47 = vld [vmem:[%s7025_s29 + $0x5dc] sm:$0xf0]  ;;  %v5723_v49 = vld [vmem:[%s7025_s29 + $0x5e0] sm:$0xf0] }
  0x4c   : > { %3008 = vmatpush.bf16.msrb.mxu3 %v6621_v31  ;;  %v5150_v31 = vor.u32 %v6375_v26, %v5147_v27  ;;  %v5209_v50 = vld [vmem:[%s7025_s29 + $0x1c0] sm:$0xf]  ;;  %v6527_v60 = vld [vmem:[%s7025_s29 + $0x604] sm:$0xf] }
  0x4d   : > { %v6395_v51 = vld [vmem:[%s7025_s29 + $0x1dc] sm:$0xf0]  ;;  %v5755_v61 = vld [vmem:[%s7025_s29 + $0x620] sm:$0xf0] }
  0x4e   : > { %v5753_v58 = vld [vmem:[%s7025_s29 + $0x600] sm:$0xf]  ;;  %v6399_v0 = vld [vmem:[%s7025_s29 + $0x204] sm:$0xf] }
  0x4f   : > { %2840 = vmatpush.bf16.msrb.mxu2 %v6612_v56  ;;  %v5210_v56 = vor.u32 %v6395_v51, %v5209_v50  ;;  %v6531_v59 = vld [vmem:[%s7025_s29 + $0x61c] sm:$0xf0]  ;;  %v5243_v1 = vld [vmem:[%s7025_s29 + $0x220] sm:$0xf0] }
  0x50   : > { %3009 = vmatpush.bf16.msrb.mxu3 %v6620_v57  ;;  %v5241_v62 = vld [vmem:[%s7025_s29 + $0x200] sm:$0xf]  ;;  %v5246_v6 = vor.u32 %v6399_v0, %v5243_v1  ;;  %v6535_v20 = vld [vmem:[%s7025_s29 + $0x644] sm:$0xf] }
  0x51   : > { %v6403_v63 = vld [vmem:[%s7025_s29 + $0x21c] sm:$0xf0]  ;;  %v5787_v21 = vld [vmem:[%s7025_s29 + $0x660] sm:$0xf0] }
  0x52   : > { %v5273_v22 = vld [vmem:[%s7025_s29 + $0x240] sm:$0xf]  ;;  %v6407_v26 = vld [vmem:[%s7025_s29 + $0x244] sm:$0xf] }
  0x53   : > { %2841 = vmatpush.bf16.msrb.mxu2 %v6611_v18  ;;  %v6411_v25 = vld [vmem:[%s7025_s29 + $0x25c] sm:$0xf0]  ;;  %v5275_v27 = vld [vmem:[%s7025_s29 + $0x260] sm:$0xf0] }
  0x54   : > { %3010 = vmatpush.bf16.msrb.mxu3 %v6619_v19  ;;  %v6539_v19 = vld [vmem:[%s7025_s29 + $0x65c] sm:$0xf0]  ;;  %v6415_v50 = vld [vmem:[%s7025_s29 + $0x284] sm:$0xf] }
  0x55   : > { %v5307_v51 = vld [vmem:[%s7025_s29 + $0x2a0] sm:$0xf0] }
  0x56   : > { %2593 = vmatmul.bf16.gmra.mxu2 %v5530_v40  ;;  %2513 = vmatmul.bf16.gmra.mxu0 %v5018_v42  ;;  %v5690_v40 = vor.u32 %v6515_v33, %v5689_v32  ;;  %v5178_v42 = vor.u32 %v6387_v37, %v5177_v36  ;;  %v5278_v32 = vor.u32 %v6407_v26, %v5275_v27 }
  0x57   : > { %2762 = vmatmul.bf16.gmra.mxu3 %v5534_v41  ;;  %v5694_v41 = vor.u32 %v6511_v34, %v5691_v35  ;;  %2842 = vmatpush.bf16.msrb.mxu2 %v6610_v44  ;;  %v6543_v44 = vld [vmem:[%s7025_s29 + $0x684] sm:$0xf] }
  0x58   : > { %2682 = vmatmul.bf16.gmra.mxu1 %v5022_v43  ;;  %v5182_v43 = vor.u32 %v6383_v38, %v5179_v39  ;;  %3011 = vmatpush.bf16.msrb.mxu3 %v6618_v45  ;;  %v5819_v45 = vld [vmem:[%s7025_s29 + $0x6a0] sm:$0xf0] }
  0x5b   : > { %2843 = vmatpush.bf16.msrb.mxu2 %v6609_v10  ;;  %v5337_v10 = vld [vmem:[%s7025_s29 + $0x2c0] sm:$0xf] }
  0x5c   : > { %3012 = vmatpush.bf16.msrb.mxu3 %v6617_v11 }
  0x66   : > { %2598 = vmatmul.bf16.gmra.mxu2 %v5562_v52  ;;  %2518 = vmatmul.bf16.gmra.mxu0 %v5050_v54  ;;  %v6391_v52 = vld [vmem:[%s7025_s29 + $0x1c4] sm:$0xf]  ;;  %v5722_v54 = vor.u32 %v6523_v47, %v5721_v46  ;;  %v5305_v46 = vld [vmem:[%s7025_s29 + $0x280] sm:$0xf] }
  0x67   : > { %2767 = vmatmul.bf16.gmra.mxu3 %v5566_v53  ;;  %v5211_v53 = vld [vmem:[%s7025_s29 + $0x1e0] sm:$0xf0] }
  0x68   : > { %2687 = vmatmul.bf16.gmra.mxu1 %v5054_v55  ;;  %v5726_v55 = vor.u32 %v6519_v48, %v5723_v49  ;;  %v5214_v57 = vor.u32 %v6391_v52, %v5211_v53  ;;  %v6419_v49 = vld [vmem:[%s7025_s29 + $0x29c] sm:$0xf0] }
  0x76   : > { %2603 = vmatmul.bf16.gmra.mxu2 %v5594_v2  ;;  %2523 = vmatmul.bf16.gmra.mxu0 %v5082_v4  ;;  %v5754_v2 = vor.u32 %v6531_v59, %v5753_v58  ;;  %v6630_v4 = vld [vmem:[%s8675_s1 + $0x138] sm:$0xff] }
  0x77   : > { %2772 = vmatmul.bf16.gmra.mxu3 %v5598_v3  ;;  %v5758_v3 = vor.u32 %v6527_v60, %v5755_v61  ;;  %3176 = vmatpush.bf16.msrb.mxu0 %v6630_v4  ;;  %v6608_v61 = vld [vmem:[%s8675_s1 + $0x88] sm:$0xff]  ;;  %v5849_v4 = vld [vmem:[%s7025_s29 + $0x6c0] sm:$0xf] }
  0x78   : > { %2692 = vmatmul.bf16.gmra.mxu1 %v5086_v5  ;;  %v5242_v5 = vor.u32 %v6403_v63, %v5241_v62  ;;  %v6616_v62 = vld [vmem:[%s8675_s1 + $0xc8] sm:$0xff]  ;;  %2844 = vmatpush.bf16.msrb.mxu2 %v6608_v61 }
  0x79   : > { %3013 = vmatpush.bf16.msrb.mxu3 %v6616_v62 }
  0x86   : > { %2608 = vmatmul.bf16.gmra.mxu2 %v5626_v14  ;;  %2528 = vmatmul.bf16.gmra.mxu0 %v5114_v16 }
  0x87   : > { %2777 = vmatmul.bf16.gmra.mxu3 %v5630_v15 }
  0x88   : > { %2697 = vmatmul.bf16.gmra.mxu1 %v5118_v17  ;;  %v5785_v17 = vld [vmem:[%s7025_s29 + $0x640] sm:$0xf] }
  0x96   : > { %2613 = vmatmul.bf16.gmra.mxu2 %v5658_v28  ;;  %2533 = vmatmul.bf16.gmra.mxu0 %v5146_v30  ;;  %v5790_v30 = vor.u32 %v6535_v20, %v5787_v21 }
  0x97   : > { %2782 = vmatmul.bf16.gmra.mxu3 %v5662_v29  ;;  %v5786_v29 = vor.u32 %v6539_v19, %v5785_v17 }
  0x98   : > { %2702 = vmatmul.bf16.gmra.mxu1 %v5150_v31  ;;  %v5274_v31 = vor.u32 %v6411_v25, %v5273_v22 }
  0xa6   : > { %2618 = vmatmul.bf16.gmra.mxu2 %v5690_v40  ;;  %2538 = vmatmul.bf16.gmra.mxu0 %v5178_v42 }
  0xa7   : > { %2787 = vmatmul.bf16.gmra.mxu3 %v5694_v41  ;;  %v5817_v41 = vld [vmem:[%s7025_s29 + $0x680] sm:$0xf] }
  0xa8   : > { %2707 = vmatmul.bf16.gmra.mxu1 %v5182_v43  ;;  %v6547_v43 = vld [vmem:[%s7025_s29 + $0x69c] sm:$0xf0] }
  0xa9   : > { %v5818_v53 = vor.u32 %v6547_v43, %v5817_v41  ;;  %v6435_v43 = vld [vmem:[%s7025_s29 + $0x31c] sm:$0xf0] }
  0xb6   : > { %2623 = vmatmul.bf16.gmra.mxu2 %v5722_v54  ;;  %2543 = vmatmul.bf16.gmra.mxu0 %v5210_v56  ;;  %v5822_v54 = vor.u32 %v6543_v44, %v5819_v45  ;;  %v5306_v56 = vor.u32 %v6419_v49, %v5305_v46  ;;  %v6431_v44 = vld [vmem:[%s7025_s29 + $0x304] sm:$0xf]  ;;  %v6628_v49 = vld [vmem:[%s8675_s1 + $0x128] sm:$0xff] }
  0xb7   : > { %2792 = vmatmul.bf16.gmra.mxu3 %v5726_v55  ;;  %v6629_v55 = vld [vmem:[%s8675_s1 + $0x130] sm:$0xff]  ;;  %v5371_v45 = vld [vmem:[%s7025_s29 + $0x320] sm:$0xf0] }
  0xb8   : > { %2712 = vmatmul.bf16.gmra.mxu1 %v5214_v57  ;;  %v5310_v57 = vor.u32 %v6415_v50, %v5307_v51  ;;  %3177 = vmatpush.bf16.msrb.mxu0 %v6629_v55  ;;  %v5374_v51 = vor.u32 %v6431_v44, %v5371_v45  ;;  %v6575_v45 = vld [vmem:[%s7025_s29 + $0x784] sm:$0xf] }
  0xbc   : > { %3178 = vmatpush.bf16.msrb.mxu0 %v6628_v49  ;;  %v5433_v49 = vld [vmem:[%s7025_s29 + $0x380] sm:$0xf] }
  0xc3   : > { %v2509_v7 = vpop.f32.mrf.mxu0 }
  0xc5   : > { %v2678_v8 = vpop.f32.mrf.mxu1 }
  0xc6   : > { %2628 = vmatmul.bf16.gmra.mxu2 %v5754_v2  ;;  %v7188_v9 = vadd.f32 %v2678_v8, %v2509_v7  ;;  %2548 = vmatmul.bf16.gmra.mxu0 %v5242_v5  ;;  %v6551_v7 = vld [vmem:[%s7025_s29 + $0x6c4] sm:$0xf] }
  0xc7   : > { %2797 = vmatmul.bf16.gmra.mxu3 %v5758_v3  ;;  %v5851_v8 = vld [vmem:[%s7025_s29 + $0x6e0] sm:$0xf0] }
  0xc8   : > { %2717 = vmatmul.bf16.gmra.mxu1 %v5246_v6  ;;  %v6555_v6 = vld [vmem:[%s7025_s29 + $0x6dc] sm:$0xf0]  ;;  %v5854_v20 = vor.u32 %v6551_v7, %v5851_v8 }
  0xc9   : > { %v2589_v12 = vpop.f32.mrf.mxu2  ;;  %v5850_v19 = vor.u32 %v6555_v6, %v5849_v4  ;;  %v6567_v4 = vld [vmem:[%s7025_s29 + $0x744] sm:$0xf]  ;;  %v5401_v7 = vld [vmem:[%s7025_s29 + $0x340] sm:$0xf] }
  0xca   : > { %v2758_v13 = vpop.f32.mrf.mxu3  ;;  %v5915_v6 = vld [vmem:[%s7025_s29 + $0x760] sm:$0xf0]  ;;  %v6443_v8 = vld [vmem:[%s7025_s29 + $0x35c] sm:$0xf0] }
  0xcb   : > { %v7196_v14 = vadd.f32 %v2758_v13, %v2589_v12  ;;  %v2511_v15 = vpop.f32.mrf.mxu0  ;;  %v6427_v13 = vld [vmem:[%s7025_s29 + $0x2dc] sm:$0xf0] }
  0xcc   : > { %v5338_v21 = vor.u32 %v6427_v13, %v5337_v10  ;;  %v5403_v13 = vld [vmem:[%s7025_s29 + $0x360] sm:$0xf0] }
  0xcd   : > { %v2680_v16 = vpop.f32.mrf.mxu1 }
  0xce   : > { %v7199_v18 = vadd.f32 %v2680_v16, %v2511_v15  ;;  %v6423_v15 = vld [vmem:[%s7025_s29 + $0x2c4] sm:$0xf] }
  0xcf   : > { %v5339_v16 = vld [vmem:[%s7025_s29 + $0x2e0] sm:$0xf0] }
  0xd0   : > { %v5342_v22 = vor.u32 %v6423_v15, %v5339_v16  ;;  %v6638_v15 = vld [vmem:[%s8675_s1 + $0x178] sm:$0xff] }
  0xd1   : > { %v2591_v23 = vpop.f32.mrf.mxu2  ;;  %3345 = vmatpush.bf16.msrb.mxu1 %v6638_v15 }
  0xd2   : > { %v2760_v24 = vpop.f32.mrf.mxu3 }
  0xd3   : > { %v7208_v28 = vadd.f32 %v2760_v24, %v2591_v23  ;;  %v2514_v33 = vpop.f32.mrf.mxu0 }
  0xd5   : > { %v2683_v34 = vpop.f32.mrf.mxu1 }
  0xd6   : > { %2633 = vmatmul.bf16.gmra.mxu2 %v5786_v29  ;;  %v7210_v35 = vadd.f32 %v2683_v34, %v2514_v33  ;;  %2553 = vmatmul.bf16.gmra.mxu0 %v5274_v31  ;;  %v6563_v34 = vld [vmem:[%s7025_s29 + $0x71c] sm:$0xf0] }
  0xd7   : > { %2802 = vmatmul.bf16.gmra.mxu3 %v5790_v30 }
  0xd8   : > { %2722 = vmatmul.bf16.gmra.mxu1 %v5278_v32  ;;  %v5881_v32 = vld [vmem:[%s7025_s29 + $0x700] sm:$0xf] }
  0xd9   : > { %v2594_v36 = vpop.f32.mrf.mxu2 }
  0xda   : > { %v2763_v37 = vpop.f32.mrf.mxu3 }
  0xdb   : > { %v7212_v38 = vadd.f32 %v2763_v37, %v2594_v36  ;;  %v2516_v39 = vpop.f32.mrf.mxu0  ;;  %v6559_v36 = vld [vmem:[%s7025_s29 + $0x704] sm:$0xf] }
  0xdc   : > { %v5883_v37 = vld [vmem:[%s7025_s29 + $0x720] sm:$0xf0] }
  0xdd   : > { %v2685_v40 = vpop.f32.mrf.mxu1 }
  0xde   : > { %v7215_v42 = vadd.f32 %v2685_v40, %v2516_v39  ;;  %v5369_v39 = vld [vmem:[%s7025_s29 + $0x300] sm:$0xf] }
  0xdf   : > { %v5370_v50 = vor.u32 %v6435_v43, %v5369_v39  ;;  %v6579_v43 = vld [vmem:[%s7025_s29 + $0x79c] sm:$0xf0] }
  0xe1   : > { %v2596_v47 = vpop.f32.mrf.mxu2 }
  0xe2   : > { %v2765_v48 = vpop.f32.mrf.mxu3 }
  0xe3   : > { %v7224_v52 = vadd.f32 %v2765_v48, %v2596_v47  ;;  %v2519_v58 = vpop.f32.mrf.mxu0  ;;  %v5882_v47 = vor.u32 %v6563_v34, %v5881_v32  ;;  %v5886_v48 = vor.u32 %v6559_v36, %v5883_v37  ;;  %v6636_v32 = vld [vmem:[%s8675_s1 + $0x168] sm:$0xff]  ;;  %v6627_v36 = vld [vmem:[%s8675_s1 + $0x120] sm:$0xff] }
  0xe4   : > { %v6635_v37 = vld [vmem:[%s8675_s1 + $0x160] sm:$0xff]  ;;  %3179 = vmatpush.bf16.msrb.mxu0 %v6627_v36 }
  0xe5   : > { %v2688_v59 = vpop.f32.mrf.mxu1  ;;  %v5979_v36 = vld [vmem:[%s7025_s29 + $0x7e0] sm:$0xf0] }
  0xe6   : > { %2638 = vmatmul.bf16.gmra.mxu2 %v5818_v53  ;;  %v7229_v60 = vadd.f32 %v2688_v59, %v2519_v58  ;;  %2558 = vmatmul.bf16.gmra.mxu0 %v5306_v56  ;;  %v6607_v56 = vld [vmem:[%s8675_s1 + $0x80] sm:$0xff] }
  0xe7   : > { %2807 = vmatmul.bf16.gmra.mxu3 %v5822_v54  ;;  %2845 = vmatpush.bf16.msrb.mxu2 %v6607_v56  ;;  %v5435_v56 = vld [vmem:[%s7025_s29 + $0x3a0] sm:$0xf0] }
  0xe8   : > { %2727 = vmatmul.bf16.gmra.mxu1 %v5310_v57  ;;  %v6615_v57 = vld [vmem:[%s8675_s1 + $0xc0] sm:$0xff] }
  0xe9   : > { %v2599_v63 = vpop.f32.mrf.mxu2  ;;  %3014 = vmatpush.bf16.msrb.mxu3 %v6615_v57  ;;  %v6634_v57 = vld [vmem:[%s8675_s1 + $0x158] sm:$0xff] }
  0xea   : > { %v2768_v0 = vpop.f32.mrf.mxu3 }
  0xeb   : > { %v7237_v1 = vadd.f32 %v2768_v0, %v2599_v63  ;;  %v2521_v2 = vpop.f32.mrf.mxu0  ;;  %v5913_v0 = vld [vmem:[%s7025_s29 + $0x740] sm:$0xf] }
  0xed   : > { %v2690_v3 = vpop.f32.mrf.mxu1 }
  0xee   : > { %v7240_v5 = vadd.f32 %v2690_v3, %v2521_v2  ;;  %v6571_v3 = vld [vmem:[%s7025_s29 + $0x75c] sm:$0xf0] }
  0xf1   : > { %v2601_v11 = vpop.f32.mrf.mxu2 }
  0xf2   : > { %v2770_v12 = vpop.f32.mrf.mxu3 }
  0xf3   : > { %v7249_v17 = vadd.f32 %v2770_v12, %v2601_v11  ;;  %v2524_v23 = vpop.f32.mrf.mxu0  ;;  %v6439_v12 = vld [vmem:[%s7025_s29 + $0x344] sm:$0xf] }
  0xf5   : > { %v2693_v24 = vpop.f32.mrf.mxu1 }
  0xf6   : > { %2643 = vmatmul.bf16.gmra.mxu2 %v5850_v19  ;;  %v7251_v25 = vadd.f32 %v2693_v24, %v2524_v23  ;;  %2563 = vmatmul.bf16.gmra.mxu0 %v5338_v21  ;;  %v5914_v19 = vor.u32 %v6571_v3, %v5913_v0  ;;  %v5402_v21 = vor.u32 %v6443_v8, %v5401_v7  ;;  %v6633_v7 = vld [vmem:[%s8675_s1 + $0x150] sm:$0xff] }
  0xf7   : > { %2812 = vmatmul.bf16.gmra.mxu3 %v5854_v20  ;;  %v5918_v20 = vor.u32 %v6567_v4, %v5915_v6 }
  0xf8   : > { %2732 = vmatmul.bf16.gmra.mxu1 %v5342_v22  ;;  %v5406_v22 = vor.u32 %v6439_v12, %v5403_v13  ;;  %v6624_v12 = vld [vmem:[%s8675_s1 + $0x108] sm:$0xff] }
  0xf9   : > { %v2604_v26 = vpop.f32.mrf.mxu2 }
  0xfa   : > { %v2773_v27 = vpop.f32.mrf.mxu3 }
  0xfb   : > { %v7253_v29 = vadd.f32 %v2773_v27, %v2604_v26  ;;  %v2526_v30 = vpop.f32.mrf.mxu0  ;;  %v6637_v26 = vld [vmem:[%s8675_s1 + $0x170] sm:$0xff] }
  0xfc   : > { %3346 = vmatpush.bf16.msrb.mxu1 %v6637_v26  ;;  %v5977_v26 = vld [vmem:[%s7025_s29 + $0x7c0] sm:$0xf] }
  0xfd   : > { %v2695_v31 = vpop.f32.mrf.mxu1 }
  0xfe   : > { %v7256_v33 = vadd.f32 %v2695_v31, %v2526_v30 }
 0x100   : > { %3347 = vmatpush.bf16.msrb.mxu1 %v6636_v32  ;;  %v6583_v32 = vld [vmem:[%s7025_s29 + $0x7c4] sm:$0xf] }
 0x101   : > { %v2606_v40 = vpop.f32.mrf.mxu2 }
 0x102   : > { %v2775_v41 = vpop.f32.mrf.mxu3 }
 0x103   : > { %v7265_v46 = vadd.f32 %v2775_v41, %v2606_v40  ;;  %v2529_v53 = vpop.f32.mrf.mxu0  ;;  %v5945_v41 = vld [vmem:[%s7025_s29 + $0x780] sm:$0xf] }
 0x104   : > { %3348 = vmatpush.bf16.msrb.mxu1 %v6635_v37  ;;  %v5465_v37 = vld [vmem:[%s7025_s29 + $0x3c0] sm:$0xf] }
 0x105   : > { %v2698_v54 = vpop.f32.mrf.mxu1 }
 0x106   : > { %2648 = vmatmul.bf16.gmra.mxu2 %v5882_v47  ;;  %v7270_v55 = vadd.f32 %v2698_v54, %v2529_v53  ;;  %2568 = vmatmul.bf16.gmra.mxu0 %v5370_v50  ;;  %v5947_v47 = vld [vmem:[%s7025_s29 + $0x7a0] sm:$0xf0]  ;;  %v6451_v50 = vld [vmem:[%s7025_s29 + $0x39c] sm:$0xf0] }
 0x107   : > { %2817 = vmatmul.bf16.gmra.mxu3 %v5886_v48  ;;  %v6626_v48 = vld [vmem:[%s8675_s1 + $0x118] sm:$0xff]  ;;  %v6447_v54 = vld [vmem:[%s7025_s29 + $0x384] sm:$0xf]  ;;  %v5434_v0 = vor.u32 %v6451_v50, %v5433_v49  ;;  %v5982_v49 = vor.u32 %v6583_v32, %v5979_v36 }
 0x108   : > { %2737 = vmatmul.bf16.gmra.mxu1 %v5374_v51  ;;  %3180 = vmatpush.bf16.msrb.mxu0 %v6626_v48  ;;  %v5438_v3 = vor.u32 %v6447_v54, %v5435_v56 }
 0x109   : > { %v2609_v58 = vpop.f32.mrf.mxu2  ;;  %3349 = vmatpush.bf16.msrb.mxu1 %v6634_v57 }
 0x10a   : > { %v2778_v59 = vpop.f32.mrf.mxu3 }
 0x10b   : > { %v7278_v61 = vadd.f32 %v2778_v59, %v2609_v58  ;;  %v2531_v62 = vpop.f32.mrf.mxu0  ;;  %v5946_v59 = vor.u32 %v6579_v43, %v5945_v41  ;;  %v6459_v41 = vld [vmem:[%s7025_s29 + $0x3dc] sm:$0xf0]  ;;  %v6455_v43 = vld [vmem:[%s7025_s29 + $0x3c4] sm:$0xf] }
 0x10c   : > { %v5466_v50 = vor.u32 %v6459_v41, %v5465_v37 }
 0x10d   : > { %v2700_v63 = vpop.f32.mrf.mxu1  ;;  %3350 = vmatpush.bf16.msrb.mxu1 %v6633_v7  ;;  %v6336_v7 = vld [vmem:[%s7025_s29 + $0xc] sm:$0xf] }
 0x10e   : > { %v7281_v2 = vadd.f32 %v2700_v63, %v2531_v62  ;;  %v5950_v62 = vor.u32 %v6575_v45, %v5947_v47  ;;  %v6625_v63 = vld [vmem:[%s8675_s1 + $0x110] sm:$0xff]  ;;  %v5467_v45 = vld [vmem:[%s7025_s29 + $0x3e0] sm:$0xf0] }
 0x10f   : > { %3181 = vmatpush.bf16.msrb.mxu0 %v6625_v63 }
 0x111   : > { %v2611_v10 = vpop.f32.mrf.mxu2 }
 0x112   : > { %v2780_v11 = vpop.f32.mrf.mxu3 }
 0x113   : > { %v7293_v16 = vadd.f32 %v2780_v11, %v2611_v10  ;;  %v2534_v23 = vpop.f32.mrf.mxu0  ;;  %v6646_v10 = vld [vmem:[%s8675_s1 + $0x1b8] sm:$0xff]  ;;  %3182 = vmatpush.bf16.msrb.mxu0 %v6624_v12 }
 0x114   : > { %v6654_v11 = vld [vmem:[%s8675_s1 + $0x1f8] sm:$0xff]  ;;  %3514 = vmatpush.bf16.msra.mxu2 %v6646_v10  ;;  %v4995_v10 = vld [vmem:[%s7025_s29 + $0x28] sm:$0xf0] }
 0x115   : > { %v2703_v24 = vpop.f32.mrf.mxu1  ;;  %3683 = vmatpush.bf16.msra.mxu3 %v6654_v11  ;;  %v5001_v11 = vld [vmem:[%s7025_s29 + $0x10] sm:$0xf] }
 0x116   : > { %2653 = vmatmul.bf16.gmra.mxu2 %v5914_v19  ;;  %v7298_v27 = vadd.f32 %v2703_v24, %v2534_v23  ;;  %2573 = vmatmul.bf16.gmra.mxu0 %v5402_v21  ;;  %v6632_v19 = vld [vmem:[%s8675_s1 + $0x148] sm:$0xff]  ;;  %v6623_v21 = vld [vmem:[%s8675_s1 + $0x100] sm:$0xff] }
 0x117   : > { %2822 = vmatmul.bf16.gmra.mxu3 %v5918_v20  ;;  %3351 = vmatpush.bf16.msrb.mxu1 %v6632_v19  ;;  %v6337_v19 = vld [vmem:[%s7025_s29 + $0x14] sm:$0xf] }
 0x118   : > { %2742 = vmatmul.bf16.gmra.mxu1 %v5406_v22  ;;  %v6631_v22 = vld [vmem:[%s8675_s1 + $0x140] sm:$0xff]  ;;  %3183 = vmatpush.bf16.msrb.mxu0 %v6623_v21  ;;  %v5003_v21 = vld [vmem:[%s7025_s29 + $0x30] sm:$0xf0] }
 0x119   : > { %v2614_v30 = vpop.f32.mrf.mxu2 }
 0x11a   : > { %v2783_v31 = vpop.f32.mrf.mxu3 }
 0x11b   : > { %v7303_v34 = vadd.f32 %v2783_v31, %v2614_v30  ;;  %v2536_v39 = vpop.f32.mrf.mxu0  ;;  %v6587_v31 = vld [vmem:[%s7025_s29 + $0x7dc] sm:$0xf0]  ;;  %3352 = vmatpush.bf16.msrb.mxu1 %v6631_v22 }
 0x11c   : > { %v5978_v48 = vor.u32 %v6587_v31, %v5977_v26  ;;  %v5006_v31 = vor.u32 %v6337_v19, %v5003_v21 }
 0x11d   : > { %8685 = vst [vmem:[#allocation10_spill] sm:$0xff] %v7303_v34  ;;  %v2705_v40 = vpop.f32.mrf.mxu1 }
 0x11e   : > { %v7313_v44 = vadd.f32 %v2705_v40, %v2536_v39 }
 0x121   : > { %v2616_v51 = vpop.f32.mrf.mxu2 }
 0x122   : > { %v2785_v53 = vpop.f32.mrf.mxu3 }
 0x123   : > { %v7327_v58 = vadd.f32 %v2785_v53, %v2616_v51  ;;  %v2539_v4 = vpop.f32.mrf.mxu0  ;;  %v5470_v51 = vor.u32 %v6455_v43, %v5467_v45 }
 0x125   : > { %8686 = vst [vmem:[#allocation11_spill] sm:$0xff] %v7327_v58  ;;  %v2708_v6 = vpop.f32.mrf.mxu1 }
 0x126   : > { %2658 = vmatmul.bf16.gmra.mxu2 %v5946_v59  ;;  %v7335_v8 = vadd.f32 %v2708_v6, %v2539_v4  ;;  %2578 = vmatmul.bf16.gmra.mxu0 %v5434_v0  ;;  %v6340_v6 = vld [vmem:[%s7025_s29 + $0x24] sm:$0xf0] }
 0x127   : > { %2827 = vmatmul.bf16.gmra.mxu3 %v5950_v62 }
 0x128   : > { %2747 = vmatmul.bf16.gmra.mxu1 %v5438_v3  ;;  %v4993_v3 = vld [vmem:[%s7025_s29 + $0x8] sm:$0xf] }
 0x129   : > { %v2619_v13 = vpop.f32.mrf.mxu2 }
 0x12a   : > { %v2788_v15 = vpop.f32.mrf.mxu3 }
 0x12b   : > { %v7349_v20 = vadd.f32 %v2788_v15, %v2619_v13  ;;  %v2541_v23 = vpop.f32.mrf.mxu0  ;;  %v6341_v15 = vld [vmem:[%s7025_s29 + $0x2c] sm:$0xf0] }
 0x12c   : > { %v5002_v26 = vor.u32 %v6341_v15, %v5001_v11 }
 0x12d   : > { %8687 = vst [vmem:[#allocation12_spill] sm:$0xff] %v7349_v20  ;;  %v2710_v24 = vpop.f32.mrf.mxu1  ;;  %v5291_v20 = vld [vmem:[%s7025_s29 + $0x270] sm:$0xf0] }
 0x12e   : > { %v7358_v30 = vadd.f32 %v2710_v24, %v2541_v23  ;;  %v4994_v23 = vor.u32 %v6340_v6, %v4993_v3  ;;  %v4998_v24 = vor.u32 %v6336_v7, %v4995_v10  ;;  %v5035_v3 = vld [vmem:[%s7025_s29 + $0x70] sm:$0xf0] }
 0x131   : > { %v2621_v39 = vpop.f32.mrf.mxu2 }
 0x132   : > { %v2790_v40 = vpop.f32.mrf.mxu3 }
 0x133   : > { %v7367_v47 = vadd.f32 %v2790_v40, %v2621_v39  ;;  %v2544_v53 = vpop.f32.mrf.mxu0 }
 0x135   : > { %8688 = vst [vmem:[#allocation13_spill] sm:$0xff] %v7367_v47  ;;  %v2713_v54 = vpop.f32.mrf.mxu1 }
 0x136   : > { %2663 = vmatmul.bf16.gmra.mxu2 %v5978_v48  ;;  %v7369_v56 = vadd.f32 %v2713_v54, %v2544_v53  ;;  %2583 = vmatmul.bf16.gmra.mxu0 %v5466_v50  ;;  %v5025_v48 = vld [vmem:[%s7025_s29 + $0x48] sm:$0xf]  ;;  %v5027_v53 = vld [vmem:[%s7025_s29 + $0x68] sm:$0xf0]  ;;  %v5033_v54 = vld [vmem:[%s7025_s29 + $0x50] sm:$0xf] }
 0x137   : > { %2832 = vmatmul.bf16.gmra.mxu3 %v5982_v49  ;;  %v6348_v50 = vld [vmem:[%s7025_s29 + $0x64] sm:$0xf0] }
 0x138   : > { %2752 = vmatmul.bf16.gmra.mxu1 %v5470_v51  ;;  %v6344_v51 = vld [vmem:[%s7025_s29 + $0x4c] sm:$0xf]  ;;  %v5026_v7 = vor.u32 %v6348_v50, %v5025_v48 }
 0x139   : > { %v2624_v57 = vpop.f32.mrf.mxu2  ;;  %v5030_v10 = vor.u32 %v6344_v51, %v5027_v53  ;;  %v6357_v51 = vld [vmem:[%s7025_s29 + $0xac] sm:$0xf0]  ;;  %v6353_v53 = vld [vmem:[%s7025_s29 + $0x94] sm:$0xf] }
 0x13a   : > { %v2793_v59 = vpop.f32.mrf.mxu3 }
 0x13b   : > { %v7371_v62 = vadd.f32 %v2793_v59, %v2624_v57  ;;  %v2546_v63 = vpop.f32.mrf.mxu0 }
 0x13d   : > { %8689 = vst [vmem:[#allocation14_spill] sm:$0xff] %v7371_v62  ;;  %v2715_v0 = vpop.f32.mrf.mxu1 }
 0x13e   : > { %v7374_v4 = vadd.f32 %v2715_v0, %v2546_v63  ;;  %v6349_v63 = vld [vmem:[%s7025_s29 + $0x6c] sm:$0xf0]  ;;  %v6345_v0 = vld [vmem:[%s7025_s29 + $0x54] sm:$0xf] }
 0x13f   : > { %v5034_v11 = vor.u32 %v6349_v63, %v5033_v54  ;;  %v5067_v54 = vld [vmem:[%s7025_s29 + $0xb0] sm:$0xf0] }
 0x141   : > { %v2626_v12 = vpop.f32.mrf.mxu2 }
 0x142   : > { %v2795_v13 = vpop.f32.mrf.mxu3 }
 0x143   : > { %v7383_v22 = vadd.f32 %v2795_v13, %v2626_v12  ;;  %v2549_v32 = vpop.f32.mrf.mxu0  ;;  %v5038_v12 = vor.u32 %v6345_v0, %v5035_v3  ;;  %v5070_v3 = vor.u32 %v6353_v53, %v5067_v54  ;;  %v6365_v53 = vld [vmem:[%s7025_s29 + $0xec] sm:$0xf0]  ;;  %v6361_v54 = vld [vmem:[%s7025_s29 + $0xd4] sm:$0xf] }
 0x145   : > { %8690 = vst [vmem:[#allocation15_spill] sm:$0xff] %v7383_v22  ;;  %v2718_v36 = vpop.f32.mrf.mxu1 }
 0x146   : > { %2846 = vmatmul.bf16.vlgmr.msrb.gmra.mxu2 %v4994_v23  ;;  %v7385_v37 = vadd.f32 %v2718_v36, %v2549_v32  ;;  %3184 = vmatmul.bf16.vlgmr.msrb.gmra.mxu0 %v5002_v26  ;;  %v5057_v32 = vld [vmem:[%s7025_s29 + $0x88] sm:$0xf] }
 0x147   : > { %3015 = vmatmul.bf16.vlgmr.msrb.gmra.mxu3 %v4998_v24 }
 0x148   : > { %3353 = vmatmul.bf16.vlgmr.msrb.gmra.mxu1 %v5006_v31 }
 0x149   : > { %v2629_v39 = vpop.f32.mrf.mxu2 }
 0x14a   : > { %v2798_v40 = vpop.f32.mrf.mxu3 }
 0x14b   : > { %v7387_v41 = vadd.f32 %v2798_v40, %v2629_v39  ;;  %v2551_v43 = vpop.f32.mrf.mxu0  ;;  %v6356_v39 = vld [vmem:[%s7025_s29 + $0xa4] sm:$0xf0]  ;;  %v6352_v40 = vld [vmem:[%s7025_s29 + $0x8c] sm:$0xf] }
 0x14d   : > { %8691 = vst [vmem:[#allocation16_spill] sm:$0xff] %v7387_v41  ;;  %v2720_v45 = vpop.f32.mrf.mxu1 }
 0x14e   : > { %v7390_v49 = vadd.f32 %v2720_v45, %v2551_v43  ;;  %v5059_v43 = vld [vmem:[%s7025_s29 + $0xa8] sm:$0xf0]  ;;  %v5065_v45 = vld [vmem:[%s7025_s29 + $0x90] sm:$0xf] }
 0x14f   : > { %v5062_v63 = vor.u32 %v6352_v40, %v5059_v43  ;;  %v5066_v0 = vor.u32 %v6357_v51, %v5065_v45  ;;  %v6364_v40 = vld [vmem:[%s7025_s29 + $0xe4] sm:$0xf0]  ;;  %v6360_v43 = vld [vmem:[%s7025_s29 + $0xcc] sm:$0xf] }
 0x150   : > { %v5091_v45 = vld [vmem:[%s7025_s29 + $0xe8] sm:$0xf0] }
 0x151   : > { %v2631_v57 = vpop.f32.mrf.mxu2 }
 0x152   : > { %v2800_v59 = vpop.f32.mrf.mxu3 }
 0x153   : > { %v7399_v6 = vadd.f32 %v2800_v59, %v2631_v57  ;;  %v2554_v13 = vpop.f32.mrf.mxu0  ;;  %v5058_v59 = vor.u32 %v6356_v39, %v5057_v32  ;;  %v5089_v32 = vld [vmem:[%s7025_s29 + $0xc8] sm:$0xf] }
 0x155   : > { %8692 = vst [vmem:[#allocation17_spill] sm:$0xff] %v7399_v6  ;;  %v2723_v15 = vpop.f32.mrf.mxu1 }
 0x156   : > { %2851 = vmatmul.bf16.gmra.mxu2 %v5026_v7  ;;  %v7401_v19 = vadd.f32 %v2723_v15, %v2554_v13  ;;  %3189 = vmatmul.bf16.gmra.mxu0 %v5034_v11  ;;  %v6653_v13 = vld [vmem:[%s8675_s1 + $0x1f0] sm:$0xff] }
 0x157   : > { %3020 = vmatmul.bf16.gmra.mxu3 %v5030_v10 }
 0x158   : > { %3358 = vmatmul.bf16.gmra.mxu1 %v5038_v12  ;;  %v6645_v12 = vld [vmem:[%s8675_s1 + $0x1b0] sm:$0xff]  ;;  %3684 = vmatpush.bf16.msra.mxu3 %v6653_v13 }
 0x159   : > { %v2634_v21 = vpop.f32.mrf.mxu2  ;;  %3515 = vmatpush.bf16.msra.mxu2 %v6645_v12 }
 0x15a   : > { %v2803_v23 = vpop.f32.mrf.mxu3 }
 0x15b   : > { %v7403_v24 = vadd.f32 %v2803_v23, %v2634_v21  ;;  %v2556_v26 = vpop.f32.mrf.mxu0 }
 0x15d   : > { %8693 = vst [vmem:[#allocation18_spill] sm:$0xff] %v7403_v24  ;;  %v2725_v31 = vpop.f32.mrf.mxu1 }
 0x15e   : > { %v7406_v36 = vadd.f32 %v2725_v31, %v2556_v26 }
 0x161   : > { %v2636_v48 = vpop.f32.mrf.mxu2 }
 0x162   : > { %v2805_v50 = vpop.f32.mrf.mxu3 }
 0x163   : > { %v7415_v57 = vadd.f32 %v2805_v50, %v2636_v48  ;;  %v2559_v7 = vpop.f32.mrf.mxu0  ;;  %v5097_v48 = vld [vmem:[%s7025_s29 + $0xd0] sm:$0xf] }
 0x165   : > { %8694 = vst [vmem:[#allocation19_spill] sm:$0xff] %v7415_v57  ;;  %v2728_v10 = vpop.f32.mrf.mxu1 }
 0x166   : > { %2856 = vmatmul.bf16.gmra.mxu2 %v5058_v59  ;;  %v7417_v11 = vadd.f32 %v2728_v10, %v2559_v7  ;;  %3194 = vmatmul.bf16.gmra.mxu0 %v5066_v0  ;;  %v5099_v59 = vld [vmem:[%s7025_s29 + $0xf0] sm:$0xf0]  ;;  %v5090_v0 = vor.u32 %v6364_v40, %v5089_v32  ;;  %v5098_v7 = vor.u32 %v6365_v53, %v5097_v48  ;;  %v6372_v48 = vld [vmem:[%s7025_s29 + $0x124] sm:$0xf0]  ;;  %v5129_v53 = vld [vmem:[%s7025_s29 + $0x110] sm:$0xf] }
 0x167   : > { %3025 = vmatmul.bf16.gmra.mxu3 %v5062_v63  ;;  %v5102_v10 = vor.u32 %v6361_v54, %v5099_v59 }
 0x168   : > { %3363 = vmatmul.bf16.gmra.mxu1 %v5070_v3  ;;  %v5094_v3 = vor.u32 %v6360_v43, %v5091_v45  ;;  %v5121_v43 = vld [vmem:[%s7025_s29 + $0x108] sm:$0xf] }
 0x169   : > { %v2639_v15 = vpop.f32.mrf.mxu2 }
 0x16a   : > { %v2808_v21 = vpop.f32.mrf.mxu3 }
 0x16b   : > { %v7425_v23 = vadd.f32 %v2808_v21, %v2639_v15  ;;  %v2561_v26 = vpop.f32.mrf.mxu0 }
 0x16d   : > { %8695 = vst [vmem:[#allocation20_spill] sm:$0xff] %v7425_v23  ;;  %v2730_v31 = vpop.f32.mrf.mxu1 }
 0x16e   : > { %v7428_v39 = vadd.f32 %v2730_v31, %v2561_v26 }
 0x171   : > { %v2641_v50 = vpop.f32.mrf.mxu2 }
 0x172   : > { %v2810_v51 = vpop.f32.mrf.mxu3 }
 0x173   : > { %v7437_v63 = vadd.f32 %v2810_v51, %v2641_v50  ;;  %v2564_v12 = vpop.f32.mrf.mxu0  ;;  %v6368_v50 = vld [vmem:[%s7025_s29 + $0x10c] sm:$0xf] }
 0x174   : > { %v5123_v51 = vld [vmem:[%s7025_s29 + $0x128] sm:$0xf0] }
 0x175   : > { %8696 = vst [vmem:[#allocation21_spill] sm:$0xff] %v7437_v63  ;;  %v2733_v13 = vpop.f32.mrf.mxu1 }
 0x176   : > { %2861 = vmatmul.bf16.gmra.mxu2 %v5090_v0  ;;  %v7439_v15 = vadd.f32 %v2733_v13, %v2564_v12  ;;  %3199 = vmatmul.bf16.gmra.mxu0 %v5098_v7  ;;  %v6373_v0 = vld [vmem:[%s7025_s29 + $0x12c] sm:$0xf0]  ;;  %v5131_v7 = vld [vmem:[%s7025_s29 + $0x130] sm:$0xf0]  ;;  %v5122_v12 = vor.u32 %v6372_v48, %v5121_v43  ;;  %v5126_v13 = vor.u32 %v6368_v50, %v5123_v51 }
 0x177   : > { %3030 = vmatmul.bf16.gmra.mxu3 %v5094_v3  ;;  %v6369_v3 = vld [vmem:[%s7025_s29 + $0x114] sm:$0xf] }
 0x178   : > { %3368 = vmatmul.bf16.gmra.mxu1 %v5102_v10 }
 0x179   : > { %v2644_v21 = vpop.f32.mrf.mxu2 }
 0x17a   : > { %v2813_v26 = vpop.f32.mrf.mxu3 }
 0x17b   : > { %v7441_v31 = vadd.f32 %v2813_v26, %v2644_v21  ;;  %v2566_v32 = vpop.f32.mrf.mxu0  ;;  %v5130_v21 = vor.u32 %v6373_v0, %v5129_v53  ;;  %v5134_v26 = vor.u32 %v6369_v3, %v5131_v7  ;;  %v6380_v0 = vld [vmem:[%s7025_s29 + $0x164] sm:$0xf0]  ;;  %v6376_v3 = vld [vmem:[%s7025_s29 + $0x14c] sm:$0xf] }
 0x17c   : > { %v5155_v7 = vld [vmem:[%s7025_s29 + $0x168] sm:$0xf0] }
 0x17d   : > { %8697 = vst [vmem:[#allocation22_spill] sm:$0xff] %v7441_v31  ;;  %v2735_v40 = vpop.f32.mrf.mxu1 }
 0x17e   : > { %v7444_v45 = vadd.f32 %v2735_v40, %v2566_v32 }
 0x181   : > { %v2646_v54 = vpop.f32.mrf.mxu2 }
 0x182   : > { %v2815_v59 = vpop.f32.mrf.mxu3 }
 0x183   : > { %v7453_v10 = vadd.f32 %v2815_v59, %v2646_v54  ;;  %v2569_v32 = vpop.f32.mrf.mxu0  ;;  %v5153_v54 = vld [vmem:[%s7025_s29 + $0x148] sm:$0xf] }
 0x184   : > { %v5154_v63 = vor.u32 %v6380_v0, %v5153_v54 }
 0x185   : > { %8698 = vst [vmem:[#allocation23_spill] sm:$0xff] %v7453_v10  ;;  %v2738_v40 = vpop.f32.mrf.mxu1  ;;  %v5163_v10 = vld [vmem:[%s7025_s29 + $0x170] sm:$0xf0] }
 0x186   : > { %2866 = vmatmul.bf16.gmra.mxu2 %v5122_v12  ;;  %v7455_v31 = vadd.f32 %v2738_v40, %v2569_v32  ;;  %3204 = vmatmul.bf16.gmra.mxu0 %v5130_v21  ;;  %v5161_v12 = vld [vmem:[%s7025_s29 + $0x150] sm:$0xf]  ;;  %v6377_v21 = vld [vmem:[%s7025_s29 + $0x154] sm:$0xf] }
 0x187   : > { %3035 = vmatmul.bf16.gmra.mxu3 %v5126_v13  ;;  %v6381_v40 = vld [vmem:[%s7025_s29 + $0x16c] sm:$0xf0] }
 0x188   : > { %3373 = vmatmul.bf16.gmra.mxu1 %v5134_v26 }
 0x189   : > { %v2649_v43 = vpop.f32.mrf.mxu2 }
 0x18a   : > { %v2818_v48 = vpop.f32.mrf.mxu3 }
 0x18b   : > { %v7457_v50 = vadd.f32 %v2818_v48, %v2649_v43  ;;  %v2571_v51 = vpop.f32.mrf.mxu0  ;;  %v5158_v43 = vor.u32 %v6376_v3, %v5155_v7  ;;  %v5162_v48 = vor.u32 %v6381_v40, %v5161_v12  ;;  %v5185_v12 = vld [vmem:[%s7025_s29 + $0x188] sm:$0xf]  ;;  %v6384_v40 = vld [vmem:[%s7025_s29 + $0x18c] sm:$0xf] }
 0x18d   : > { %8699 = vst [vmem:[#allocation24_spill] sm:$0xff] %v7457_v50  ;;  %v2740_v53 = vpop.f32.mrf.mxu1  ;;  %v5166_v50 = vor.u32 %v6377_v21, %v5163_v10  ;;  %v5193_v21 = vld [vmem:[%s7025_s29 + $0x190] sm:$0xf] }
 0x18e   : > { %v7460_v59 = vadd.f32 %v2740_v53, %v2571_v51 }
 0x191   : > { %v2651_v13 = vpop.f32.mrf.mxu2 }
 0x192   : > { %v2820_v32 = vpop.f32.mrf.mxu3 }
 0x193   : > { %v7469_v26 = vadd.f32 %v2820_v32, %v2651_v13  ;;  %v2574_v51 = vpop.f32.mrf.mxu0  ;;  %v6388_v32 = vld [vmem:[%s7025_s29 + $0x1a4] sm:$0xf0] }
 0x194   : > { %v5186_v57 = vor.u32 %v6388_v32, %v5185_v12  ;;  %v6652_v12 = vld [vmem:[%s8675_s1 + $0x1e8] sm:$0xff] }
 0x195   : > { %8700 = vst [vmem:[#allocation25_spill] sm:$0xff] %v7469_v26  ;;  %v2743_v53 = vpop.f32.mrf.mxu1  ;;  %v5195_v26 = vld [vmem:[%s7025_s29 + $0x1b0] sm:$0xf0]  ;;  %3685 = vmatpush.bf16.msra.mxu3 %v6652_v12  ;;  %v5217_v32 = vld [vmem:[%s7025_s29 + $0x1c8] sm:$0xf] }
 0x196   : > { %2871 = vmatmul.bf16.gmra.mxu2 %v5154_v63  ;;  %v7471_v23 = vadd.f32 %v2743_v53, %v2574_v51  ;;  %3209 = vmatmul.bf16.gmra.mxu0 %v5162_v48  ;;  %v5187_v63 = vld [vmem:[%s7025_s29 + $0x1a8] sm:$0xf0]  ;;  %v6389_v53 = vld [vmem:[%s7025_s29 + $0x1ac] sm:$0xf0]  ;;  %v6385_v48 = vld [vmem:[%s7025_s29 + $0x194] sm:$0xf] }
 0x197   : > { %3040 = vmatmul.bf16.gmra.mxu3 %v5158_v43  ;;  %v5190_v24 = vor.u32 %v6384_v40, %v5187_v63  ;;  %v6396_v63 = vld [vmem:[%s7025_s29 + $0x1e4] sm:$0xf0] }
 0x198   : > { %3378 = vmatmul.bf16.gmra.mxu1 %v5166_v50 }
 0x199   : > { %v2654_v54 = vpop.f32.mrf.mxu2 }
 0x19a   : > { %v2823_v0 = vpop.f32.mrf.mxu3 }
 0x19b   : > { %v7473_v3 = vadd.f32 %v2823_v0, %v2654_v54  ;;  %v2576_v7 = vpop.f32.mrf.mxu0  ;;  %v5194_v54 = vor.u32 %v6389_v53, %v5193_v21  ;;  %v5198_v0 = vor.u32 %v6385_v48, %v5195_v26  ;;  %v6392_v21 = vld [vmem:[%s7025_s29 + $0x1cc] sm:$0xf] }
 0x19d   : > { %8701 = vst [vmem:[#allocation26_spill] sm:$0xff] %v7473_v3  ;;  %v2745_v10 = vpop.f32.mrf.mxu1 }
 0x19e   : > { %v7476_v13 = vadd.f32 %v2745_v10, %v2576_v7  ;;  %v6644_v10 = vld [vmem:[%s8675_s1 + $0x1a8] sm:$0xff] }
 0x19f   : > { %3516 = vmatpush.bf16.msra.mxu2 %v6644_v10  ;;  %v5218_v10 = vor.u32 %v6396_v63, %v5217_v32 }
 0x1a1   : > { %v2656_v43 = vpop.f32.mrf.mxu2 }
 0x1a2   : > { %v2825_v51 = vpop.f32.mrf.mxu3 }
 0x1a3   : > { %v7485_v50 = vadd.f32 %v2825_v51, %v2656_v43  ;;  %v2579_v3 = vpop.f32.mrf.mxu0  ;;  %v5219_v43 = vld [vmem:[%s7025_s29 + $0x1e8] sm:$0xf0]  ;;  %v5225_v51 = vld [vmem:[%s7025_s29 + $0x1d0] sm:$0xf] }
 0x1a4   : > { %v5222_v12 = vor.u32 %v6392_v21, %v5219_v43 }
 0x1a5   : > { %8702 = vst [vmem:[#allocation27_spill] sm:$0xff] %v7485_v50  ;;  %v2748_v6 = vpop.f32.mrf.mxu1  ;;  %v5227_v50 = vld [vmem:[%s7025_s29 + $0x1f0] sm:$0xf0] }
 0x1a6   : > { %2876 = vmatmul.bf16.gmra.mxu2 %v5186_v57  ;;  %v7487_v7 = vadd.f32 %v2748_v6, %v2579_v3  ;;  %3214 = vmatmul.bf16.gmra.mxu0 %v5194_v54  ;;  %v6397_v54 = vld [vmem:[%s7025_s29 + $0x1ec] sm:$0xf0] }
 0x1a7   : > { %3045 = vmatmul.bf16.gmra.mxu3 %v5190_v24 }
 0x1a8   : > { %3383 = vmatmul.bf16.gmra.mxu1 %v5198_v0  ;;  %v6393_v0 = vld [vmem:[%s7025_s29 + $0x1d4] sm:$0xf] }
 0x1a9   : > { %v2659_v26 = vpop.f32.mrf.mxu2 }
 0x1aa   : > { %v2828_v57 = vpop.f32.mrf.mxu3 }
 0x1ab   : > { %v7495_v6 = vadd.f32 %v2828_v57, %v2659_v26  ;;  %v2581_v24 = vpop.f32.mrf.mxu0  ;;  %v5226_v26 = vor.u32 %v6397_v54, %v5225_v51  ;;  %v5230_v57 = vor.u32 %v6393_v0, %v5227_v50  ;;  %v5249_v51 = vld [vmem:[%s7025_s29 + $0x208] sm:$0xf]  ;;  %v6400_v54 = vld [vmem:[%s7025_s29 + $0x20c] sm:$0xf] }
 0x1ac   : > { %v5251_v0 = vld [vmem:[%s7025_s29 + $0x228] sm:$0xf0] }
 0x1ad   : > { %8703 = vst [vmem:[#allocation28_spill] sm:$0xff] %v7495_v6  ;;  %v2750_v3 = vpop.f32.mrf.mxu1  ;;  %v5254_v62 = vor.u32 %v6400_v54, %v5251_v0 }
 0x1ae   : > { %v7498_v40 = vadd.f32 %v2750_v3, %v2581_v24 }
 0x1b1   : > { %v2661_v53 = vpop.f32.mrf.mxu2 }
 0x1b2   : > { %v2830_v48 = vpop.f32.mrf.mxu3 }
 0x1b3   : > { %v7507_v41 = vadd.f32 %v2830_v48, %v2661_v53  ;;  %v2584_v24 = vpop.f32.mrf.mxu0  ;;  %v6404_v48 = vld [vmem:[%s7025_s29 + $0x224] sm:$0xf0] }
 0x1b4   : > { %v5250_v22 = vor.u32 %v6404_v48, %v5249_v51 }
 0x1b5   : > { %8704 = vst [vmem:[#allocation29_spill] sm:$0xff] %v7507_v41  ;;  %v2753_v3 = vpop.f32.mrf.mxu1  ;;  %v5259_v41 = vld [vmem:[%s7025_s29 + $0x230] sm:$0xf0] }
 0x1b6   : > { %2881 = vmatmul.bf16.gmra.mxu2 %v5218_v10  ;;  %v7509_v6 = vadd.f32 %v2753_v3, %v2584_v24  ;;  %3219 = vmatmul.bf16.gmra.mxu0 %v5226_v26  ;;  %v5257_v10 = vld [vmem:[%s7025_s29 + $0x210] sm:$0xf]  ;;  %v6401_v26 = vld [vmem:[%s7025_s29 + $0x214] sm:$0xf] }
 0x1b7   : > { %3050 = vmatmul.bf16.gmra.mxu3 %v5222_v12  ;;  %v6405_v3 = vld [vmem:[%s7025_s29 + $0x22c] sm:$0xf0] }
 0x1b8   : > { %3388 = vmatmul.bf16.gmra.mxu1 %v5230_v57 }
 0x1b9   : > { %v2664_v32 = vpop.f32.mrf.mxu2 }
 0x1ba   : > { %v2833_v63 = vpop.f32.mrf.mxu3 }
 0x1bb   : > { %v7511_v21 = vadd.f32 %v2833_v63, %v2664_v32  ;;  %v2586_v43 = vpop.f32.mrf.mxu0  ;;  %v5258_v32 = vor.u32 %v6405_v3, %v5257_v10  ;;  %v5262_v63 = vor.u32 %v6401_v26, %v5259_v41  ;;  %v6408_v3 = vld [vmem:[%s7025_s29 + $0x24c] sm:$0xf] }
 0x1bd   : > { %8705 = vst [vmem:[#allocation30_spill] sm:$0xff] %v7511_v21  ;;  %v2755_v50 = vpop.f32.mrf.mxu1  ;;  %v4080_v21 = vld [vmem:[#allocation5] sm:$0xf] }
 0x1be   : > { %v7514_v53 = vadd.f32 %v2755_v50, %v2586_v43  ;;  %v4183_v47 = vsel %vm4181_vm0, %v4080_v21, 0  ;;  %v6412_v21 = vld [vmem:[%s7025_s29 + $0x264] sm:$0xf0] }
 0x1bf   : > { %4192 = vmatpush.bf16.msra.mxu0 %v4183_v47  ;;  %v5289_v47 = vld [vmem:[%s7025_s29 + $0x250] sm:$0xf] }
 0x1c1   : > { %v2666_v12 = vpop.f32.mrf.mxu2 }
 0x1c2   : > { %v2835_v24 = vpop.f32.mrf.mxu3 }
 0x1c3   : > { %v7523_v57 = vadd.f32 %v2835_v24, %v2666_v12  ;;  %v3185_v43 = vpop.f32.mrf.mxu0  ;;  %v5281_v24 = vld [vmem:[%s7025_s29 + $0x248] sm:$0xf] }
 0x1c4   : > { %v5282_v34 = vor.u32 %v6412_v21, %v5281_v24 }
 0x1c5   : > { %8706 = vst [vmem:[#allocation31_spill] sm:$0xff] %v7523_v57  ;;  %v3354_v50 = vpop.f32.mrf.mxu1  ;;  %v6409_v57 = vld [vmem:[%s7025_s29 + $0x254] sm:$0xf] }
 0x1c6   : > { %2886 = vmatmul.bf16.gmra.mxu2 %v5250_v22  ;;  %3224 = vmatmul.bf16.gmra.mxu0 %v5258_v32  ;;  %v5283_v22 = vld [vmem:[%s7025_s29 + $0x268] sm:$0xf0] }
 0x1c7   : > { %3055 = vmatmul.bf16.gmra.mxu3 %v5254_v62 }
 0x1c8   : > { %3393 = vmatmul.bf16.gmra.mxu1 %v5262_v63  ;;  %v6413_v63 = vld [vmem:[%s7025_s29 + $0x26c] sm:$0xf0] }
 0x1c9   : > { %v2847_v51 = vpop.f32.mrf.mxu2 }
 0x1ca   : > { %v3016_v48 = vpop.f32.mrf.mxu3  ;;  %v2848_v41 = vadd.f32 %v2847_v51, %v7188_v9  ;;  %v5286_v9 = vor.u32 %v6408_v3, %v5283_v22  ;;  %v6420_v22 = vld [vmem:[%s7025_s29 + $0x2a4] sm:$0xf0] }
 0x1cb   : > { %v3187_v0 = vpop.f32.mrf.mxu0 }
 0x1cc   : > { %v3017_v54 = vadd.f32 %v3016_v48, %v2848_v41  ;;  %v5290_v48 = vor.u32 %v6413_v63, %v5289_v47  ;;  %v5294_v41 = vor.u32 %v6409_v57, %v5291_v20  ;;  %v5315_v47 = vld [vmem:[%s7025_s29 + $0x2a8] sm:$0xf0] }
 0x1cd   : > { %v3356_v10 = vpop.f32.mrf.mxu1 }
 0x1ce   : > { %v3186_v12 = vadd.f32 %v3185_v43, %v3017_v54 }
 0x1d0   : > { %v7530_v62 = vadd.f32 %v3354_v50, %v3186_v12 }
 0x1d1   : > { %v2849_v26 = vpop.f32.mrf.mxu2 }
 0x1d2   : > { %v3018_v32 = vpop.f32.mrf.mxu3  ;;  %v2850_v58 = vadd.f32 %v2849_v26, %v7199_v18 }
 0x1d3   : > { %v3190_v43 = vpop.f32.mrf.mxu0 }
 0x1d4   : > { %v3019_v51 = vadd.f32 %v3018_v32, %v2850_v58 }
 0x1d5   : > { %v3359_v54 = vpop.f32.mrf.mxu1 }
 0x1d6   : > { %v3188_v50 = vadd.f32 %v3187_v0, %v3019_v51  ;;  %2891 = vmatmul.bf16.gmra.mxu2 %v5282_v34  ;;  %3229 = vmatmul.bf16.gmra.mxu0 %v5290_v48  ;;  %v5313_v0 = vld [vmem:[%s7025_s29 + $0x288] sm:$0xf]  ;;  %v6416_v34 = vld [vmem:[%s7025_s29 + $0x28c] sm:$0xf]  ;;  %v6417_v51 = vld [vmem:[%s7025_s29 + $0x294] sm:$0xf] }
 0x1d7   : > { %3060 = vmatmul.bf16.gmra.mxu3 %v5286_v9  ;;  %v6421_v9 = vld [vmem:[%s7025_s29 + $0x2ac] sm:$0xf0]  ;;  %v5323_v48 = vld [vmem:[%s7025_s29 + $0x2b0] sm:$0xf0] }
 0x1d8   : > { %v7537_v12 = vadd.f32 %v3356_v10, %v3188_v50  ;;  %3398 = vmatmul.bf16.gmra.mxu1 %v5294_v41  ;;  %v5321_v10 = vld [vmem:[%s7025_s29 + $0x290] sm:$0xf]  ;;  %v5314_v50 = vor.u32 %v6420_v22, %v5313_v0 }
 0x1d9   : > { %v2852_v18 = vpop.f32.mrf.mxu2 }
 0x1da   : > { %8707 = vst [vmem:[#allocation32_spill] sm:$0xff] %v7537_v12  ;;  %v3021_v58 = vpop.f32.mrf.mxu3  ;;  %v2853_v20 = vadd.f32 %v2852_v18, %v7210_v35  ;;  %v5318_v35 = vor.u32 %v6416_v34, %v5315_v47 }
 0x1db   : > { %v3192_v24 = vpop.f32.mrf.mxu0 }
 0x1dc   : > { %v3022_v57 = vadd.f32 %v3021_v58, %v2853_v20  ;;  %v5322_v58 = vor.u32 %v6421_v9, %v5321_v10  ;;  %v5326_v20 = vor.u32 %v6417_v51, %v5323_v48  ;;  %v5345_v10 = vld [vmem:[%s7025_s29 + $0x2c8] sm:$0xf]  ;;  %v5347_v9 = vld [vmem:[%s7025_s29 + $0x2e8] sm:$0xf0]  ;;  %v5353_v48 = vld [vmem:[%s7025_s29 + $0x2d0] sm:$0xf] }
 0x1dd   : > { %v3361_v21 = vpop.f32.mrf.mxu1 }
 0x1de   : > { %v3191_v3 = vadd.f32 %v3190_v43, %v3022_v57 }
 0x1e0   : > { %v7544_v26 = vadd.f32 %v3359_v54, %v3191_v3  ;;  %v6643_v54 = vld [vmem:[%s8675_s1 + $0x1a0] sm:$0xff] }
 0x1e1   : > { %v2854_v32 = vpop.f32.mrf.mxu2  ;;  %3517 = vmatpush.bf16.msra.mxu2 %v6643_v54 }
 0x1e2   : > { %v3023_v63 = vpop.f32.mrf.mxu3  ;;  %v2855_v41 = vadd.f32 %v2854_v32, %v7215_v42  ;;  %v6651_v42 = vld [vmem:[%s8675_s1 + $0x1e0] sm:$0xff]  ;;  %v6428_v32 = vld [vmem:[%s7025_s29 + $0x2e4] sm:$0xf0] }
 0x1e3   : > { %v3195_v43 = vpop.f32.mrf.mxu0  ;;  %3686 = vmatpush.bf16.msra.mxu3 %v6651_v42 }
 0x1e4   : > { %v3024_v18 = vadd.f32 %v3023_v63, %v2855_v41  ;;  %v6424_v63 = vld [vmem:[%s7025_s29 + $0x2cc] sm:$0xf] }
 0x1e5   : > { %v3364_v57 = vpop.f32.mrf.mxu1  ;;  %v5350_v54 = vor.u32 %v6424_v63, %v5347_v9 }
 0x1e6   : > { %v3193_v12 = vadd.f32 %v3192_v24, %v3024_v18  ;;  %2896 = vmatmul.bf16.gmra.mxu2 %v5314_v50  ;;  %3234 = vmatmul.bf16.gmra.mxu0 %v5322_v58  ;;  %v6425_v18 = vld [vmem:[%s7025_s29 + $0x2d4] sm:$0xf] }
 0x1e7   : > { %3065 = vmatmul.bf16.gmra.mxu3 %v5318_v35  ;;  %v6429_v35 = vld [vmem:[%s7025_s29 + $0x2ec] sm:$0xf0]  ;;  %v5355_v58 = vld [vmem:[%s7025_s29 + $0x2f0] sm:$0xf0] }
 0x1e8   : > { %v7554_v3 = vadd.f32 %v3361_v21, %v3193_v12  ;;  %3403 = vmatmul.bf16.gmra.mxu1 %v5326_v20  ;;  %v5346_v20 = vor.u32 %v6428_v32, %v5345_v10 }
 0x1e9   : > { %v2857_v24 = vpop.f32.mrf.mxu2 }
 0x1ea   : > { %v3026_v0 = vpop.f32.mrf.mxu3  ;;  %v2858_v22 = vadd.f32 %v2857_v24, %v7229_v60  ;;  %v5354_v24 = vor.u32 %v6429_v35, %v5353_v48  ;;  %v5379_v35 = vld [vmem:[%s7025_s29 + $0x328] sm:$0xf0] }
 0x1eb   : > { %v3197_v12 = vpop.f32.mrf.mxu0 }
 0x1ec   : > { %v3027_v34 = vadd.f32 %v3026_v0, %v2858_v22  ;;  %v5358_v0 = vor.u32 %v6425_v18, %v5355_v58 }
 0x1ed   : > { %v3366_v21 = vpop.f32.mrf.mxu1 }
 0x1ee   : > { %v3196_v47 = vadd.f32 %v3195_v43, %v3027_v34 }
 0x1f0   : > { %v7564_v51 = vadd.f32 %v3364_v57, %v3196_v47 }
 0x1f1   : > { %v2859_v41 = vpop.f32.mrf.mxu2 }
 0x1f2   : > { %v3028_v50 = vpop.f32.mrf.mxu3  ;;  %v2860_v60 = vadd.f32 %v2859_v41, %v7240_v5  ;;  %v6436_v41 = vld [vmem:[%s7025_s29 + $0x324] sm:$0xf0] }
 0x1f3   : > { %v3200_v43 = vpop.f32.mrf.mxu0 }
 0x1f4   : > { %v3029_v42 = vadd.f32 %v3028_v50, %v2860_v60  ;;  %v6432_v50 = vld [vmem:[%s7025_s29 + $0x30c] sm:$0xf] }
 0x1f5   : > { %v3369_v22 = vpop.f32.mrf.mxu1 }
 0x1f6   : > { %v3198_v57 = vadd.f32 %v3197_v12, %v3029_v42  ;;  %2901 = vmatmul.bf16.gmra.mxu2 %v5346_v20  ;;  %3239 = vmatmul.bf16.gmra.mxu0 %v5354_v24  ;;  %v5377_v12 = vld [vmem:[%s7025_s29 + $0x308] sm:$0xf]  ;;  %v6437_v20 = vld [vmem:[%s7025_s29 + $0x32c] sm:$0xf0]  ;;  %v5387_v42 = vld [vmem:[%s7025_s29 + $0x330] sm:$0xf0] }
 0x1f7   : > { %3070 = vmatmul.bf16.gmra.mxu3 %v5350_v54  ;;  %v6433_v54 = vld [vmem:[%s7025_s29 + $0x314] sm:$0xf] }
 0x1f8   : > { %v7571_v34 = vadd.f32 %v3366_v21, %v3198_v57  ;;  %3408 = vmatmul.bf16.gmra.mxu1 %v5358_v0  ;;  %v5385_v21 = vld [vmem:[%s7025_s29 + $0x310] sm:$0xf]  ;;  %v5378_v0 = vor.u32 %v6436_v41, %v5377_v12 }
 0x1f9   : > { %v2862_v5 = vpop.f32.mrf.mxu2 }
 0x1fa   : > { %v3031_v47 = vpop.f32.mrf.mxu3  ;;  %v2863_v10 = vadd.f32 %v2862_v5, %v7251_v25  ;;  %v5382_v25 = vor.u32 %v6432_v50, %v5379_v35  ;;  %v5386_v5 = vor.u32 %v6437_v20, %v5385_v21  ;;  %v5411_v20 = vld [vmem:[%s7025_s29 + $0x368] sm:$0xf0] }
 0x1fb   : > { %v3202_v63 = vpop.f32.mrf.mxu0 }
 0x1fc   : > { %v3032_v32 = vadd.f32 %v3031_v47, %v2863_v10  ;;  %v5390_v47 = vor.u32 %v6433_v54, %v5387_v42 }
 0x1fd   : > { %v3371_v9 = vpop.f32.mrf.mxu1 }
 0x1fe   : > { %v3201_v48 = vadd.f32 %v3200_v43, %v3032_v32 }
 0x200   : > { %v7578_v18 = vadd.f32 %v3369_v22, %v3201_v48 }
 0x201   : > { %v2864_v58 = vpop.f32.mrf.mxu2 }
 0x202   : > { %v3033_v60 = vpop.f32.mrf.mxu3  ;;  %v2865_v24 = vadd.f32 %v2864_v58, %v7256_v33  ;;  %v6444_v58 = vld [vmem:[%s7025_s29 + $0x364] sm:$0xf0] }
 0x203   : > { %v3205_v43 = vpop.f32.mrf.mxu0 }
 0x204   : > { %v3034_v57 = vadd.f32 %v3033_v60, %v2865_v24  ;;  %v6440_v60 = vld [vmem:[%s7025_s29 + $0x34c] sm:$0xf] }
 0x205   : > { %v3374_v10 = vpop.f32.mrf.mxu1 }
 0x206   : > { %v3203_v22 = vadd.f32 %v3202_v63, %v3034_v57  ;;  %2906 = vmatmul.bf16.gmra.mxu2 %v5378_v0  ;;  %3244 = vmatmul.bf16.gmra.mxu0 %v5386_v5  ;;  %v5409_v63 = vld [vmem:[%s7025_s29 + $0x348] sm:$0xf]  ;;  %v6445_v0 = vld [vmem:[%s7025_s29 + $0x36c] sm:$0xf0]  ;;  %v5419_v57 = vld [vmem:[%s7025_s29 + $0x370] sm:$0xf0] }
 0x207   : > { %3075 = vmatmul.bf16.gmra.mxu3 %v5382_v25  ;;  %v6441_v25 = vld [vmem:[%s7025_s29 + $0x354] sm:$0xf] }
 0x208   : > { %v7585_v32 = vadd.f32 %v3371_v9, %v3203_v22  ;;  %3413 = vmatmul.bf16.gmra.mxu1 %v5390_v47  ;;  %v5417_v9 = vld [vmem:[%s7025_s29 + $0x350] sm:$0xf]  ;;  %v5410_v47 = vor.u32 %v6444_v58, %v5409_v63 }
 0x209   : > { %v2867_v33 = vpop.f32.mrf.mxu2 }
 0x20a   : > { %v3036_v48 = vpop.f32.mrf.mxu3  ;;  %v2868_v12 = vadd.f32 %v2867_v33, %v7270_v55  ;;  %v5414_v55 = vor.u32 %v6440_v60, %v5411_v20  ;;  %v5418_v33 = vor.u32 %v6445_v0, %v5417_v9  ;;  %v5443_v0 = vld [vmem:[%s7025_s29 + $0x3a8] sm:$0xf0] }
 0x20b   : > { %v3207_v50 = vpop.f32.mrf.mxu0 }
 0x20c   : > { %v3037_v41 = vadd.f32 %v3036_v48, %v2868_v12  ;;  %v5422_v48 = vor.u32 %v6441_v25, %v5419_v57 }
 0x20d   : > { %v3376_v35 = vpop.f32.mrf.mxu1 }
 0x20e   : > { %v3206_v21 = vadd.f32 %v3205_v43, %v3037_v41 }
 0x210   : > { %v7592_v54 = vadd.f32 %v3374_v10, %v3206_v21 }
 0x211   : > { %v2869_v42 = vpop.f32.mrf.mxu2 }
 0x212   : > { %v3038_v24 = vpop.f32.mrf.mxu3  ;;  %v2870_v5 = vadd.f32 %v2869_v42, %v7281_v2  ;;  %v6452_v42 = vld [vmem:[%s7025_s29 + $0x3a4] sm:$0xf0] }
 0x213   : > { %v3210_v43 = vpop.f32.mrf.mxu0 }
 0x214   : > { %v3039_v22 = vadd.f32 %v3038_v24, %v2870_v5  ;;  %v6448_v24 = vld [vmem:[%s7025_s29 + $0x38c] sm:$0xf] }
 0x215   : > { %v3379_v12 = vpop.f32.mrf.mxu1 }
 0x216   : > { %v3208_v10 = vadd.f32 %v3207_v50, %v3039_v22  ;;  %2911 = vmatmul.bf16.gmra.mxu2 %v5410_v47  ;;  %3249 = vmatmul.bf16.gmra.mxu0 %v5418_v33  ;;  %v5441_v50 = vld [vmem:[%s7025_s29 + $0x388] sm:$0xf]  ;;  %v6453_v47 = vld [vmem:[%s7025_s29 + $0x3ac] sm:$0xf0]  ;;  %v5451_v22 = vld [vmem:[%s7025_s29 + $0x3b0] sm:$0xf0] }
 0x217   : > { %3080 = vmatmul.bf16.gmra.mxu3 %v5414_v55  ;;  %v6449_v55 = vld [vmem:[%s7025_s29 + $0x394] sm:$0xf] }
 0x218   : > { %v7599_v41 = vadd.f32 %v3376_v35, %v3208_v10  ;;  %3418 = vmatmul.bf16.gmra.mxu1 %v5422_v48  ;;  %v5449_v35 = vld [vmem:[%s7025_s29 + $0x390] sm:$0xf]  ;;  %v5442_v48 = vor.u32 %v6452_v42, %v5441_v50 }
 0x219   : > { %v2872_v2 = vpop.f32.mrf.mxu2 }
 0x21a   : > { %v3041_v21 = vpop.f32.mrf.mxu3  ;;  %v2873_v63 = vadd.f32 %v2872_v2, %v7298_v27  ;;  %v5446_v27 = vor.u32 %v6448_v24, %v5443_v0  ;;  %v5450_v2 = vor.u32 %v6453_v47, %v5449_v35  ;;  %v6456_v47 = vld [vmem:[%s7025_s29 + $0x3cc] sm:$0xf] }
 0x21b   : > { %v3212_v60 = vpop.f32.mrf.mxu0 }
 0x21c   : > { %v3042_v58 = vadd.f32 %v3041_v21, %v2873_v63  ;;  %v5454_v21 = vor.u32 %v6449_v55, %v5451_v22  ;;  %v5475_v55 = vld [vmem:[%s7025_s29 + $0x3e8] sm:$0xf0] }
 0x21d   : > { %v3381_v20 = vpop.f32.mrf.mxu1 }
 0x21e   : > { %v3211_v9 = vadd.f32 %v3210_v43, %v3042_v58 }
 0x220   : > { %v7606_v25 = vadd.f32 %v3379_v12, %v3211_v9  ;;  %v6642_v12 = vld [vmem:[%s8675_s1 + $0x198] sm:$0xff] }
 0x221   : > { %v2874_v57 = vpop.f32.mrf.mxu2  ;;  %3518 = vmatpush.bf16.msra.mxu2 %v6642_v12  ;;  %v5478_v12 = vor.u32 %v6456_v47, %v5475_v55 }
 0x222   : > { %v3043_v5 = vpop.f32.mrf.mxu3  ;;  %v2875_v33 = vadd.f32 %v2874_v57, %v7313_v44  ;;  %v6650_v44 = vld [vmem:[%s8675_s1 + $0x1d8] sm:$0xff]  ;;  %v5473_v57 = vld [vmem:[%s7025_s29 + $0x3c8] sm:$0xf] }
 0x223   : > { %v3215_v43 = vpop.f32.mrf.mxu0  ;;  %3687 = vmatpush.bf16.msra.mxu3 %v6650_v44 }
 0x224   : > { %v3044_v10 = vadd.f32 %v3043_v5, %v2875_v33  ;;  %v6460_v5 = vld [vmem:[%s7025_s29 + $0x3e4] sm:$0xf0]  ;;  %v5481_v33 = vld [vmem:[%s7025_s29 + $0x3d0] sm:$0xf] }
 0x225   : > { %v3384_v63 = vpop.f32.mrf.mxu1 }
 0x226   : > { %v3213_v58 = vadd.f32 %v3212_v60, %v3044_v10  ;;  %2916 = vmatmul.bf16.gmra.mxu2 %v5442_v48  ;;  %3254 = vmatmul.bf16.gmra.mxu0 %v5450_v2  ;;  %v6461_v10 = vld [vmem:[%s7025_s29 + $0x3ec] sm:$0xf0]  ;;  %v6457_v2 = vld [vmem:[%s7025_s29 + $0x3d4] sm:$0xf] }
 0x227   : > { %3085 = vmatmul.bf16.gmra.mxu3 %v5446_v27 }
 0x228   : > { %v7616_v9 = vadd.f32 %v3381_v20, %v3213_v58  ;;  %3423 = vmatmul.bf16.gmra.mxu1 %v5454_v21  ;;  %v5483_v21 = vld [vmem:[%s7025_s29 + $0x3f0] sm:$0xf0]  ;;  %v5474_v58 = vor.u32 %v6460_v5, %v5473_v57 }
 0x229   : > { %v2877_v60 = vpop.f32.mrf.mxu2 }
 0x22a   : > { %v3046_v50 = vpop.f32.mrf.mxu3  ;;  %v2878_v42 = vadd.f32 %v2877_v60, %v7335_v8  ;;  %v5482_v60 = vor.u32 %v6461_v10, %v5481_v33  ;;  %v5507_v10 = vld [vmem:[%s7025_s29 + $0x428] sm:$0xf0] }
 0x22b   : > { %v3217_v20 = vpop.f32.mrf.mxu0 }
 0x22c   : > { %v3047_v24 = vadd.f32 %v3046_v50, %v2878_v42  ;;  %v5486_v50 = vor.u32 %v6457_v2, %v5483_v21 }
 0x22d   : > { %v3386_v0 = vpop.f32.mrf.mxu1 }
 0x22e   : > { %v3216_v35 = vadd.f32 %v3215_v43, %v3047_v24 }
 0x230   : > { %v7626_v22 = vadd.f32 %v3384_v63, %v3216_v35 }
 0x231   : > { %v2879_v48 = vpop.f32.mrf.mxu2 }
 0x232   : > { %v3048_v27 = vpop.f32.mrf.mxu3  ;;  %v2880_v8 = vadd.f32 %v2879_v48, %v7358_v30  ;;  %v6468_v48 = vld [vmem:[%s7025_s29 + $0x424] sm:$0xf0] }
 0x233   : > { %v3220_v43 = vpop.f32.mrf.mxu0 }
 0x234   : > { %v3049_v44 = vadd.f32 %v3048_v27, %v2880_v8  ;;  %v6464_v27 = vld [vmem:[%s7025_s29 + $0x40c] sm:$0xf] }
 0x235   : > { %v3389_v42 = vpop.f32.mrf.mxu1 }
 0x236   : > { %v3218_v63 = vadd.f32 %v3217_v20, %v3049_v44  ;;  %2921 = vmatmul.bf16.gmra.mxu2 %v5474_v58  ;;  %3259 = vmatmul.bf16.gmra.mxu0 %v5482_v60  ;;  %v5505_v20 = vld [vmem:[%s7025_s29 + $0x408] sm:$0xf]  ;;  %v6469_v58 = vld [vmem:[%s7025_s29 + $0x42c] sm:$0xf0]  ;;  %v5515_v44 = vld [vmem:[%s7025_s29 + $0x430] sm:$0xf0] }
 0x237   : > { %3090 = vmatmul.bf16.gmra.mxu3 %v5478_v12  ;;  %v6465_v12 = vld [vmem:[%s7025_s29 + $0x414] sm:$0xf] }
 0x238   : > { %v7633_v24 = vadd.f32 %v3386_v0, %v3218_v63  ;;  %3428 = vmatmul.bf16.gmra.mxu1 %v5486_v50  ;;  %v5513_v0 = vld [vmem:[%s7025_s29 + $0x410] sm:$0xf]  ;;  %v5506_v50 = vor.u32 %v6468_v48, %v5505_v20 }
 0x239   : > { %v2882_v30 = vpop.f32.mrf.mxu2 }
 0x23a   : > { %v3051_v35 = vpop.f32.mrf.mxu3  ;;  %v2883_v57 = vadd.f32 %v2882_v30, %v7369_v56  ;;  %v5510_v56 = vor.u32 %v6464_v27, %v5507_v10  ;;  %v5514_v30 = vor.u32 %v6469_v58, %v5513_v0  ;;  %v5537_v0 = vld [vmem:[%s7025_s29 + $0x448] sm:$0xf]  ;;  %v5539_v58 = vld [vmem:[%s7025_s29 + $0x468] sm:$0xf0] }
 0x23b   : > { %v3222_v47 = vpop.f32.mrf.mxu0 }
 0x23c   : > { %v3052_v5 = vadd.f32 %v3051_v35, %v2883_v57  ;;  %v5518_v35 = vor.u32 %v6465_v12, %v5515_v44  ;;  %v5545_v44 = vld [vmem:[%s7025_s29 + $0x450] sm:$0xf] }
 0x23d   : > { %v3391_v55 = vpop.f32.mrf.mxu1 }
 0x23e   : > { %v3221_v33 = vadd.f32 %v3220_v43, %v3052_v5 }
 0x240   : > { %v7640_v2 = vadd.f32 %v3389_v42, %v3221_v33 }
 0x241   : > { %v2884_v21 = vpop.f32.mrf.mxu2 }
 0x242   : > { %v3053_v8 = vpop.f32.mrf.mxu3  ;;  %v2885_v60 = vadd.f32 %v2884_v21, %v7374_v4  ;;  %v6476_v21 = vld [vmem:[%s7025_s29 + $0x464] sm:$0xf0] }
 0x243   : > { %v3225_v43 = vpop.f32.mrf.mxu0 }
 0x244   : > { %v3054_v63 = vadd.f32 %v3053_v8, %v2885_v60  ;;  %v6472_v8 = vld [vmem:[%s7025_s29 + $0x44c] sm:$0xf] }
 0x245   : > { %v3394_v57 = vpop.f32.mrf.mxu1 }
 0x246   : > { %v3223_v5 = vadd.f32 %v3222_v47, %v3054_v63  ;;  %2926 = vmatmul.bf16.gmra.mxu2 %v5506_v50  ;;  %3264 = vmatmul.bf16.gmra.mxu0 %v5514_v30  ;;  %v6477_v50 = vld [vmem:[%s7025_s29 + $0x46c] sm:$0xf0]  ;;  %v5547_v63 = vld [vmem:[%s7025_s29 + $0x470] sm:$0xf0] }
 0x247   : > { %3095 = vmatmul.bf16.gmra.mxu3 %v5510_v56  ;;  %v6473_v56 = vld [vmem:[%s7025_s29 + $0x454] sm:$0xf] }
 0x248   : > { %v7647_v42 = vadd.f32 %v3391_v55, %v3223_v5  ;;  %3433 = vmatmul.bf16.gmra.mxu1 %v5518_v35  ;;  %v6655_v55 = vld [vmem:[%s8678_s4] sm:$0xff]  ;;  %v5538_v35 = vor.u32 %v6476_v21, %v5537_v0 }
 0x249   : > { %v2887_v4 = vpop.f32.mrf.mxu2  ;;  %4562 = vmatpush.bf16.msra.mxu1 %v6655_v55 }
 0x24a   : > { %v3056_v33 = vpop.f32.mrf.mxu3  ;;  %v2888_v20 = vadd.f32 %v2887_v4, %v7385_v37  ;;  %v5546_v4 = vor.u32 %v6477_v50, %v5545_v44  ;;  %v5571_v50 = vld [vmem:[%s7025_s29 + $0x4a8] sm:$0xf0] }
 0x24b   : > { %v3227_v27 = vpop.f32.mrf.mxu0 }
 0x24c   : > { %v3057_v48 = vadd.f32 %v3056_v33, %v2888_v20  ;;  %v5550_v33 = vor.u32 %v6473_v56, %v5547_v63 }
 0x24d   : > { %v3396_v10 = vpop.f32.mrf.mxu1 }
 0x24e   : > { %v3226_v47 = vadd.f32 %v3225_v43, %v3057_v48  ;;  %v5542_v43 = vor.u32 %v6472_v8, %v5539_v58 }
 0x250   : > { %v7657_v12 = vadd.f32 %v3394_v57, %v3226_v47 }
 0x251   : > { %v2889_v60 = vpop.f32.mrf.mxu2 }
 0x252   : > { %v3058_v37 = vpop.f32.mrf.mxu3  ;;  %v2890_v30 = vadd.f32 %v2889_v60, %v7390_v49  ;;  %v6484_v60 = vld [vmem:[%s7025_s29 + $0x4a4] sm:$0xf0] }
 0x253   : > { %v3230_v20 = vpop.f32.mrf.mxu0 }
 0x254   : > { %v3059_v5 = vadd.f32 %v3058_v37, %v2890_v30  ;;  %v6480_v37 = vld [vmem:[%s7025_s29 + $0x48c] sm:$0xf] }
 0x255   : > { %v3399_v48 = vpop.f32.mrf.mxu1 }
 0x256   : > { %v3228_v57 = vadd.f32 %v3227_v27, %v3059_v5  ;;  %2931 = vmatmul.bf16.gmra.mxu2 %v5538_v35  ;;  %3269 = vmatmul.bf16.gmra.mxu0 %v5546_v4  ;;  %v5569_v27 = vld [vmem:[%s7025_s29 + $0x488] sm:$0xf]  ;;  %v6485_v35 = vld [vmem:[%s7025_s29 + $0x4ac] sm:$0xf0]  ;;  %v5579_v5 = vld [vmem:[%s7025_s29 + $0x4b0] sm:$0xf0] }
 0x257   : > { %3100 = vmatmul.bf16.gmra.mxu3 %v5542_v43  ;;  %v6481_v43 = vld [vmem:[%s7025_s29 + $0x494] sm:$0xf] }
 0x258   : > { %v7664_v47 = vadd.f32 %v3396_v10, %v3228_v57  ;;  %3438 = vmatmul.bf16.gmra.mxu1 %v5550_v33  ;;  %v5577_v10 = vld [vmem:[%s7025_s29 + $0x490] sm:$0xf]  ;;  %v5570_v33 = vor.u32 %v6484_v60, %v5569_v27 }
 0x259   : > { %v2892_v49 = vpop.f32.mrf.mxu2 }
 0x25a   : > { %v3061_v0 = vpop.f32.mrf.mxu3  ;;  %v2893_v55 = vadd.f32 %v2892_v49, %v7401_v19  ;;  %v5574_v19 = vor.u32 %v6480_v37, %v5571_v50  ;;  %v5578_v49 = vor.u32 %v6485_v35, %v5577_v10  ;;  %v6488_v35 = vld [vmem:[%s7025_s29 + $0x4cc] sm:$0xf] }
 0x25b   : > { %v3232_v8 = vpop.f32.mrf.mxu0 }
 0x25c   : > { %v3062_v21 = vadd.f32 %v3061_v0, %v2893_v55  ;;  %v5582_v0 = vor.u32 %v6481_v43, %v5579_v5  ;;  %v5603_v43 = vld [vmem:[%s7025_s29 + $0x4e8] sm:$0xf0] }
 0x25d   : > { %v3401_v58 = vpop.f32.mrf.mxu1 }
 0x25e   : > { %v3231_v44 = vadd.f32 %v3230_v20, %v3062_v21 }
 0x260   : > { %v7671_v56 = vadd.f32 %v3399_v48, %v3231_v44  ;;  %v6641_v48 = vld [vmem:[%s8675_s1 + $0x190] sm:$0xff] }
 0x261   : > { %v2894_v63 = vpop.f32.mrf.mxu2  ;;  %3519 = vmatpush.bf16.msra.mxu2 %v6641_v48  ;;  %v5606_v48 = vor.u32 %v6488_v35, %v5603_v43 }
 0x262   : > { %v3063_v30 = vpop.f32.mrf.mxu3  ;;  %v2895_v4 = vadd.f32 %v2894_v63, %v7406_v36  ;;  %v6649_v36 = vld [vmem:[%s8675_s1 + $0x1d0] sm:$0xff]  ;;  %v5601_v63 = vld [vmem:[%s7025_s29 + $0x4c8] sm:$0xf] }
 0x263   : > { %v3235_v20 = vpop.f32.mrf.mxu0  ;;  %3688 = vmatpush.bf16.msra.mxu3 %v6649_v36 }
 0x264   : > { %v3064_v57 = vadd.f32 %v3063_v30, %v2895_v4  ;;  %v6492_v30 = vld [vmem:[%s7025_s29 + $0x4e4] sm:$0xf0]  ;;  %v5609_v4 = vld [vmem:[%s7025_s29 + $0x4d0] sm:$0xf] }
 0x265   : > { %v3404_v55 = vpop.f32.mrf.mxu1 }
 0x266   : > { %v3233_v21 = vadd.f32 %v3232_v8, %v3064_v57  ;;  %2936 = vmatmul.bf16.gmra.mxu2 %v5570_v33  ;;  %3274 = vmatmul.bf16.gmra.mxu0 %v5578_v49  ;;  %v6493_v57 = vld [vmem:[%s7025_s29 + $0x4ec] sm:$0xf0]  ;;  %v6489_v49 = vld [vmem:[%s7025_s29 + $0x4d4] sm:$0xf] }
 0x267   : > { %3105 = vmatmul.bf16.gmra.mxu3 %v5574_v19 }
 0x268   : > { %v7681_v44 = vadd.f32 %v3401_v58, %v3233_v21  ;;  %3443 = vmatmul.bf16.gmra.mxu1 %v5582_v0  ;;  %v5611_v0 = vld [vmem:[%s7025_s29 + $0x4f0] sm:$0xf0]  ;;  %v5602_v21 = vor.u32 %v6492_v30, %v5601_v63 }
 0x269   : > { %v2897_v8 = vpop.f32.mrf.mxu2 }
 0x26a   : > { %v3066_v27 = vpop.f32.mrf.mxu3  ;;  %v2898_v60 = vadd.f32 %v2897_v8, %v7417_v11  ;;  %v5610_v8 = vor.u32 %v6493_v57, %v5609_v4  ;;  %v5635_v57 = vld [vmem:[%s7025_s29 + $0x528] sm:$0xf0] }
 0x26b   : > { %v3237_v58 = vpop.f32.mrf.mxu0 }
 0x26c   : > { %v3067_v37 = vadd.f32 %v3066_v27, %v2898_v60  ;;  %v5614_v27 = vor.u32 %v6489_v49, %v5611_v0 }
 0x26d   : > { %v3406_v50 = vpop.f32.mrf.mxu1 }
 0x26e   : > { %v3236_v10 = vadd.f32 %v3235_v20, %v3067_v37 }
 0x270   : > { %v7691_v5 = vadd.f32 %v3404_v55, %v3236_v10 }
 0x271   : > { %v2899_v33 = vpop.f32.mrf.mxu2 }
 0x272   : > { %v3068_v19 = vpop.f32.mrf.mxu3  ;;  %v2900_v11 = vadd.f32 %v2899_v33, %v7428_v39  ;;  %v6500_v33 = vld [vmem:[%s7025_s29 + $0x524] sm:$0xf0] }
 0x273   : > { %v3240_v20 = vpop.f32.mrf.mxu0 }
 0x274   : > { %v3069_v36 = vadd.f32 %v3068_v19, %v2900_v11  ;;  %v6496_v19 = vld [vmem:[%s7025_s29 + $0x50c] sm:$0xf] }
 0x275   : > { %v3409_v60 = vpop.f32.mrf.mxu1 }
 0x276   : > { %v3238_v55 = vadd.f32 %v3237_v58, %v3069_v36  ;;  %2941 = vmatmul.bf16.gmra.mxu2 %v5602_v21  ;;  %3279 = vmatmul.bf16.gmra.mxu0 %v5610_v8  ;;  %v5633_v58 = vld [vmem:[%s7025_s29 + $0x508] sm:$0xf]  ;;  %v6501_v21 = vld [vmem:[%s7025_s29 + $0x52c] sm:$0xf0]  ;;  %v5643_v36 = vld [vmem:[%s7025_s29 + $0x530] sm:$0xf0] }
 0x277   : > { %3110 = vmatmul.bf16.gmra.mxu3 %v5606_v48  ;;  %v6497_v48 = vld [vmem:[%s7025_s29 + $0x514] sm:$0xf] }
 0x278   : > { %v7698_v37 = vadd.f32 %v3406_v50, %v3238_v55  ;;  %3448 = vmatmul.bf16.gmra.mxu1 %v5614_v27  ;;  %v5641_v50 = vld [vmem:[%s7025_s29 + $0x510] sm:$0xf]  ;;  %v5634_v27 = vor.u32 %v6500_v33, %v5633_v58 }
 0x279   : > { %v2902_v39 = vpop.f32.mrf.mxu2 }
 0x27a   : > { %v3071_v10 = vpop.f32.mrf.mxu3  ;;  %v2903_v63 = vadd.f32 %v2902_v39, %v7439_v15  ;;  %v5638_v15 = vor.u32 %v6496_v19, %v5635_v57  ;;  %v5642_v39 = vor.u32 %v6501_v21, %v5641_v50  ;;  %v5667_v21 = vld [vmem:[%s7025_s29 + $0x568] sm:$0xf0] }
 0x27b   : > { %v3242_v35 = vpop.f32.mrf.mxu0 }
 0x27c   : > { %v3072_v30 = vadd.f32 %v3071_v10, %v2903_v63  ;;  %v5646_v10 = vor.u32 %v6497_v48, %v5643_v36 }
 0x27d   : > { %v3411_v43 = vpop.f32.mrf.mxu1 }
 0x27e   : > { %v3241_v4 = vadd.f32 %v3240_v20, %v3072_v30 }
 0x280   : > { %v7705_v49 = vadd.f32 %v3409_v60, %v3241_v4 }
 0x281   : > { %v2904_v0 = vpop.f32.mrf.mxu2 }
 0x282   : > { %v3073_v11 = vpop.f32.mrf.mxu3  ;;  %v2905_v8 = vadd.f32 %v2904_v0, %v7444_v45  ;;  %v6508_v0 = vld [vmem:[%s7025_s29 + $0x564] sm:$0xf0] }
 0x283   : > { %v3245_v20 = vpop.f32.mrf.mxu0 }
 0x284   : > { %v3074_v55 = vadd.f32 %v3073_v11, %v2905_v8  ;;  %v6504_v11 = vld [vmem:[%s7025_s29 + $0x54c] sm:$0xf] }
 0x285   : > { %v3414_v63 = vpop.f32.mrf.mxu1 }
 0x286   : > { %v3243_v60 = vadd.f32 %v3242_v35, %v3074_v55  ;;  %2946 = vmatmul.bf16.gmra.mxu2 %v5634_v27  ;;  %3284 = vmatmul.bf16.gmra.mxu0 %v5642_v39  ;;  %v5665_v35 = vld [vmem:[%s7025_s29 + $0x548] sm:$0xf]  ;;  %v6509_v27 = vld [vmem:[%s7025_s29 + $0x56c] sm:$0xf0]  ;;  %v5675_v55 = vld [vmem:[%s7025_s29 + $0x570] sm:$0xf0] }
 0x287   : > { %3115 = vmatmul.bf16.gmra.mxu3 %v5638_v15  ;;  %v6505_v15 = vld [vmem:[%s7025_s29 + $0x554] sm:$0xf] }
 0x288   : > { %v7712_v30 = vadd.f32 %v3411_v43, %v3243_v60  ;;  %3453 = vmatmul.bf16.gmra.mxu1 %v5646_v10  ;;  %v5673_v43 = vld [vmem:[%s7025_s29 + $0x550] sm:$0xf]  ;;  %v5666_v10 = vor.u32 %v6508_v0, %v5665_v35 }
 0x289   : > { %v2907_v45 = vpop.f32.mrf.mxu2 }
 0x28a   : > { %v3076_v4 = vpop.f32.mrf.mxu3  ;;  %v2908_v58 = vadd.f32 %v2907_v45, %v7455_v31  ;;  %v5670_v31 = vor.u32 %v6504_v11, %v5667_v21  ;;  %v5674_v45 = vor.u32 %v6509_v27, %v5673_v43  ;;  %v5699_v27 = vld [vmem:[%s7025_s29 + $0x5a8] sm:$0xf0] }
 0x28b   : > { %v3247_v19 = vpop.f32.mrf.mxu0 }
 0x28c   : > { %v3077_v33 = vadd.f32 %v3076_v4, %v2908_v58  ;;  %v5678_v4 = vor.u32 %v6505_v15, %v5675_v55 }
 0x28d   : > { %v3416_v57 = vpop.f32.mrf.mxu1 }
 0x28e   : > { %v3246_v50 = vadd.f32 %v3245_v20, %v3077_v33 }
 0x290   : > { %v7719_v48 = vadd.f32 %v3414_v63, %v3246_v50 }
 0x291   : > { %v2909_v36 = vpop.f32.mrf.mxu2 }
 0x292   : > { %v3078_v8 = vpop.f32.mrf.mxu3  ;;  %v2910_v39 = vadd.f32 %v2909_v36, %v7460_v59  ;;  %v6516_v36 = vld [vmem:[%s7025_s29 + $0x5a4] sm:$0xf0] }
 0x293   : > { %v3250_v20 = vpop.f32.mrf.mxu0 }
 0x294   : > { %v3079_v60 = vadd.f32 %v3078_v8, %v2910_v39  ;;  %v6512_v8 = vld [vmem:[%s7025_s29 + $0x58c] sm:$0xf] }
 0x295   : > { %v3419_v58 = vpop.f32.mrf.mxu1 }
 0x296   : > { %v3248_v63 = vadd.f32 %v3247_v19, %v3079_v60  ;;  %2951 = vmatmul.bf16.gmra.mxu2 %v5666_v10  ;;  %3289 = vmatmul.bf16.gmra.mxu0 %v5674_v45  ;;  %v5697_v19 = vld [vmem:[%s7025_s29 + $0x588] sm:$0xf]  ;;  %v6517_v10 = vld [vmem:[%s7025_s29 + $0x5ac] sm:$0xf0]  ;;  %v5707_v60 = vld [vmem:[%s7025_s29 + $0x5b0] sm:$0xf0] }
 0x297   : > { %3120 = vmatmul.bf16.gmra.mxu3 %v5670_v31  ;;  %v6513_v31 = vld [vmem:[%s7025_s29 + $0x594] sm:$0xf] }
 0x298   : > { %v7726_v33 = vadd.f32 %v3416_v57, %v3248_v63  ;;  %3458 = vmatmul.bf16.gmra.mxu1 %v5678_v4  ;;  %v5705_v57 = vld [vmem:[%s7025_s29 + $0x590] sm:$0xf]  ;;  %v5698_v4 = vor.u32 %v6516_v36, %v5697_v19 }
 0x299   : > { %v2912_v59 = vpop.f32.mrf.mxu2 }
 0x29a   : > { %v3081_v50 = vpop.f32.mrf.mxu3  ;;  %v2913_v35 = vadd.f32 %v2912_v59, %v7471_v23  ;;  %v5702_v23 = vor.u32 %v6512_v8, %v5699_v27  ;;  %v5706_v59 = vor.u32 %v6517_v10, %v5705_v57  ;;  %v6520_v10 = vld [vmem:[%s7025_s29 + $0x5cc] sm:$0xf] }
 0x29b   : > { %v3252_v11 = vpop.f32.mrf.mxu0 }
 0x29c   : > { %v3082_v0 = vadd.f32 %v3081_v50, %v2913_v35  ;;  %v5710_v50 = vor.u32 %v6513_v31, %v5707_v60  ;;  %v5731_v31 = vld [vmem:[%s7025_s29 + $0x5e8] sm:$0xf0] }
 0x29d   : > { %v3421_v21 = vpop.f32.mrf.mxu1 }
 0x29e   : > { %v3251_v43 = vadd.f32 %v3250_v20, %v3082_v0 }
 0x2a0   : > { %v7733_v15 = vadd.f32 %v3419_v58, %v3251_v43  ;;  %v6640_v58 = vld [vmem:[%s8675_s1 + $0x188] sm:$0xff] }
 0x2a1   : > { %v2914_v55 = vpop.f32.mrf.mxu2  ;;  %3520 = vmatpush.bf16.msra.mxu2 %v6640_v58  ;;  %v5734_v58 = vor.u32 %v6520_v10, %v5731_v31 }
 0x2a2   : > { %v3083_v39 = vpop.f32.mrf.mxu3  ;;  %v2915_v45 = vadd.f32 %v2914_v55, %v7476_v13  ;;  %v6648_v13 = vld [vmem:[%s8675_s1 + $0x1c8] sm:$0xff] }
 0x2a3   : > { %v3255_v20 = vpop.f32.mrf.mxu0  ;;  %3689 = vmatpush.bf16.msra.mxu3 %v6648_v13  ;;  %v5729_v55 = vld [vmem:[%s7025_s29 + $0x5c8] sm:$0xf] }
 0x2a4   : > { %v3084_v63 = vadd.f32 %v3083_v39, %v2915_v45  ;;  %v6524_v39 = vld [vmem:[%s7025_s29 + $0x5e4] sm:$0xf0]  ;;  %v5737_v45 = vld [vmem:[%s7025_s29 + $0x5d0] sm:$0xf] }
 0x2a5   : > { %v3424_v35 = vpop.f32.mrf.mxu1 }
 0x2a6   : > { %v3253_v0 = vadd.f32 %v3252_v11, %v3084_v63  ;;  %2956 = vmatmul.bf16.gmra.mxu2 %v5698_v4  ;;  %3294 = vmatmul.bf16.gmra.mxu0 %v5706_v59  ;;  %v6525_v63 = vld [vmem:[%s7025_s29 + $0x5ec] sm:$0xf0]  ;;  %v6521_v59 = vld [vmem:[%s7025_s29 + $0x5d4] sm:$0xf] }
 0x2a7   : > { %3125 = vmatmul.bf16.gmra.mxu3 %v5702_v23 }
 0x2a8   : > { %v7743_v43 = vadd.f32 %v3421_v21, %v3253_v0  ;;  %3463 = vmatmul.bf16.gmra.mxu1 %v5710_v50  ;;  %v5739_v50 = vld [vmem:[%s7025_s29 + $0x5f0] sm:$0xf0]  ;;  %v5730_v0 = vor.u32 %v6524_v39, %v5729_v55 }
 0x2a9   : > { %v2917_v11 = vpop.f32.mrf.mxu2 }
 0x2aa   : > { %v3086_v19 = vpop.f32.mrf.mxu3  ;;  %v2918_v36 = vadd.f32 %v2917_v11, %v7487_v7  ;;  %v5738_v11 = vor.u32 %v6525_v63, %v5737_v45  ;;  %v5763_v63 = vld [vmem:[%s7025_s29 + $0x628] sm:$0xf0] }
 0x2ab   : > { %v3257_v21 = vpop.f32.mrf.mxu0 }
 0x2ac   : > { %v3087_v8 = vadd.f32 %v3086_v19, %v2918_v36  ;;  %v5742_v19 = vor.u32 %v6521_v59, %v5739_v50 }
 0x2ad   : > { %v3426_v27 = vpop.f32.mrf.mxu1 }
 0x2ae   : > { %v3256_v57 = vadd.f32 %v3255_v20, %v3087_v8 }
 0x2b0   : > { %v7753_v60 = vadd.f32 %v3424_v35, %v3256_v57 }
 0x2b1   : > { %v2919_v4 = vpop.f32.mrf.mxu2 }
 0x2b2   : > { %v3088_v23 = vpop.f32.mrf.mxu3  ;;  %v2920_v7 = vadd.f32 %v2919_v4, %v7498_v40  ;;  %v6532_v4 = vld [vmem:[%s7025_s29 + $0x624] sm:$0xf0] }
 0x2b3   : > { %v3260_v20 = vpop.f32.mrf.mxu0 }
 0x2b4   : > { %v3089_v13 = vadd.f32 %v3088_v23, %v2920_v7  ;;  %v6528_v23 = vld [vmem:[%s7025_s29 + $0x60c] sm:$0xf] }
 0x2b5   : > { %v3429_v36 = vpop.f32.mrf.mxu1 }
 0x2b6   : > { %v3258_v35 = vadd.f32 %v3257_v21, %v3089_v13  ;;  %2961 = vmatmul.bf16.gmra.mxu2 %v5730_v0  ;;  %3299 = vmatmul.bf16.gmra.mxu0 %v5738_v11  ;;  %v5761_v21 = vld [vmem:[%s7025_s29 + $0x608] sm:$0xf]  ;;  %v6533_v0 = vld [vmem:[%s7025_s29 + $0x62c] sm:$0xf0]  ;;  %v5771_v13 = vld [vmem:[%s7025_s29 + $0x630] sm:$0xf0] }
 0x2b7   : > { %3130 = vmatmul.bf16.gmra.mxu3 %v5734_v58  ;;  %v6529_v58 = vld [vmem:[%s7025_s29 + $0x614] sm:$0xf] }
 0x2b8   : > { %v7760_v8 = vadd.f32 %v3426_v27, %v3258_v35  ;;  %3468 = vmatmul.bf16.gmra.mxu1 %v5742_v19  ;;  %v5769_v27 = vld [vmem:[%s7025_s29 + $0x610] sm:$0xf]  ;;  %v5762_v19 = vor.u32 %v6532_v4, %v5761_v21 }
 0x2b9   : > { %v2922_v40 = vpop.f32.mrf.mxu2 }
 0x2ba   : > { %v3091_v57 = vpop.f32.mrf.mxu3  ;;  %v2923_v55 = vadd.f32 %v2922_v40, %v7509_v6  ;;  %v5766_v6 = vor.u32 %v6528_v23, %v5763_v63  ;;  %v5770_v40 = vor.u32 %v6533_v0, %v5769_v27  ;;  %v5795_v0 = vld [vmem:[%s7025_s29 + $0x668] sm:$0xf0] }
 0x2bb   : > { %v3262_v10 = vpop.f32.mrf.mxu0 }
 0x2bc   : > { %v3092_v39 = vadd.f32 %v3091_v57, %v2923_v55  ;;  %v5774_v57 = vor.u32 %v6529_v58, %v5771_v13 }
 0x2bd   : > { %v3431_v31 = vpop.f32.mrf.mxu1 }
 0x2be   : > { %v3261_v45 = vadd.f32 %v3260_v20, %v3092_v39 }
 0x2c0   : > { %v7767_v59 = vadd.f32 %v3429_v36, %v3261_v45 }
 0x2c1   : > { %v2924_v50 = vpop.f32.mrf.mxu2 }
 0x2c2   : > { %v3093_v7 = vpop.f32.mrf.mxu3  ;;  %v2925_v11 = vadd.f32 %v2924_v50, %v7514_v53  ;;  %v6540_v50 = vld [vmem:[%s7025_s29 + $0x664] sm:$0xf0] }
 0x2c3   : > { %v3265_v20 = vpop.f32.mrf.mxu0 }
 0x2c4   : > { %v3094_v35 = vadd.f32 %v3093_v7, %v2925_v11  ;;  %v6536_v7 = vld [vmem:[%s7025_s29 + $0x64c] sm:$0xf] }
 0x2c5   : > { %v3434_v55 = vpop.f32.mrf.mxu1 }
 0x2c6   : > { %v3263_v36 = vadd.f32 %v3262_v10, %v3094_v35  ;;  %2966 = vmatmul.bf16.gmra.mxu2 %v5762_v19  ;;  %3304 = vmatmul.bf16.gmra.mxu0 %v5770_v40  ;;  %v5793_v10 = vld [vmem:[%s7025_s29 + $0x648] sm:$0xf]  ;;  %v6541_v19 = vld [vmem:[%s7025_s29 + $0x66c] sm:$0xf0]  ;;  %v5803_v35 = vld [vmem:[%s7025_s29 + $0x670] sm:$0xf0] }
 0x2c7   : > { %3135 = vmatmul.bf16.gmra.mxu3 %v5766_v6  ;;  %v6537_v6 = vld [vmem:[%s7025_s29 + $0x654] sm:$0xf] }
 0x2c8   : > { %v7774_v39 = vadd.f32 %v3431_v31, %v3263_v36  ;;  %3473 = vmatmul.bf16.gmra.mxu1 %v5774_v57  ;;  %v5801_v31 = vld [vmem:[%s7025_s29 + $0x650] sm:$0xf]  ;;  %v5794_v57 = vor.u32 %v6540_v50, %v5793_v10 }
 0x2c9   : > { %v2927_v53 = vpop.f32.mrf.mxu2 }
 0x2ca   : > { %v3096_v45 = vpop.f32.mrf.mxu3  ;;  %v2928_v21 = vadd.f32 %v2927_v53, %v7196_v14  ;;  %v5798_v14 = vor.u32 %v6536_v7, %v5795_v0  ;;  %v5802_v53 = vor.u32 %v6541_v19, %v5801_v31  ;;  %v5827_v19 = vld [vmem:[%s7025_s29 + $0x6a8] sm:$0xf0] }
 0x2cb   : > { %v3267_v23 = vpop.f32.mrf.mxu0 }
 0x2cc   : > { %v3097_v4 = vadd.f32 %v3096_v45, %v2928_v21  ;;  %v5806_v45 = vor.u32 %v6537_v6, %v5803_v35 }
 0x2cd   : > { %v3436_v63 = vpop.f32.mrf.mxu1 }
 0x2ce   : > { %v3266_v27 = vadd.f32 %v3265_v20, %v3097_v4 }
 0x2d0   : > { %v7781_v58 = vadd.f32 %v3434_v55, %v3266_v27 }
 0x2d1   : > { %v2929_v13 = vpop.f32.mrf.mxu2 }
 0x2d2   : > { %v3098_v11 = vpop.f32.mrf.mxu3  ;;  %v2930_v40 = vadd.f32 %v2929_v13, %v7208_v28  ;;  %v6548_v13 = vld [vmem:[%s7025_s29 + $0x6a4] sm:$0xf0] }
 0x2d3   : > { %v3270_v20 = vpop.f32.mrf.mxu0 }
 0x2d4   : > { %v3099_v36 = vadd.f32 %v3098_v11, %v2930_v40  ;;  %v6544_v11 = vld [vmem:[%s7025_s29 + $0x68c] sm:$0xf] }
 0x2d5   : > { %v3439_v21 = vpop.f32.mrf.mxu1 }
 0x2d6   : > { %v3268_v55 = vadd.f32 %v3267_v23, %v3099_v36  ;;  %2971 = vmatmul.bf16.gmra.mxu2 %v5794_v57  ;;  %3309 = vmatmul.bf16.gmra.mxu0 %v5802_v53  ;;  %v5825_v23 = vld [vmem:[%s7025_s29 + $0x688] sm:$0xf]  ;;  %v6549_v57 = vld [vmem:[%s7025_s29 + $0x6ac] sm:$0xf0]  ;;  %v5835_v36 = vld [vmem:[%s7025_s29 + $0x6b0] sm:$0xf0] }
 0x2d7   : > { %3140 = vmatmul.bf16.gmra.mxu3 %v5798_v14  ;;  %v6545_v14 = vld [vmem:[%s7025_s29 + $0x694] sm:$0xf] }
 0x2d8   : > { %v7788_v4 = vadd.f32 %v3436_v63, %v3268_v55  ;;  %3478 = vmatmul.bf16.gmra.mxu1 %v5806_v45  ;;  %v5833_v63 = vld [vmem:[%s7025_s29 + $0x690] sm:$0xf]  ;;  %v5826_v45 = vor.u32 %v6548_v13, %v5825_v23 }
 0x2d9   : > { %v2932_v28 = vpop.f32.mrf.mxu2 }
 0x2da   : > { %v3101_v27 = vpop.f32.mrf.mxu3  ;;  %v2933_v10 = vadd.f32 %v2932_v28, %v7212_v38  ;;  %v5830_v38 = vor.u32 %v6544_v11, %v5827_v19  ;;  %v5834_v28 = vor.u32 %v6549_v57, %v5833_v63  ;;  %v6552_v57 = vld [vmem:[%s7025_s29 + $0x6cc] sm:$0xf] }
 0x2db   : > { %v3272_v7 = vpop.f32.mrf.mxu0 }
 0x2dc   : > { %v3102_v50 = vadd.f32 %v3101_v27, %v2933_v10  ;;  %v5838_v27 = vor.u32 %v6545_v14, %v5835_v36  ;;  %v5859_v14 = vld [vmem:[%s7025_s29 + $0x6e8] sm:$0xf0] }
 0x2dd   : > { %v3441_v0 = vpop.f32.mrf.mxu1 }
 0x2de   : > { %v3271_v31 = vadd.f32 %v3270_v20, %v3102_v50 }
 0x2e0   : > { %v7795_v6 = vadd.f32 %v3439_v21, %v3271_v31  ;;  %v6639_v21 = vld [vmem:[%s8675_s1 + $0x180] sm:$0xff] }
 0x2e1   : > { %v2934_v35 = vpop.f32.mrf.mxu2  ;;  %3521 = vmatpush.bf16.msra.mxu2 %v6639_v21  ;;  %v5862_v21 = vor.u32 %v6552_v57, %v5859_v14 }
 0x2e2   : > { %v3103_v40 = vpop.f32.mrf.mxu3  ;;  %v2935_v53 = vadd.f32 %v2934_v35, %v7224_v52  ;;  %v6647_v52 = vld [vmem:[%s8675_s1 + $0x1c0] sm:$0xff]  ;;  %v5857_v35 = vld [vmem:[%s7025_s29 + $0x6c8] sm:$0xf] }
 0x2e3   : > { %v3275_v20 = vpop.f32.mrf.mxu0  ;;  %3690 = vmatpush.bf16.msra.mxu3 %v6647_v52 }
 0x2e4   : > { %v3104_v55 = vadd.f32 %v3103_v40, %v2935_v53  ;;  %v6556_v40 = vld [vmem:[%s7025_s29 + $0x6e4] sm:$0xf0]  ;;  %v5865_v53 = vld [vmem:[%s7025_s29 + $0x6d0] sm:$0xf] }
 0x2e5   : > { %v3444_v10 = vpop.f32.mrf.mxu1 }
 0x2e6   : > { %v3273_v50 = vadd.f32 %v3272_v7, %v3104_v55  ;;  %2976 = vmatmul.bf16.gmra.mxu2 %v5826_v45  ;;  %3314 = vmatmul.bf16.gmra.mxu0 %v5834_v28  ;;  %v6557_v55 = vld [vmem:[%s7025_s29 + $0x6ec] sm:$0xf0]  ;;  %v6553_v28 = vld [vmem:[%s7025_s29 + $0x6d4] sm:$0xf] }
 0x2e7   : > { %3145 = vmatmul.bf16.gmra.mxu3 %v5830_v38 }
 0x2e8   : > { %v7805_v31 = vadd.f32 %v3441_v0, %v3273_v50  ;;  %3483 = vmatmul.bf16.gmra.mxu1 %v5838_v27  ;;  %v5867_v27 = vld [vmem:[%s7025_s29 + $0x6f0] sm:$0xf0]  ;;  %v5858_v50 = vor.u32 %v6556_v40, %v5857_v35 }
 0x2e9   : > { %v2937_v7 = vpop.f32.mrf.mxu2 }
 0x2ea   : > { %v3106_v23 = vpop.f32.mrf.mxu3  ;;  %v2938_v13 = vadd.f32 %v2937_v7, %v7237_v1  ;;  %v5866_v7 = vor.u32 %v6557_v55, %v5865_v53  ;;  %v5891_v55 = vld [vmem:[%s7025_s29 + $0x728] sm:$0xf0] }
 0x2eb   : > { %v3277_v0 = vpop.f32.mrf.mxu0 }
 0x2ec   : > { %v3107_v11 = vadd.f32 %v3106_v23, %v2938_v13  ;;  %v5870_v23 = vor.u32 %v6553_v28, %v5867_v27 }
 0x2ed   : > { %v3446_v19 = vpop.f32.mrf.mxu1 }
 0x2ee   : > { %v3276_v63 = vadd.f32 %v3275_v20, %v3107_v11 }
 0x2f0   : > { %v7815_v36 = vadd.f32 %v3444_v10, %v3276_v63 }
 0x2f1   : > { %v2939_v45 = vpop.f32.mrf.mxu2 }
 0x2f2   : > { %v3108_v38 = vpop.f32.mrf.mxu3  ;;  %v2940_v1 = vadd.f32 %v2939_v45, %v7249_v17  ;;  %v6564_v45 = vld [vmem:[%s7025_s29 + $0x724] sm:$0xf0] }
 0x2f3   : > { %v3280_v20 = vpop.f32.mrf.mxu0 }
 0x2f4   : > { %v3109_v52 = vadd.f32 %v3108_v38, %v2940_v1  ;;  %v6560_v38 = vld [vmem:[%s7025_s29 + $0x70c] sm:$0xf] }
 0x2f5   : > { %v3449_v13 = vpop.f32.mrf.mxu1 }
 0x2f6   : > { %v3278_v10 = vadd.f32 %v3277_v0, %v3109_v52  ;;  %2981 = vmatmul.bf16.gmra.mxu2 %v5858_v50  ;;  %3319 = vmatmul.bf16.gmra.mxu0 %v5866_v7  ;;  %v5889_v0 = vld [vmem:[%s7025_s29 + $0x708] sm:$0xf]  ;;  %v6565_v50 = vld [vmem:[%s7025_s29 + $0x72c] sm:$0xf0]  ;;  %v5899_v52 = vld [vmem:[%s7025_s29 + $0x730] sm:$0xf0] }
 0x2f7   : > { %3150 = vmatmul.bf16.gmra.mxu3 %v5862_v21  ;;  %v6561_v21 = vld [vmem:[%s7025_s29 + $0x714] sm:$0xf] }
 0x2f8   : > { %v7822_v11 = vadd.f32 %v3446_v19, %v3278_v10  ;;  %3488 = vmatmul.bf16.gmra.mxu1 %v5870_v23  ;;  %v5897_v19 = vld [vmem:[%s7025_s29 + $0x710] sm:$0xf]  ;;  %v5890_v23 = vor.u32 %v6564_v45, %v5889_v0 }
 0x2f9   : > { %v2942_v17 = vpop.f32.mrf.mxu2 }
 0x2fa   : > { %v3111_v63 = vpop.f32.mrf.mxu3  ;;  %v2943_v35 = vadd.f32 %v2942_v17, %v7253_v29  ;;  %v5894_v29 = vor.u32 %v6560_v38, %v5891_v55  ;;  %v5898_v17 = vor.u32 %v6565_v50, %v5897_v19  ;;  %v5921_v19 = vld [vmem:[%s7025_s29 + $0x748] sm:$0xf] }
 0x2fb   : > { %v3282_v57 = vpop.f32.mrf.mxu0 }
 0x2fc   : > { %v3112_v40 = vadd.f32 %v3111_v63, %v2943_v35  ;;  %v5902_v63 = vor.u32 %v6561_v21, %v5899_v52  ;;  %v5929_v21 = vld [vmem:[%s7025_s29 + $0x750] sm:$0xf] }
 0x2fd   : > { %v3451_v14 = vpop.f32.mrf.mxu1 }
 0x2fe   : > { %v3281_v53 = vadd.f32 %v3280_v20, %v3112_v40 }
 0x300   : > { %v7829_v28 = vadd.f32 %v3449_v13, %v3281_v53 }
 0x301   : > { %v2944_v27 = vpop.f32.mrf.mxu2 }
 0x302   : > { %v3113_v1 = vpop.f32.mrf.mxu3  ;;  %v2945_v7 = vadd.f32 %v2944_v27, %v7265_v46  ;;  %v6572_v27 = vld [vmem:[%s7025_s29 + $0x764] sm:$0xf0] }
 0x303   : > { %v3285_v20 = vpop.f32.mrf.mxu0 }
 0x304   : > { %v3114_v10 = vadd.f32 %v3113_v1, %v2945_v7  ;;  %v6568_v1 = vld [vmem:[%s7025_s29 + $0x74c] sm:$0xf] }
 0x305   : > { %v3454_v35 = vpop.f32.mrf.mxu1 }
 0x306   : > { %v3283_v13 = vadd.f32 %v3282_v57, %v3114_v10  ;;  %2986 = vmatmul.bf16.gmra.mxu2 %v5890_v23  ;;  %3324 = vmatmul.bf16.gmra.mxu0 %v5898_v17  ;;  %v6573_v23 = vld [vmem:[%s7025_s29 + $0x76c] sm:$0xf0]  ;;  %v5931_v10 = vld [vmem:[%s7025_s29 + $0x770] sm:$0xf0]  ;;  %v5922_v17 = vor.u32 %v6572_v27, %v5921_v19 }
 0x307   : > { %3155 = vmatmul.bf16.gmra.mxu3 %v5894_v29  ;;  %v6569_v29 = vld [vmem:[%s7025_s29 + $0x754] sm:$0xf] }
 0x308   : > { %v7836_v40 = vadd.f32 %v3451_v14, %v3283_v13  ;;  %3493 = vmatmul.bf16.gmra.mxu1 %v5902_v63  ;;  %v5923_v14 = vld [vmem:[%s7025_s29 + $0x768] sm:$0xf0] }
 0x309   : > { %v2947_v46 = vpop.f32.mrf.mxu2  ;;  %v5926_v63 = vor.u32 %v6568_v1, %v5923_v14 }
 0x30a   : > { %v3116_v53 = vpop.f32.mrf.mxu3  ;;  %v2948_v0 = vadd.f32 %v2947_v46, %v7278_v61  ;;  %v5934_v46 = vor.u32 %v6569_v29, %v5931_v10  ;;  %v5961_v10 = vld [vmem:[%s7025_s29 + $0x790] sm:$0xf] }
 0x30b   : > { %v7839_v38 = vpop.f32.mrf.mxu0 }
 0x30c   : > { %v3117_v45 = vadd.f32 %v3116_v53, %v2948_v0 }
 0x30d   : > { %v7841_v55 = vpop.f32.mrf.mxu1 }
 0x30e   : > { %8708 = vst [vmem:[#allocation33_spill] sm:$0xff] %v7841_v55  ;;  %v3286_v57 = vadd.f32 %v3285_v20, %v3117_v45  ;;  %v5930_v20 = vor.u32 %v6573_v23, %v5929_v21  ;;  %v8709_v45 = vld [vmem:[#allocation10_spill] sm:$0xff]  ;;  %v8713_v55 = vld [vmem:[#allocation11_spill] sm:$0xff] }
 0x30f   : > { %v5953_v21 = vld [vmem:[%s7025_s29 + $0x788] sm:$0xf]  ;;  %v5955_v23 = vld [vmem:[%s7025_s29 + $0x7a8] sm:$0xf0] }
 0x310   : > { %v7847_v50 = vadd.f32 %v3454_v35, %v3286_v57 }
 0x311   : > { %v2949_v52 = vpop.f32.mrf.mxu2 }
 0x312   : > { %v3118_v7 = vpop.f32.mrf.mxu3  ;;  %v2950_v61 = vadd.f32 %v2949_v52, %v7293_v16  ;;  %v6580_v52 = vld [vmem:[%s7025_s29 + $0x7a4] sm:$0xf0] }
 0x313   : > { %v3290_v53 = vpop.f32.mrf.mxu0 }
 0x314   : > { %v7854_v13 = vadd.f32 %v3118_v7, %v2950_v61  ;;  %v6576_v7 = vld [vmem:[%s7025_s29 + $0x78c] sm:$0xf] }
 0x315   : > { %v3459_v35 = vpop.f32.mrf.mxu1 }
 0x316   : > { %2991 = vmatmul.bf16.gmra.mxu2 %v5922_v17  ;;  %3329 = vmatmul.bf16.gmra.mxu0 %v5930_v20  ;;  %v6577_v20 = vld [vmem:[%s7025_s29 + $0x794] sm:$0xf] }
 0x317   : > { %3160 = vmatmul.bf16.gmra.mxu3 %v5926_v63  ;;  %v6581_v63 = vld [vmem:[%s7025_s29 + $0x7ac] sm:$0xf0] }
 0x318   : > { %3498 = vmatmul.bf16.gmra.mxu1 %v5934_v46  ;;  %v5963_v46 = vld [vmem:[%s7025_s29 + $0x7b0] sm:$0xf0] }
 0x319   : > { %v2952_v0 = vpop.f32.mrf.mxu2 }
 0x31a   : > { %v3121_v16 = vpop.f32.mrf.mxu3  ;;  %v2953_v57 = vadd.f32 %v2952_v0, %v8709_v45  ;;  %v5958_v45 = vor.u32 %v6576_v7, %v5955_v23 }
 0x31b   : > { %v7857_v27 = vpop.f32.mrf.mxu0 }
 0x31c   : > { %v3122_v19 = vadd.f32 %v3121_v16, %v2953_v57  ;;  %8710 = vst [vmem:[#allocation10_spill] sm:$0xff] %v7857_v27  ;;  %v5954_v16 = vor.u32 %v6580_v52, %v5953_v21  ;;  %v8715_v21 = vld [vmem:[#allocation12_spill] sm:$0xff] }
 0x31d   : > { %v7859_v1 = vpop.f32.mrf.mxu1  ;;  %v6585_v27 = vld [vmem:[%s7025_s29 + $0x7d4] sm:$0xf] }
 0x31e   : > { %8711 = vst [vmem:[#allocation34_spill] sm:$0xff] %v7859_v1  ;;  %v3291_v14 = vadd.f32 %v3290_v53, %v3122_v19  ;;  %v5962_v53 = vor.u32 %v6581_v63, %v5961_v10  ;;  %v5966_v19 = vor.u32 %v6577_v20, %v5963_v46  ;;  %v6588_v63 = vld [vmem:[%s7025_s29 + $0x7e4] sm:$0xf0]  ;;  %v6584_v20 = vld [vmem:[%s7025_s29 + $0x7cc] sm:$0xf] }
 0x31f   : > { %v5987_v46 = vld [vmem:[%s7025_s29 + $0x7e8] sm:$0xf0] }
 0x320   : > { %v7865_v29 = vadd.f32 %v3459_v35, %v3291_v14 }
 0x321   : > { %v2954_v61 = vpop.f32.mrf.mxu2 }
 0x322   : > { %8712 = vst [vmem:[#allocation35_spill] sm:$0xff] %v7865_v29  ;;  %v3123_v17 = vpop.f32.mrf.mxu3  ;;  %v2955_v0 = vadd.f32 %v2954_v61, %v8713_v55  ;;  %v8719_v29 = vld [vmem:[#allocation13_spill] sm:$0xff] }
 0x323   : > { %v3295_v1 = vpop.f32.mrf.mxu0 }
 0x324   : > { %v7872_v57 = vadd.f32 %v3123_v17, %v2955_v0  ;;  %v5985_v17 = vld [vmem:[%s7025_s29 + $0x7c8] sm:$0xf] }
 0x325   : > { %v3464_v35 = vpop.f32.mrf.mxu1 }
 0x326   : > { %8714 = vst [vmem:[#allocation11_spill] sm:$0xff] %v7872_v57  ;;  %2996 = vmatmul.bf16.gmra.mxu2 %v5954_v16  ;;  %3334 = vmatmul.bf16.gmra.mxu0 %v5962_v53  ;;  %v5993_v16 = vld [vmem:[%s7025_s29 + $0x7d0] sm:$0xf]  ;;  %v5995_v57 = vld [vmem:[%s7025_s29 + $0x7f0] sm:$0xf0] }
 0x327   : > { %3165 = vmatmul.bf16.gmra.mxu3 %v5958_v45 }
 0x328   : > { %3503 = vmatmul.bf16.gmra.mxu1 %v5966_v19  ;;  %v6589_v19 = vld [vmem:[%s7025_s29 + $0x7ec] sm:$0xf0] }
 0x329   : > { %v2957_v14 = vpop.f32.mrf.mxu2 }
 0x32a   : > { %v3126_v55 = vpop.f32.mrf.mxu3  ;;  %v2958_v52 = vadd.f32 %v2957_v14, %v8715_v21  ;;  %v5990_v21 = vor.u32 %v6584_v20, %v5987_v46 }
 0x32b   : > { %v7875_v23 = vpop.f32.mrf.mxu0 }
 0x32c   : > { %v3127_v7 = vadd.f32 %v3126_v55, %v2958_v52  ;;  %8716 = vst [vmem:[#allocation12_spill] sm:$0xff] %v7875_v23  ;;  %v5986_v55 = vor.u32 %v6588_v63, %v5985_v17 }
 0x32d   : > { %v7877_v10 = vpop.f32.mrf.mxu1 }
 0x32e   : > { %8717 = vst [vmem:[#allocation36_spill] sm:$0xff] %v7877_v10  ;;  %v3296_v61 = vadd.f32 %v3295_v1, %v3127_v7  ;;  %v5994_v1 = vor.u32 %v6589_v19, %v5993_v16  ;;  %v5998_v7 = vor.u32 %v6585_v27, %v5995_v57  ;;  %v5009_v16 = vld [vmem:[%s7025_s29 + $0x18] sm:$0xf]  ;;  %v6338_v57 = vld [vmem:[%s7025_s29 + $0x1c] sm:$0xf] }
 0x32f   : > { %v6342_v27 = vld [vmem:[%s7025_s29 + $0x34] sm:$0xf0] }
 0x330   : > { %v7883_v0 = vadd.f32 %v3464_v35, %v3296_v61 }
 0x331   : > { %v2959_v45 = vpop.f32.mrf.mxu2 }
 0x332   : > { %8718 = vst [vmem:[#allocation37_spill] sm:$0xff] %v7883_v0  ;;  %v3128_v53 = vpop.f32.mrf.mxu3  ;;  %v2960_v14 = vadd.f32 %v2959_v45, %v8719_v29  ;;  %v8721_v0 = vld [vmem:[#allocation14_spill] sm:$0xff]  ;;  %v5011_v45 = vld [vmem:[%s7025_s29 + $0x38] sm:$0xf0] }
 0x333   : > { %v3300_v10 = vpop.f32.mrf.mxu0 }
 0x334   : > { %v7890_v52 = vadd.f32 %v3128_v53, %v2960_v14 }
 0x335   : > { %v3469_v35 = vpop.f32.mrf.mxu1 }
 0x336   : > { %8720 = vst [vmem:[#allocation13_spill] sm:$0xff] %v7890_v52  ;;  %3001 = vmatmul.bf16.gmra.mxu2 %v5986_v55  ;;  %3339 = vmatmul.bf16.gmra.mxu0 %v5994_v1  ;;  %v8725_v55 = vld [vmem:[#allocation15_spill] sm:$0xff]  ;;  %v5010_v1 = vor.u32 %v6342_v27, %v5009_v16  ;;  %v5041_v16 = vld [vmem:[%s7025_s29 + $0x58] sm:$0xf] }
 0x337   : > { %3170 = vmatmul.bf16.gmra.mxu3 %v5990_v21  ;;  %v6350_v27 = vld [vmem:[%s7025_s29 + $0x74] sm:$0xf0] }
 0x338   : > { %3508 = vmatmul.bf16.gmra.mxu1 %v5998_v7 }
 0x339   : > { %v2962_v61 = vpop.f32.mrf.mxu2 }
 0x33a   : > { %v3131_v23 = vpop.f32.mrf.mxu3  ;;  %v2963_v29 = vadd.f32 %v2962_v61, %v8721_v0 }
 0x33b   : > { %v7893_v63 = vpop.f32.mrf.mxu0 }
 0x33c   : > { %v3132_v17 = vadd.f32 %v3131_v23, %v2963_v29  ;;  %8722 = vst [vmem:[#allocation14_spill] sm:$0xff] %v7893_v63  ;;  %v5014_v23 = vor.u32 %v6338_v57, %v5011_v45  ;;  %v6346_v57 = vld [vmem:[%s7025_s29 + $0x5c] sm:$0xf] }
 0x33d   : > { %v7895_v20 = vpop.f32.mrf.mxu1  ;;  %v5043_v45 = vld [vmem:[%s7025_s29 + $0x78] sm:$0xf0] }
 0x33e   : > { %8723 = vst [vmem:[#allocation38_spill] sm:$0xff] %v7895_v20  ;;  %v3301_v46 = vadd.f32 %v3300_v10, %v3132_v17 }
 0x340   : > { %v7901_v53 = vadd.f32 %v3469_v35, %v3301_v46  ;;  %v8727_v35 = vld [vmem:[#allocation16_spill] sm:$0xff] }
 0x341   : > { %v2964_v19 = vpop.f32.mrf.mxu2 }
 0x342   : > { %8724 = vst [vmem:[#allocation39_spill] sm:$0xff] %v7901_v53  ;;  %v3133_v14 = vpop.f32.mrf.mxu3  ;;  %v2965_v21 = vadd.f32 %v2964_v19, %v8725_v55 }
 0x343   : > { %v3305_v7 = vpop.f32.mrf.mxu0 }
 0x344   : > { %v7904_v0 = vadd.f32 %v3133_v14, %v2965_v21 }
 0x345   : > { %v3474_v10 = vpop.f32.mrf.mxu1 }
 0x346   : > { %8726 = vst [vmem:[#allocation15_spill] sm:$0xff] %v7904_v0  ;;  %3522 = vmatmul.bf16.vlgmr.msra.gmra.mxu2 %v5010_v1  ;;  %v8731_v1 = vld [vmem:[#allocation17_spill] sm:$0xff]  ;;  %v5042_v0 = vor.u32 %v6350_v27, %v5041_v16  ;;  %v5073_v16 = vld [vmem:[%s7025_s29 + $0x98] sm:$0xf] }
 0x347   : > { %3691 = vmatmul.bf16.vlgmr.msra.gmra.mxu3 %v5014_v23  ;;  %v6358_v27 = vld [vmem:[%s7025_s29 + $0xb4] sm:$0xf0] }
 0x349   : > { %v2967_v61 = vpop.f32.mrf.mxu2 }
 0x34a   : > { %v3136_v29 = vpop.f32.mrf.mxu3  ;;  %v2968_v17 = vadd.f32 %v2967_v61, %v8727_v35  ;;  %v5046_v61 = vor.u32 %v6346_v57, %v5043_v45  ;;  %v6354_v57 = vld [vmem:[%s7025_s29 + $0x9c] sm:$0xf] }
 0x34b   : > { %v7907_v20 = vpop.f32.mrf.mxu0  ;;  %v5075_v45 = vld [vmem:[%s7025_s29 + $0xb8] sm:$0xf0] }
 0x34c   : > { %v3137_v46 = vadd.f32 %v3136_v29, %v2968_v17  ;;  %8728 = vst [vmem:[#allocation16_spill] sm:$0xff] %v7907_v20 }
 0x34d   : > { %v7909_v63 = vpop.f32.mrf.mxu1 }
 0x34e   : > { %8729 = vst [vmem:[#allocation40_spill] sm:$0xff] %v7909_v63  ;;  %v3306_v19 = vadd.f32 %v3305_v7, %v3137_v46 }
 0x350   : > { %v7915_v14 = vadd.f32 %v3474_v10, %v3306_v19  ;;  %v8733_v10 = vld [vmem:[#allocation18_spill] sm:$0xff] }
 0x351   : > { %v2969_v55 = vpop.f32.mrf.mxu2 }
 0x352   : > { %8730 = vst [vmem:[#allocation41_spill] sm:$0xff] %v7915_v14  ;;  %v3138_v21 = vpop.f32.mrf.mxu3  ;;  %v2970_v23 = vadd.f32 %v2969_v55, %v8731_v1 }
 0x353   : > { %v3310_v35 = vpop.f32.mrf.mxu0 }
 0x354   : > { %v7918_v29 = vadd.f32 %v3138_v21, %v2970_v23 }
 0x355   : > { %v3479_v7 = vpop.f32.mrf.mxu1 }
 0x356   : > { %8732 = vst [vmem:[#allocation17_spill] sm:$0xff] %v7918_v29  ;;  %3527 = vmatmul.bf16.gmra.mxu2 %v5042_v0  ;;  %v8737_v0 = vld [vmem:[#allocation19_spill] sm:$0xff]  ;;  %v5074_v29 = vor.u32 %v6358_v27, %v5073_v16  ;;  %v5105_v16 = vld [vmem:[%s7025_s29 + $0xd8] sm:$0xf] }
 0x357   : > { %3696 = vmatmul.bf16.gmra.mxu3 %v5046_v61  ;;  %v6366_v27 = vld [vmem:[%s7025_s29 + $0xf4] sm:$0xf0] }
 0x359   : > { %v2972_v17 = vpop.f32.mrf.mxu2 }
 0x35a   : > { %v3141_v46 = vpop.f32.mrf.mxu3  ;;  %v2973_v19 = vadd.f32 %v2972_v17, %v8733_v10  ;;  %v5078_v17 = vor.u32 %v6354_v57, %v5075_v45  ;;  %v6362_v57 = vld [vmem:[%s7025_s29 + $0xdc] sm:$0xf] }
 0x35b   : > { %v7921_v20 = vpop.f32.mrf.mxu0  ;;  %v5107_v45 = vld [vmem:[%s7025_s29 + $0xf8] sm:$0xf0] }
 0x35c   : > { %v3142_v63 = vadd.f32 %v3141_v46, %v2973_v19  ;;  %8734 = vst [vmem:[#allocation18_spill] sm:$0xff] %v7921_v20 }
 0x35d   : > { %v7923_v14 = vpop.f32.mrf.mxu1 }
 0x35e   : > { %8735 = vst [vmem:[#allocation42_spill] sm:$0xff] %v7923_v14  ;;  %v3311_v55 = vadd.f32 %v3310_v35, %v3142_v63 }
 0x360   : > { %v7929_v21 = vadd.f32 %v3479_v7, %v3311_v55  ;;  %v8739_v7 = vld [vmem:[#allocation20_spill] sm:$0xff] }
 0x361   : > { %v2974_v1 = vpop.f32.mrf.mxu2 }
 0x362   : > { %8736 = vst [vmem:[#allocation43_spill] sm:$0xff] %v7929_v21  ;;  %v3143_v23 = vpop.f32.mrf.mxu3  ;;  %v2975_v61 = vadd.f32 %v2974_v1, %v8737_v0 }
 0x363   : > { %v3315_v10 = vpop.f32.mrf.mxu0 }
 0x364   : > { %v7932_v46 = vadd.f32 %v3143_v23, %v2975_v61 }
 0x365   : > { %v3484_v63 = vpop.f32.mrf.mxu1 }
 0x366   : > { %8738 = vst [vmem:[#allocation19_spill] sm:$0xff] %v7932_v46  ;;  %3532 = vmatmul.bf16.gmra.mxu2 %v5074_v29  ;;  %v8743_v29 = vld [vmem:[#allocation21_spill] sm:$0xff]  ;;  %v5106_v46 = vor.u32 %v6366_v27, %v5105_v16  ;;  %v5137_v16 = vld [vmem:[%s7025_s29 + $0x118] sm:$0xf] }
 0x367   : > { %3701 = vmatmul.bf16.gmra.mxu3 %v5078_v17  ;;  %v6374_v27 = vld [vmem:[%s7025_s29 + $0x134] sm:$0xf0] }
 0x369   : > { %v2977_v35 = vpop.f32.mrf.mxu2 }
 0x36a   : > { %v3146_v19 = vpop.f32.mrf.mxu3  ;;  %v2978_v55 = vadd.f32 %v2977_v35, %v8739_v7  ;;  %v5110_v35 = vor.u32 %v6362_v57, %v5107_v45  ;;  %v6370_v57 = vld [vmem:[%s7025_s29 + $0x11c] sm:$0xf] }
 0x36b   : > { %v7935_v20 = vpop.f32.mrf.mxu0  ;;  %v5139_v45 = vld [vmem:[%s7025_s29 + $0x138] sm:$0xf0] }
 0x36c   : > { %v3147_v14 = vadd.f32 %v3146_v19, %v2978_v55  ;;  %8740 = vst [vmem:[#allocation20_spill] sm:$0xff] %v7935_v20 }
 0x36d   : > { %v7937_v21 = vpop.f32.mrf.mxu1 }
 0x36e   : > { %8741 = vst [vmem:[#allocation44_spill] sm:$0xff] %v7937_v21  ;;  %v3316_v1 = vadd.f32 %v3315_v10, %v3147_v14 }
 0x370   : > { %v7943_v23 = vadd.f32 %v3484_v63, %v3316_v1  ;;  %v8745_v63 = vld [vmem:[#allocation22_spill] sm:$0xff] }
 0x371   : > { %v2979_v0 = vpop.f32.mrf.mxu2 }
 0x372   : > { %8742 = vst [vmem:[#allocation45_spill] sm:$0xff] %v7943_v23  ;;  %v3148_v61 = vpop.f32.mrf.mxu3  ;;  %v2980_v17 = vadd.f32 %v2979_v0, %v8743_v29 }
 0x373   : > { %v3320_v7 = vpop.f32.mrf.mxu0 }
 0x374   : > { %v7946_v19 = vadd.f32 %v3148_v61, %v2980_v17 }
 0x375   : > { %v3489_v14 = vpop.f32.mrf.mxu1 }
 0x376   : > { %8744 = vst [vmem:[#allocation21_spill] sm:$0xff] %v7946_v19  ;;  %3537 = vmatmul.bf16.gmra.mxu2 %v5106_v46  ;;  %v8749_v46 = vld [vmem:[#allocation23_spill] sm:$0xff]  ;;  %v5138_v19 = vor.u32 %v6374_v27, %v5137_v16  ;;  %v5169_v16 = vld [vmem:[%s7025_s29 + $0x158] sm:$0xf] }
 0x377   : > { %3706 = vmatmul.bf16.gmra.mxu3 %v5110_v35  ;;  %v6382_v27 = vld [vmem:[%s7025_s29 + $0x174] sm:$0xf0] }
 0x379   : > { %v2982_v10 = vpop.f32.mrf.mxu2 }
 0x37a   : > { %v3151_v55 = vpop.f32.mrf.mxu3  ;;  %v2983_v1 = vadd.f32 %v2982_v10, %v8745_v63  ;;  %v5142_v10 = vor.u32 %v6370_v57, %v5139_v45  ;;  %v6378_v57 = vld [vmem:[%s7025_s29 + $0x15c] sm:$0xf] }
 0x37b   : > { %v7949_v20 = vpop.f32.mrf.mxu0  ;;  %v5171_v45 = vld [vmem:[%s7025_s29 + $0x178] sm:$0xf0] }
 0x37c   : > { %v3152_v21 = vadd.f32 %v3151_v55, %v2983_v1  ;;  %8746 = vst [vmem:[#allocation22_spill] sm:$0xff] %v7949_v20 }
 0x37d   : > { %v7951_v23 = vpop.f32.mrf.mxu1 }
 0x37e   : > { %8747 = vst [vmem:[#allocation46_spill] sm:$0xff] %v7951_v23  ;;  %v3321_v0 = vadd.f32 %v3320_v7, %v3152_v21 }
 0x380   : > { %v7957_v61 = vadd.f32 %v3489_v14, %v3321_v0  ;;  %v8751_v14 = vld [vmem:[#allocation24_spill] sm:$0xff] }
 0x381   : > { %v2984_v29 = vpop.f32.mrf.mxu2 }
 0x382   : > { %8748 = vst [vmem:[#allocation47_spill] sm:$0xff] %v7957_v61  ;;  %v3153_v17 = vpop.f32.mrf.mxu3  ;;  %v2985_v35 = vadd.f32 %v2984_v29, %v8749_v46 }
 0x383   : > { %v3325_v63 = vpop.f32.mrf.mxu0 }
 0x384   : > { %v7960_v55 = vadd.f32 %v3153_v17, %v2985_v35  ;;  %v8755_v35 = vld [vmem:[#allocation25_spill] sm:$0xff] }
 0x385   : > { %v3494_v21 = vpop.f32.mrf.mxu1 }
 0x386   : > { %8750 = vst [vmem:[#allocation23_spill] sm:$0xff] %v7960_v55  ;;  %3542 = vmatmul.bf16.gmra.mxu2 %v5138_v19  ;;  %v5170_v55 = vor.u32 %v6382_v27, %v5169_v16  ;;  %v6390_v16 = vld [vmem:[%s7025_s29 + $0x1b4] sm:$0xf0]  ;;  %v6386_v27 = vld [vmem:[%s7025_s29 + $0x19c] sm:$0xf] }
 0x387   : > { %3711 = vmatmul.bf16.gmra.mxu3 %v5142_v10 }
 0x389   : > { %v2987_v7 = vpop.f32.mrf.mxu2 }
 0x38a   : > { %v3156_v1 = vpop.f32.mrf.mxu3  ;;  %v2988_v0 = vadd.f32 %v2987_v7, %v8751_v14  ;;  %v5174_v7 = vor.u32 %v6378_v57, %v5171_v45  ;;  %v5203_v57 = vld [vmem:[%s7025_s29 + $0x1b8] sm:$0xf0] }
 0x38b   : > { %v7963_v20 = vpop.f32.mrf.mxu0  ;;  %v5206_v53 = vor.u32 %v6386_v27, %v5203_v57  ;;  %v5235_v27 = vld [vmem:[%s7025_s29 + $0x1f8] sm:$0xf0] }
 0x38c   : > { %v3157_v23 = vadd.f32 %v3156_v1, %v2988_v0  ;;  %8752 = vst [vmem:[#allocation24_spill] sm:$0xff] %v7963_v20 }
 0x38d   : > { %v7965_v61 = vpop.f32.mrf.mxu1 }
 0x38e   : > { %8753 = vst [vmem:[#allocation48_spill] sm:$0xff] %v7965_v61  ;;  %v3326_v29 = vadd.f32 %v3325_v63, %v3157_v23 }
 0x390   : > { %v7971_v17 = vadd.f32 %v3494_v21, %v3326_v29  ;;  %v8757_v21 = vld [vmem:[#allocation26_spill] sm:$0xff] }
 0x391   : > { %v2989_v46 = vpop.f32.mrf.mxu2 }
 0x392   : > { %8754 = vst [vmem:[#allocation49_spill] sm:$0xff] %v7971_v17  ;;  %v3158_v19 = vpop.f32.mrf.mxu3  ;;  %v2990_v10 = vadd.f32 %v2989_v46, %v8755_v35  ;;  %v5201_v46 = vld [vmem:[%s7025_s29 + $0x198] sm:$0xf] }
 0x393   : > { %v3330_v14 = vpop.f32.mrf.mxu0 }
 0x394   : > { %v7974_v1 = vadd.f32 %v3158_v19, %v2990_v10 }
 0x395   : > { %v3499_v23 = vpop.f32.mrf.mxu1 }
 0x396   : > { %8756 = vst [vmem:[#allocation25_spill] sm:$0xff] %v7974_v1  ;;  %3547 = vmatmul.bf16.gmra.mxu2 %v5170_v55  ;;  %v8758_v55 = vld [vmem:[#allocation27_spill] sm:$0xff]  ;;  %v5202_v1 = vor.u32 %v6390_v16, %v5201_v46  ;;  %v6398_v46 = vld [vmem:[%s7025_s29 + $0x1f4] sm:$0xf0]  ;;  %v6394_v16 = vld [vmem:[%s7025_s29 + $0x1dc] sm:$0xf] }
 0x397   : > { %3716 = vmatmul.bf16.gmra.mxu3 %v5174_v7 }
 0x399   : > { %v2992_v63 = vpop.f32.mrf.mxu2 }
 0x39a   : > { %v3161_v0 = vpop.f32.mrf.mxu3  ;;  %v2993_v29 = vadd.f32 %v2992_v63, %v8757_v21 }
 0x39b   : > { %v7977_v20 = vpop.f32.mrf.mxu0 }
 0x39c   : > { %v3162_v61 = vadd.f32 %v3161_v0, %v2993_v29  ;;  %v5233_v29 = vld [vmem:[%s7025_s29 + $0x1d8] sm:$0xf] }
 0x39d   : > { %v7980_v35 = vpop.f32.mrf.mxu1 }
 0x39e   : > { %v3331_v17 = vadd.f32 %v3330_v14, %v3162_v61  ;;  %v6903_v14 = vmov 0.0  }
 0x39f   : > { %324 = vst.msk [vmem:[#allocation2] sm:$0xff] %vm323_vm1, %v6903_v14 }
 0x3a0   : > { %v7985_v45 = vadd.f32 %v3499_v23, %v3331_v17  ;;  %325 = vst.msk [vmem:[#allocation2 + $0x8] sm:$0xff] %vm323_vm1, %v6903_v14 }
 0x3a1   : > { %v2994_v19 = vpop.f32.mrf.mxu2  ;;  %326 = vst.msk [vmem:[#allocation2 + $0x10] sm:$0xff] %vm323_vm1, %v6903_v14 }
 0x3a2   : > { %v3163_v10 = vpop.f32.mrf.mxu3  ;;  %v2995_v7 = vadd.f32 %v2994_v19, %v8758_v55  ;;  %327 = vst.msk [vmem:[#allocation2 + $0x18] sm:$0xff] %vm323_vm1, %v6903_v14 }
 0x3a3   : > { %v3335_v61 = vpop.f32.mrf.mxu0  ;;  %328 = vst.msk [vmem:[#allocation2 + $0x20] sm:$0xff] %vm323_vm1, %v6903_v14 }
 0x3a4   : > { %v7988_v52 = vadd.f32 %v3163_v10, %v2995_v7  ;;  %329 = vst.msk [vmem:[#allocation2 + $0x28] sm:$0xff] %vm323_vm1, %v6903_v14  ;;  %v8761_v7 = vld [vmem:[#allocation29_spill] sm:$0xff] }
 0x3a5   : > { %v3504_v17 = vpop.f32.mrf.mxu1  ;;  %330 = vst.msk [vmem:[#allocation2 + $0x30] sm:$0xff] %vm323_vm1, %v6903_v14 }
 0x3a6   : > { %3552 = vmatmul.bf16.gmra.mxu2 %v5202_v1  ;;  %331 = vst.msk [vmem:[#allocation2 + $0x38] sm:$0xff] %vm323_vm1, %v6903_v14 }
 0x3a7   : > { %3721 = vmatmul.bf16.gmra.mxu3 %v5206_v53  ;;  %v8759_v53 = vld [vmem:[#allocation28_spill] sm:$0xff]  ;;  %332 = vst.msk [vmem:[#allocation2 + $0x40] sm:$0xff] %vm323_vm1, %v6903_v14 }
 0x3a8   : > { %333 = vst.msk [vmem:[#allocation2 + $0x48] sm:$0xff] %vm323_vm1, %v6903_v14 }
 0x3a9   : > { %v2997_v23 = vpop.f32.mrf.mxu2  ;;  %334 = vst.msk [vmem:[#allocation2 + $0x50] sm:$0xff] %vm323_vm1, %v6903_v14 }
 0x3aa   : > { %v3166_v63 = vpop.f32.mrf.mxu3  ;;  %v2998_v1 = vadd.f32 %v2997_v23, %v8759_v53  ;;  %335 = vst.msk [vmem:[#allocation2 + $0x58] sm:$0xff] %vm323_vm1, %v6903_v14  ;;  %v5234_v23 = vor.u32 %v6398_v46, %v5233_v29 }
 0x3ab   : > { %v8017_v19 = vpop.f32.mrf.mxu0  ;;  %336 = vst.msk [vmem:[#allocation2 + $0x60] sm:$0xff] %vm323_vm1, %v6903_v14 }
 0x3ac   : > { %v3167_v0 = vadd.f32 %v3166_v63, %v2998_v1  ;;  %8760 = vst [vmem:[#allocation26_spill] sm:$0xff] %v8017_v19  ;;  %v5238_v63 = vor.u32 %v6394_v16, %v5235_v27  ;;  %v391_v19 = vld [vmem:[#allocation2 + $0x18] sm:$0xff] }
 0x3ad   : > { %v8026_v53 = vpop.f32.mrf.mxu1  ;;  %337 = vst.msk [vmem:[#allocation2 + $0x68] sm:$0xff] %vm323_vm1, %v6903_v14 }
 0x3ae   : > { %v3336_v21 = vadd.f32 %v3335_v61, %v3167_v0  ;;  %8762 = vst [vmem:[#allocation27_spill] sm:$0xff] %v8026_v53 }
 0x3af   : > { %338 = vst.msk [vmem:[#allocation2 + $0x70] sm:$0xff] %vm323_vm1, %v6903_v14 }
 0x3b0   : > { %v8015_v57 = vadd.f32 %v3504_v17, %v3336_v21  ;;  %339 = vst.msk [vmem:[#allocation2 + $0x78] sm:$0xff] %vm323_vm1, %v6903_v14  ;;  %v8763_v21 = vld [vmem:[#allocation30_spill] sm:$0xff] }
 0x3b1   : > { %v2999_v10 = vpop.f32.mrf.mxu2  ;;  %340 = vst.msk [vmem:[#allocation2 + $0x80] sm:$0xff] %vm323_vm1, %v6903_v14 }
 0x3b2   : > { %v3168_v55 = vpop.f32.mrf.mxu3  ;;  %v3000_v61 = vadd.f32 %v2999_v10, %v8761_v7  ;;  %341 = vst.msk [vmem:[#allocation2 + $0x88] sm:$0xff] %vm323_vm1, %v6903_v14  ;;  %v6406_v7 = vld [vmem:[%s7025_s29 + $0x234] sm:$0xf0] }
 0x3b3   : > { %342 = vst.msk [vmem:[#allocation2 + $0x90] sm:$0xff] %vm323_vm1, %v6903_v14  ;;  %v3340_v46 = vpop.f32.mrf.mxu0 }
 0x3b4   : > { %v8030_v17 = vadd.f32 %v3168_v55, %v3000_v61  ;;  %343 = vst.msk [vmem:[#allocation2 + $0x98] sm:$0xff] %vm323_vm1, %v6903_v14  ;;  %v5265_v55 = vld [vmem:[%s7025_s29 + $0x218] sm:$0xf]  ;;  %v6402_v61 = vld [vmem:[%s7025_s29 + $0x21c] sm:$0xf] }
 0x3b5   : > { %344 = vst.msk [vmem:[#allocation2 + $0xa0] sm:$0xff] %vm323_vm1, %v6903_v14  ;;  %v3509_v27 = vpop.f32.mrf.mxu1 }
 0x3b6   : > { %3557 = vmatmul.bf16.gmra.mxu2 %v5234_v23  ;;  %345 = vst.msk [vmem:[#allocation2 + $0xa8] sm:$0xff] %vm323_vm1, %v6903_v14  ;;  %v5267_v23 = vld [vmem:[%s7025_s29 + $0x238] sm:$0xf0] }
 0x3b7   : > { %3726 = vmatmul.bf16.gmra.mxu3 %v5238_v63  ;;  %346 = vst.msk [vmem:[#allocation2 + $0xb0] sm:$0xff] %vm323_vm1, %v6903_v14 }
 0x3b8   : > { %347 = vst.msk [vmem:[#allocation2 + $0xb8] sm:$0xff] %vm323_vm1, %v6903_v14 }
 0x3b9   : > { %v3002_v1 = vpop.f32.mrf.mxu2  ;;  %348 = vst.msk [vmem:[#allocation2 + $0xc0] sm:$0xff] %vm323_vm1, %v6903_v14 }
 0x3ba   : > { %v3171_v0 = vpop.f32.mrf.mxu3  ;;  %v3003_v29 = vadd.f32 %v3002_v1, %v8763_v21  ;;  %349 = vst.msk [vmem:[#allocation2 + $0xc8] sm:$0xff] %vm323_vm1, %v6903_v14  ;;  %v8765_v21 = vld [vmem:[#allocation31_spill] sm:$0xff] }
 0x3bb   : > { %350 = vst.msk [vmem:[#allocation2 + $0xd0] sm:$0xff] %vm323_vm1, %v6903_v14 }
 0x3bc   : > { %v3172_v16 = vadd.f32 %v3171_v0, %v3003_v29  ;;  %351 = vst.msk [vmem:[#allocation2 + $0xd8] sm:$0xff] %vm323_vm1, %v6903_v14 }
 0x3bd   : > { %352 = vst.msk [vmem:[#allocation2 + $0xe0] sm:$0xff] %vm323_vm1, %v6903_v14 }
 0x3be   : > { %v3341_v10 = vadd.f32 %v3340_v46, %v3172_v16  ;;  %v5266_v46 = vor.u32 %v6406_v7, %v5265_v55  ;;  %v5270_v16 = vor.u32 %v6402_v61, %v5267_v23  ;;  %353 = vst.msk [vmem:[#allocation2 + $0xe8] sm:$0xff] %vm323_vm1, %v6903_v14  ;;  %v388_v61 = vld [vmem:[#allocation2] sm:$0xff] }
 0x3bf   : > { %354 = vst.msk [vmem:[#allocation2 + $0xf0] sm:$0xff] %vm323_vm1, %v6903_v14 }
 0x3c0   : > { %v8061_v63 = vadd.f32 %v3509_v27, %v3341_v10  ;;  %355 = vst.msk [vmem:[#allocation2 + $0xf8] sm:$0xff] %vm323_vm1, %v6903_v14 }
 0x3c1   : > { %v3004_v1 = vpop.f32.mrf.mxu2  ;;  %356 = vst.msk [vmem:[#allocation2 + $0x100] sm:$0xff] %vm323_vm1, %v6903_v14 }
 0x3c2   : > { %8764 = vst [vmem:[#allocation28_spill] sm:$0xff] %v8061_v63  ;;  %v3173_v0 = vpop.f32.mrf.mxu3  ;;  %v3005_v29 = vadd.f32 %v3004_v1, %v8765_v21  ;;  %v6410_v21 = vld [vmem:[%s7025_s29 + $0x25c] sm:$0xf] }
 0x3c3   : > { %357 = vst.msk [vmem:[#allocation2 + $0x108] sm:$0xff] %vm323_vm1, %v6903_v14 }
 0x3c4   : > { %v8072_v27 = vadd.f32 %v3173_v0, %v3005_v29  ;;  %358 = vst.msk [vmem:[#allocation2 + $0x110] sm:$0xff] %vm323_vm1, %v6903_v14  ;;  %v5297_v0 = vld [vmem:[%s7025_s29 + $0x258] sm:$0xf]  ;;  %v5299_v29 = vld [vmem:[%s7025_s29 + $0x278] sm:$0xf0] }
 0x3c5   : > { %359 = vst.msk [vmem:[#allocation2 + $0x118] sm:$0xff] %vm323_vm1, %v6903_v14 }
 0x3c6   : > { %8766 = vst [vmem:[#allocation29_spill] sm:$0xff] %v8072_v27  ;;  %3562 = vmatmul.bf16.gmra.mxu2 %v5266_v46 }
 0x3c7   : > { %3731 = vmatmul.bf16.gmra.mxu3 %v5270_v16  ;;  %360 = vst.msk [vmem:[#allocation2 + $0x120] sm:$0xff] %vm323_vm1, %v6903_v14 }
 0x3c8   : > { %361 = vst.msk [vmem:[#allocation2 + $0x128] sm:$0xff] %vm323_vm1, %v6903_v14 }
 0x3c9   : > { %v3523_v10 = vpop.f32.mrf.mxu2  ;;  %362 = vst.msk [vmem:[#allocation2 + $0x130] sm:$0xff] %vm323_vm1, %v6903_v14 }
 0x3ca   : > { %v3692_v55 = vpop.f32.mrf.mxu3  ;;  %v3524_v7 = vadd.f32 %v3523_v10, %v7530_v62  ;;  %363 = vst.msk [vmem:[#allocation2 + $0x138] sm:$0xff] %vm323_vm1, %v6903_v14  ;;  %v6414_v62 = vld [vmem:[%s7025_s29 + $0x274] sm:$0xf0] }
 0x3cb   : > { %364 = vst.msk [vmem:[#allocation2 + $0x140] sm:$0xff] %vm323_vm1, %v6903_v14  ;;  %v5298_v10 = vor.u32 %v6414_v62, %v5297_v0  ;;  %v5329_v62 = vld [vmem:[%s7025_s29 + $0x298] sm:$0xf] }
 0x3cc   : > { %v3693_v23 = vadd.f32 %v3692_v55, %v3524_v7  ;;  %365 = vst.msk [vmem:[#allocation2 + $0x148] sm:$0xff] %vm323_vm1, %v6903_v14  ;;  %v5302_v55 = vor.u32 %v6410_v21, %v5299_v29  ;;  %v6422_v21 = vld [vmem:[%s7025_s29 + $0x2b4] sm:$0xf0] }
 0x3cd   : > { %366 = vst.msk [vmem:[#allocation2 + $0x150] sm:$0xff] %vm323_vm1, %v6903_v14  ;;  %v5330_v53 = vor.u32 %v6422_v21, %v5329_v62  ;;  %v392_v21 = vld [vmem:[#allocation2 + $0x20] sm:$0xff] }
 0x3ce   : > { %v3852_v1 = vadd.f32 %v3693_v23, %v388_v61  ;;  %367 = vst.msk [vmem:[#allocation2 + $0x158] sm:$0xff] %vm323_vm1, %v6903_v14  ;;  %v8767_v23 = vld [vmem:[#allocation32_spill] sm:$0xff] }
 0x3cf   : > { %368 = vst.msk [vmem:[#allocation2 + $0x160] sm:$0xff] %vm323_vm1, %v6903_v14 }
 0x3d0   : > { %3917 = vst.msk [vmem:[#allocation2] sm:$0xff] %vm323_vm1, %v3852_v1 }
 0x3d1   : > { %v3525_v46 = vpop.f32.mrf.mxu2  ;;  %369 = vst.msk [vmem:[#allocation2 + $0x168] sm:$0xff] %vm323_vm1, %v6903_v14 }
 0x3d2   : > { %v3694_v16 = vpop.f32.mrf.mxu3  ;;  %370 = vst.msk [vmem:[#allocation2 + $0x170] sm:$0xff] %vm323_vm1, %v6903_v14  ;;  %v3526_v1 = vadd.f32 %v3525_v46, %v8767_v23  ;;  %v389_v46 = vld [vmem:[#allocation2 + $0x8] sm:$0xff] }
 0x3d3   : > { %371 = vst.msk [vmem:[#allocation2 + $0x178] sm:$0xff] %vm323_vm1, %v6903_v14 }
 0x3d4   : > { %372 = vst.msk [vmem:[#allocation2 + $0x180] sm:$0xff] %vm323_vm1, %v6903_v14  ;;  %v3695_v29 = vadd.f32 %v3694_v16, %v3526_v1 }
 0x3d5   : > { %373 = vst.msk [vmem:[#allocation2 + $0x188] sm:$0xff] %vm323_vm1, %v6903_v14 }
 0x3d6   : > { %3567 = vmatmul.bf16.gmra.mxu2 %v5298_v10  ;;  %374 = vst.msk [vmem:[#allocation2 + $0x190] sm:$0xff] %vm323_vm1, %v6903_v14  ;;  %v6418_v10 = vld [vmem:[%s7025_s29 + $0x29c] sm:$0xf]  ;;  %v3853_v1 = vadd.f32 %v3695_v29, %v389_v46  ;;  %v6430_v46 = vld [vmem:[%s7025_s29 + $0x2f4] sm:$0xf0] }
 0x3d7   : > { %3736 = vmatmul.bf16.gmra.mxu3 %v5302_v55  ;;  %375 = vst.msk [vmem:[#allocation2 + $0x198] sm:$0xff] %vm323_vm1, %v6903_v14  ;;  %v5331_v55 = vld [vmem:[%s7025_s29 + $0x2b8] sm:$0xf0] }
 0x3d8   : > { %376 = vst.msk [vmem:[#allocation2 + $0x1a0] sm:$0xff] %vm323_vm1, %v6903_v14  ;;  %v5334_v16 = vor.u32 %v6418_v10, %v5331_v55  ;;  %v3984_v10 = vld [vmem:[#allocation2] sm:$0xff]  ;;  %v5361_v55 = vld [vmem:[%s7025_s29 + $0x2d8] sm:$0xf] }
 0x3d9   : > { %v3528_v7 = vpop.f32.mrf.mxu2  ;;  %377 = vst.msk [vmem:[#allocation2 + $0x1a8] sm:$0xff] %vm323_vm1, %v6903_v14 }
 0x3da   : > { %v3697_v61 = vpop.f32.mrf.mxu3  ;;  %v3529_v0 = vadd.f32 %v3528_v7, %v7544_v26  ;;  %378 = vst.msk [vmem:[#allocation2 + $0x1b0] sm:$0xff] %vm323_vm1, %v6903_v14  ;;  %v390_v26 = vld [vmem:[#allocation2 + $0x10] sm:$0xff] }
 0x3db   : > { %379 = vst.msk [vmem:[#allocation2 + $0x1b8] sm:$0xff] %vm323_vm1, %v6903_v14 }
 0x3dc   : > { %380 = vst.msk [vmem:[#allocation2 + $0x1c0] sm:$0xff] %vm323_vm1, %v6903_v14  ;;  %v3698_v23 = vadd.f32 %v3697_v61, %v3529_v0 }
 0x3dd   : > { %381 = vst.msk [vmem:[#allocation2 + $0x1c8] sm:$0xff] %vm323_vm1, %v6903_v14 }
 0x3de   : > { %382 = vst.msk [vmem:[#allocation2 + $0x1d0] sm:$0xff] %vm323_vm1, %v6903_v14  ;;  %v3854_v61 = vadd.f32 %v3698_v23, %v390_v26  ;;  %v6426_v23 = vld [vmem:[%s7025_s29 + $0x2dc] sm:$0xf] }
 0x3df   : > { %383 = vst.msk [vmem:[#allocation2 + $0x1d8] sm:$0xff] %vm323_vm1, %v6903_v14  ;;  %v5363_v26 = vld [vmem:[%s7025_s29 + $0x2f8] sm:$0xf0] }
 0x3e0   : > { %384 = vst.msk [vmem:[#allocation2 + $0x1e0] sm:$0xff] %vm323_vm1, %v6903_v14 }
 0x3e1   : > { %v3530_v7 = vpop.f32.mrf.mxu2  ;;  %385 = vst.msk [vmem:[#allocation2 + $0x1e8] sm:$0xff] %vm323_vm1, %v6903_v14 }
 0x3e2   : > { %v3699_v27 = vpop.f32.mrf.mxu3  ;;  %v3531_v63 = vadd.f32 %v3530_v7, %v7554_v3  ;;  %386 = vst.msk [vmem:[#allocation2 + $0x1f0] sm:$0xff] %vm323_vm1, %v6903_v14 }
 0x3e3   : > { %387 = vst.msk [vmem:[#allocation2 + $0x1f8] sm:$0xff] %vm323_vm1, %v6903_v14 }
 0x3e4   : > { %v3700_v0 = vadd.f32 %v3699_v27, %v3531_v63  ;;  %3918 = vst.msk [vmem:[#allocation2 + $0x8] sm:$0xff] %vm323_vm1, %v3853_v1 }
 0x3e5   : > { %3919 = vst.msk [vmem:[#allocation2 + $0x10] sm:$0xff] %vm323_vm1, %v3854_v61  ;;  %v5362_v61 = vor.u32 %v6430_v46, %v5361_v55  ;;  %v6438_v46 = vld [vmem:[%s7025_s29 + $0x334] sm:$0xf0] }
 0x3e6   : > { %v3855_v3 = vadd.f32 %v3700_v0, %v391_v19  ;;  %3572 = vmatmul.bf16.gmra.mxu2 %v5330_v53  ;;  %v393_v0 = vld [vmem:[#allocation2 + $0x28] sm:$0xff] }
 0x3e7   : > { %3741 = vmatmul.bf16.gmra.mxu3 %v5334_v16 }
 0x3e8   : > { %3920 = vst.msk [vmem:[#allocation2 + $0x18] sm:$0xff] %vm323_vm1, %v3855_v3 }
 0x3e9   : > { %v3533_v63 = vpop.f32.mrf.mxu2 }
 0x3ea   : > { %v3702_v27 = vpop.f32.mrf.mxu3  ;;  %v3534_v62 = vadd.f32 %v3533_v63, %v7564_v51  ;;  %v5366_v51 = vor.u32 %v6426_v23, %v5363_v26  ;;  %v6434_v23 = vld [vmem:[%s7025_s29 + $0x31c] sm:$0xf] }
 0x3eb   : > { %v3985_v14 = vld [vmem:[#allocation2 + $0x8] sm:$0xff]  ;;  %v5395_v26 = vld [vmem:[%s7025_s29 + $0x338] sm:$0xf0] }
 0x3ec   : > { %v3703_v29 = vadd.f32 %v3702_v27, %v3534_v62  ;;  %v4048_v53 = vpack.c.bf16 %v3985_v14, %v3984_v10  ;;  %v394_v10 = vld [vmem:[#allocation2 + $0x30] sm:$0xff] }
 0x3ee   : > { %v3856_v19 = vadd.f32 %v3703_v29, %v392_v21  ;;  %6263 = vmatmul.msk.bf16.vlgmr.msra.gmra.mxu0 %vm323_vm1, %v4048_v53  ;;  %v5393_v53 = vld [vmem:[%s7025_s29 + $0x318] sm:$0xf] }
 0x3ef   : > { %v3987_v21 = vld [vmem:[#allocation2 + $0x18] sm:$0xff] }
 0x3f0   : > { %3921 = vst.msk [vmem:[#allocation2 + $0x20] sm:$0xff] %vm323_vm1, %v3856_v19 }
 0x3f1   : > { %v3535_v7 = vpop.f32.mrf.mxu2 }
 0x3f2   : > { %v3704_v16 = vpop.f32.mrf.mxu3  ;;  %v3536_v1 = vadd.f32 %v3535_v7, %v7571_v34  ;;  %v3986_v34 = vld [vmem:[#allocation2 + $0x10] sm:$0xff] }
 0x3f3   : > { %v4049_v19 = vpack.c.bf16 %v3987_v21, %v3986_v34 }
 0x3f4   : > { %v3705_v3 = vadd.f32 %v3704_v16, %v3536_v1 }
 0x3f6   : > { %v3857_v63 = vadd.f32 %v3705_v3, %v393_v0  ;;  %3577 = vmatmul.bf16.gmra.mxu2 %v5362_v61  ;;  %v5394_v61 = vor.u32 %v6438_v46, %v5393_v53  ;;  %v6442_v53 = vld [vmem:[%s7025_s29 + $0x35c] sm:$0xf] }
 0x3f7   : > { %3746 = vmatmul.bf16.gmra.mxu3 %v5366_v51  ;;  %v5398_v51 = vor.u32 %v6434_v23, %v5395_v26  ;;  %v5427_v46 = vld [vmem:[%s7025_s29 + $0x378] sm:$0xf0] }
 0x3f8   : > { %3922 = vst.msk [vmem:[#allocation2 + $0x28] sm:$0xff] %vm323_vm1, %v3857_v63 }
 0x3f9   : > { %v3538_v27 = vpop.f32.mrf.mxu2 }
 0x3fa   : > { %v3707_v62 = vpop.f32.mrf.mxu3  ;;  %v3539_v29 = vadd.f32 %v3538_v27, %v7578_v18  ;;  %v395_v18 = vld [vmem:[#allocation2 + $0x38] sm:$0xff] }
 0x3fc   : > { %v3708_v14 = vadd.f32 %v3707_v62, %v3539_v29  ;;  %v396_v29 = vld [vmem:[#allocation2 + $0x40] sm:$0xff] }
 0x3fe   : > { %v3858_v55 = vadd.f32 %v3708_v14, %v394_v10  ;;  %6264 = vmatmul.msk.bf16.gmra.mxu0 %vm323_vm1, %v4049_v19  ;;  %v5425_v19 = vld [vmem:[%s7025_s29 + $0x358] sm:$0xf] }
 0x3ff   : > { %v3989_v62 = vld [vmem:[#allocation2 + $0x28] sm:$0xff] }
 0x400   : > { %3923 = vst.msk [vmem:[#allocation2 + $0x30] sm:$0xff] %vm323_vm1, %v3858_v55  ;;  %v6446_v55 = vld [vmem:[%s7025_s29 + $0x374] sm:$0xf0] }
 0x401   : > { %v3540_v7 = vpop.f32.mrf.mxu2 }
 0x402   : > { %v3709_v16 = vpop.f32.mrf.mxu3  ;;  %v3541_v1 = vadd.f32 %v3540_v7, %v7585_v32  ;;  %v3988_v32 = vld [vmem:[#allocation2 + $0x20] sm:$0xff] }
 0x403   : > { %v4050_v34 = vpack.c.bf16 %v3989_v62, %v3988_v32  ;;  %v5457_v32 = vld [vmem:[%s7025_s29 + $0x398] sm:$0xf] }
 0x404   : > { %v3710_v0 = vadd.f32 %v3709_v16, %v3541_v1  ;;  %v5426_v16 = vor.u32 %v6446_v55, %v5425_v19  ;;  %v5430_v1 = vor.u32 %v6442_v53, %v5427_v46 }
 0x406   : > { %v3859_v3 = vadd.f32 %v3710_v0, %v395_v18  ;;  %3582 = vmatmul.bf16.gmra.mxu2 %v5394_v61 }
 0x407   : > { %3751 = vmatmul.bf16.gmra.mxu3 %v5398_v51 }
 0x408   : > { %3924 = vst.msk [vmem:[#allocation2 + $0x38] sm:$0xff] %vm323_vm1, %v3859_v3 }
 0x409   : > { %v3543_v63 = vpop.f32.mrf.mxu2 }
 0x40a   : > { %v3712_v27 = vpop.f32.mrf.mxu3  ;;  %v3544_v21 = vadd.f32 %v3543_v63, %v7592_v54  ;;  %v397_v54 = vld [vmem:[#allocation2 + $0x48] sm:$0xff] }
 0x40c   : > { %v3713_v10 = vadd.f32 %v3712_v27, %v3544_v21  ;;  %v398_v27 = vld [vmem:[#allocation2 + $0x50] sm:$0xff] }
 0x40e   : > { %v3860_v14 = vadd.f32 %v3713_v10, %v396_v29  ;;  %6265 = vmatmul.msk.bf16.gmra.mxu0 %vm323_vm1, %v4050_v34  ;;  %v6454_v10 = vld [vmem:[%s7025_s29 + $0x3b4] sm:$0xf0]  ;;  %v6450_v34 = vld [vmem:[%s7025_s29 + $0x39c] sm:$0xf] }
 0x40f   : > { %v3991_v3 = vld [vmem:[#allocation2 + $0x38] sm:$0xff]  ;;  %v5458_v46 = vor.u32 %v6454_v10, %v5457_v32 }
 0x410   : > { %3925 = vst.msk [vmem:[#allocation2 + $0x40] sm:$0xff] %vm323_vm1, %v3860_v14  ;;  %v5459_v14 = vld [vmem:[%s7025_s29 + $0x3b8] sm:$0xf0] }
 0x411   : > { %v3545_v23 = vpop.f32.mrf.mxu2 }
 0x412   : > { %v3714_v26 = vpop.f32.mrf.mxu3  ;;  %v3546_v7 = vadd.f32 %v3545_v23, %v7599_v41  ;;  %v3990_v41 = vld [vmem:[#allocation2 + $0x30] sm:$0xff]  ;;  %v5462_v23 = vor.u32 %v6450_v34, %v5459_v14 }
 0x413   : > { %v4051_v21 = vpack.c.bf16 %v3991_v3, %v3990_v41  ;;  %v6458_v41 = vld [vmem:[%s7025_s29 + $0x3dc] sm:$0xf] }
 0x414   : > { %v3715_v61 = vadd.f32 %v3714_v26, %v3546_v7 }
 0x416   : > { %v3861_v51 = vadd.f32 %v3715_v61, %v397_v54  ;;  %3587 = vmatmul.bf16.gmra.mxu2 %v5426_v16 }
 0x417   : > { %3756 = vmatmul.bf16.gmra.mxu3 %v5430_v1 }
 0x418   : > { %3926 = vst.msk [vmem:[#allocation2 + $0x48] sm:$0xff] %vm323_vm1, %v3861_v51  ;;  %v400_v51 = vld [vmem:[#allocation2 + $0x60] sm:$0xff] }
 0x419   : > { %v3548_v18 = vpop.f32.mrf.mxu2 }
 0x41a   : > { %v3717_v0 = vpop.f32.mrf.mxu3  ;;  %v3549_v63 = vadd.f32 %v3548_v18, %v7606_v25  ;;  %v399_v25 = vld [vmem:[#allocation2 + $0x58] sm:$0xff] }
 0x41c   : > { %v3718_v62 = vadd.f32 %v3717_v0, %v3549_v63  ;;  %v5489_v63 = vld [vmem:[%s7025_s29 + $0x3d8] sm:$0xf] }
 0x41e   : > { %v3862_v29 = vadd.f32 %v3718_v62, %v398_v27  ;;  %6266 = vmatmul.msk.bf16.gmra.mxu0 %vm323_vm1, %v4051_v21  ;;  %v6462_v27 = vld [vmem:[%s7025_s29 + $0x3f4] sm:$0xf0]  ;;  %v5491_v62 = vld [vmem:[%s7025_s29 + $0x3f8] sm:$0xf0] }
 0x41f   : > { %v3993_v54 = vld [vmem:[#allocation2 + $0x48] sm:$0xff]  ;;  %v5490_v10 = vor.u32 %v6462_v27, %v5489_v63  ;;  %v5494_v34 = vor.u32 %v6458_v41, %v5491_v62 }
 0x420   : > { %3927 = vst.msk [vmem:[#allocation2 + $0x50] sm:$0xff] %vm323_vm1, %v3862_v29 }
 0x421   : > { %v3550_v19 = vpop.f32.mrf.mxu2 }
 0x422   : > { %v3719_v55 = vpop.f32.mrf.mxu3  ;;  %v3551_v53 = vadd.f32 %v3550_v19, %v7616_v9  ;;  %v3992_v9 = vld [vmem:[#allocation2 + $0x40] sm:$0xff] }
 0x423   : > { %v4052_v0 = vpack.c.bf16 %v3993_v54, %v3992_v9  ;;  %v6470_v54 = vld [vmem:[%s7025_s29 + $0x434] sm:$0xf0] }
 0x424   : > { %v3720_v26 = vadd.f32 %v3719_v55, %v3551_v53 }
 0x426   : > { %v3863_v7 = vadd.f32 %v3720_v26, %v399_v25  ;;  %3592 = vmatmul.bf16.gmra.mxu2 %v5458_v46  ;;  %v402_v25 = vld [vmem:[#allocation2 + $0x70] sm:$0xff] }
 0x427   : > { %3761 = vmatmul.bf16.gmra.mxu3 %v5462_v23 }
 0x428   : > { %3928 = vst.msk [vmem:[#allocation2 + $0x58] sm:$0xff] %vm323_vm1, %v3863_v7 }
 0x429   : > { %v3553_v16 = vpop.f32.mrf.mxu2 }
 0x42a   : > { %v3722_v1 = vpop.f32.mrf.mxu3  ;;  %v3554_v61 = vadd.f32 %v3553_v16, %v7626_v22  ;;  %v401_v22 = vld [vmem:[#allocation2 + $0x68] sm:$0xff] }
 0x42c   : > { %v3723_v18 = vadd.f32 %v3722_v1, %v3554_v61  ;;  %v5521_v1 = vld [vmem:[%s7025_s29 + $0x418] sm:$0xf]  ;;  %v6466_v61 = vld [vmem:[%s7025_s29 + $0x41c] sm:$0xf] }
 0x42e   : > { %v3864_v3 = vadd.f32 %v3723_v18, %v400_v51  ;;  %6267 = vmatmul.msk.bf16.gmra.mxu0 %vm323_vm1, %v4052_v0  ;;  %v5523_v51 = vld [vmem:[%s7025_s29 + $0x438] sm:$0xf0] }
 0x42f   : > { %v3995_v46 = vld [vmem:[#allocation2 + $0x58] sm:$0xff]  ;;  %v5526_v63 = vor.u32 %v6466_v61, %v5523_v51 }
 0x430   : > { %3929 = vst.msk [vmem:[#allocation2 + $0x60] sm:$0xff] %vm323_vm1, %v3864_v3  ;;  %v5522_v3 = vor.u32 %v6470_v54, %v5521_v1 }
 0x431   : > { %v3555_v21 = vpop.f32.mrf.mxu2 }
 0x432   : > { %v3724_v29 = vpop.f32.mrf.mxu3  ;;  %v3556_v32 = vadd.f32 %v3555_v21, %v7633_v24  ;;  %v3994_v24 = vld [vmem:[#allocation2 + $0x50] sm:$0xff] }
 0x433   : > { %v4053_v7 = vpack.c.bf16 %v3995_v46, %v3994_v24  ;;  %v5555_v46 = vld [vmem:[%s7025_s29 + $0x478] sm:$0xf0] }
 0x434   : > { %v3725_v14 = vadd.f32 %v3724_v29, %v3556_v32 }
 0x436   : > { %v3865_v19 = vadd.f32 %v3725_v14, %v401_v22  ;;  %3597 = vmatmul.bf16.gmra.mxu2 %v5490_v10  ;;  %v404_v10 = vld [vmem:[#allocation2 + $0x80] sm:$0xff] }
 0x437   : > { %3766 = vmatmul.bf16.gmra.mxu3 %v5494_v34 }
 0x438   : > { %3930 = vst.msk [vmem:[#allocation2 + $0x68] sm:$0xff] %vm323_vm1, %v3865_v19  ;;  %v5553_v19 = vld [vmem:[%s7025_s29 + $0x458] sm:$0xf] }
 0x439   : > { %v3558_v55 = vpop.f32.mrf.mxu2 }
 0x43a   : > { %v3727_v53 = vpop.f32.mrf.mxu3  ;;  %v3559_v23 = vadd.f32 %v3558_v55, %v7640_v2  ;;  %v403_v2 = vld [vmem:[#allocation2 + $0x78] sm:$0xff] }
 0x43b   : > { %v6478_v55 = vld [vmem:[%s7025_s29 + $0x474] sm:$0xf0] }
 0x43c   : > { %v3728_v26 = vadd.f32 %v3727_v53, %v3559_v23  ;;  %v6474_v53 = vld [vmem:[%s7025_s29 + $0x45c] sm:$0xf] }
 0x43e   : > { %v3866_v16 = vadd.f32 %v3728_v26, %v402_v25  ;;  %6268 = vmatmul.msk.bf16.gmra.mxu0 %vm323_vm1, %v4053_v7  ;;  %v5554_v26 = vor.u32 %v6478_v55, %v5553_v19  ;;  %v5558_v7 = vor.u32 %v6474_v53, %v5555_v46  ;;  %v408_v46 = vld [vmem:[#allocation2 + $0xa0] sm:$0xff] }
 0x43f   : > { %v3997_v29 = vld [vmem:[#allocation2 + $0x68] sm:$0xff] }
 0x440   : > { %3931 = vst.msk [vmem:[#allocation2 + $0x70] sm:$0xff] %vm323_vm1, %v3866_v16 }
 0x441   : > { %v3560_v9 = vpop.f32.mrf.mxu2 }
 0x442   : > { %v3729_v18 = vpop.f32.mrf.mxu3  ;;  %v3561_v0 = vadd.f32 %v3560_v9, %v7647_v42  ;;  %v3996_v42 = vld [vmem:[#allocation2 + $0x60] sm:$0xff] }
 0x443   : > { %v4054_v22 = vpack.c.bf16 %v3997_v29, %v3996_v42 }
 0x444   : > { %v3730_v27 = vadd.f32 %v3729_v18, %v3561_v0  ;;  %v406_v18 = vld [vmem:[#allocation2 + $0x90] sm:$0xff] }
 0x446   : > { %v3867_v41 = vadd.f32 %v3730_v27, %v403_v2  ;;  %3602 = vmatmul.bf16.gmra.mxu2 %v5522_v3  ;;  %v5585_v2 = vld [vmem:[%s7025_s29 + $0x498] sm:$0xf] }
 0x447   : > { %3771 = vmatmul.bf16.gmra.mxu3 %v5526_v63  ;;  %v6486_v27 = vld [vmem:[%s7025_s29 + $0x4b4] sm:$0xf0] }
 0x448   : > { %3932 = vst.msk [vmem:[#allocation2 + $0x78] sm:$0xff] %vm323_vm1, %v3867_v41  ;;  %v6482_v41 = vld [vmem:[%s7025_s29 + $0x49c] sm:$0xf] }
 0x449   : > { %v3563_v62 = vpop.f32.mrf.mxu2 }
 0x44a   : > { %v3732_v21 = vpop.f32.mrf.mxu3  ;;  %v3564_v32 = vadd.f32 %v3563_v62, %v7657_v12  ;;  %v405_v12 = vld [vmem:[#allocation2 + $0x88] sm:$0xff]  ;;  %v5587_v62 = vld [vmem:[%s7025_s29 + $0x4b8] sm:$0xf0] }
 0x44b   : > { %v5590_v42 = vor.u32 %v6482_v41, %v5587_v62 }
 0x44c   : > { %v3733_v34 = vadd.f32 %v3732_v21, %v3564_v32 }
 0x44e   : > { %v3868_v14 = vadd.f32 %v3733_v34, %v404_v10  ;;  %6269 = vmatmul.msk.bf16.gmra.mxu0 %vm323_vm1, %v4054_v22  ;;  %v5586_v10 = vor.u32 %v6486_v27, %v5585_v2  ;;  %v8229_v22 = vpop.f32.mrf.mxu0 }
 0x44f   : > { %v3999_v51 = vld [vmem:[#allocation2 + $0x78] sm:$0xff] }
 0x450   : > { %3933 = vst.msk [vmem:[#allocation2 + $0x80] sm:$0xff] %vm323_vm1, %v3868_v14 }
 0x451   : > { %v3565_v23 = vpop.f32.mrf.mxu2 }
 0x452   : > { %v3734_v25 = vpop.f32.mrf.mxu3  ;;  %v3566_v24 = vadd.f32 %v3565_v23, %v7664_v47  ;;  %v3998_v47 = vld [vmem:[#allocation2 + $0x70] sm:$0xff] }
 0x453   : > { %v4055_v3 = vpack.c.bf16 %v3999_v51, %v3998_v47 }
 0x454   : > { %v3735_v16 = vadd.f32 %v3734_v25, %v3566_v24 }
 0x456   : > { %v3869_v1 = vadd.f32 %v3735_v16, %v405_v12  ;;  %3607 = vmatmul.bf16.gmra.mxu2 %v5554_v26  ;;  %v5617_v12 = vld [vmem:[%s7025_s29 + $0x4d8] sm:$0xf] }
 0x457   : > { %3776 = vmatmul.bf16.gmra.mxu3 %v5558_v7  ;;  %v4000_v23 = vld [vmem:[#allocation2 + $0x80] sm:$0xff]  ;;  %v6494_v16 = vld [vmem:[%s7025_s29 + $0x4f4] sm:$0xf0] }
 0x458   : > { %3934 = vst.msk [vmem:[#allocation2 + $0x88] sm:$0xff] %vm323_vm1, %v3869_v1  ;;  %v6490_v1 = vld [vmem:[%s7025_s29 + $0x4dc] sm:$0xf] }
 0x459   : > { %v3568_v54 = vpop.f32.mrf.mxu2 }
 0x45a   : > { %v3737_v61 = vpop.f32.mrf.mxu3  ;;  %v3569_v9 = vadd.f32 %v3568_v54, %v7671_v56  ;;  %v407_v56 = vld [vmem:[#allocation2 + $0x98] sm:$0xff] }
 0x45b   : > { %v5619_v54 = vld [vmem:[%s7025_s29 + $0x4f8] sm:$0xf0] }
 0x45c   : > { %v3738_v0 = vadd.f32 %v3737_v61, %v3569_v9  ;;  %v8238_v61 = vld [vmem:[#allocation7] ss:$0 sm:$0xff]  ;;  %v5622_v47 = vor.u32 %v6490_v1, %v5619_v54 }
 0x45e   : > { %v3870_v63 = vadd.f32 %v3738_v0, %v406_v18  ;;  %6270 = vmatmul.msk.bf16.gmra.mxu0 %vm323_vm1, %v4055_v3  ;;  %v5618_v18 = vor.u32 %v6494_v16, %v5617_v12  ;;  %v409_v0 = vld [vmem:[#allocation2 + $0xa8] sm:$0xff]  ;;  %v411_v16 = vld [vmem:[#allocation2 + $0xb8] sm:$0xff] }
 0x45f   : > { %v4001_v53 = vld [vmem:[#allocation2 + $0x88] sm:$0xff] }
 0x460   : > { %3935 = vst.msk [vmem:[#allocation2 + $0x90] sm:$0xff] %vm323_vm1, %v3870_v63  ;;  %v4056_v24 = vpack.c.bf16 %v4001_v53, %v4000_v23  ;;  %v6498_v23 = vld [vmem:[%s7025_s29 + $0x51c] sm:$0xf] }
 0x461   : > { %v3570_v21 = vpop.f32.mrf.mxu2 }
 0x462   : > { %v3739_v29 = vpop.f32.mrf.mxu3  ;;  %v3571_v32 = vadd.f32 %v3570_v21, %v7681_v44 }
 0x464   : > { %v3740_v34 = vadd.f32 %v3739_v29, %v3571_v32 }
 0x466   : > { %v3871_v14 = vadd.f32 %v3740_v34, %v407_v56  ;;  %3612 = vmatmul.bf16.gmra.mxu2 %v5586_v10  ;;  %v410_v56 = vld [vmem:[#allocation2 + $0xb0] sm:$0xff] }
 0x467   : > { %3781 = vmatmul.bf16.gmra.mxu3 %v5590_v42  ;;  %v4002_v34 = vld [vmem:[#allocation2 + $0x90] sm:$0xff] }
 0x468   : > { %3936 = vst.msk [vmem:[#allocation2 + $0x98] sm:$0xff] %vm323_vm1, %v3871_v14 }
 0x469   : > { %v3573_v19 = vpop.f32.mrf.mxu2 }
 0x46a   : > { %v3742_v55 = vpop.f32.mrf.mxu3  ;;  %v3574_v44 = vadd.f32 %v3573_v19, %v7691_v5 }
 0x46b   : > { %v4194_v26 = vpop.f32.mrf.mxu0 }
 0x46c   : > { %v3743_v25 = vadd.f32 %v3742_v55, %v3574_v44  ;;  %v4195_v63 = vadd.f32 %v8238_v61, %v4194_v26  ;;  %v5649_v44 = vld [vmem:[%s7025_s29 + $0x518] sm:$0xf] }
 0x46e   : > { %v3872_v7 = vadd.f32 %v3743_v25, %v408_v46  ;;  %6271 = vmatmul.msk.bf16.gmra.mxu0 %vm323_vm1, %v4056_v24  ;;  %v4354_v62 = vmax.f32 %v4195_v63, 0.0  ;;  %v6502_v46 = vld [vmem:[%s7025_s29 + $0x534] sm:$0xf0]  ;;  %v5651_v25 = vld [vmem:[%s7025_s29 + $0x538] sm:$0xf0] }
 0x46f   : > { %v4003_v32 = vld [vmem:[#allocation2 + $0x98] sm:$0xff]  ;;  %v5654_v12 = vor.u32 %v6498_v23, %v5651_v25 }
 0x470   : > { %3937 = vst.msk [vmem:[#allocation2 + $0xa0] sm:$0xff] %vm323_vm1, %v3872_v7  ;;  %v4057_v19 = vpack.c.bf16 %v4003_v32, %v4002_v34  ;;  %v5650_v7 = vor.u32 %v6502_v46, %v5649_v44  ;;  %v5681_v32 = vld [vmem:[%s7025_s29 + $0x558] sm:$0xf] }
 0x471   : > { %v3575_v51 = vpop.f32.mrf.mxu2 }
 0x472   : > { %v3744_v9 = vpop.f32.mrf.mxu3  ;;  %v3576_v5 = vadd.f32 %v3575_v51, %v7698_v37 }
 0x473   : > { %v4196_v2 = vpop.f32.mrf.mxu0 }
 0x474   : > { %v3745_v3 = vadd.f32 %v3744_v9, %v3576_v5  ;;  %v4197_v41 = vadd.f32 %v8238_v61, %v4196_v2 }
 0x476   : > { %v3873_v27 = vadd.f32 %v3745_v3, %v409_v0  ;;  %3617 = vmatmul.bf16.gmra.mxu2 %v5618_v18  ;;  %v4355_v21 = vmax.f32 %v4197_v41, 0.0 }
 0x477   : > { %3786 = vmatmul.bf16.gmra.mxu3 %v5622_v47  ;;  %v4004_v41 = vld [vmem:[#allocation2 + $0xa0] sm:$0xff] }
 0x478   : > { %3938 = vst.msk [vmem:[#allocation2 + $0xa8] sm:$0xff] %vm323_vm1, %v3873_v27  ;;  %v4418_v42 = vpack.c.bf16 %v4355_v21, %v4354_v62  ;;  %v412_v27 = vld [vmem:[#allocation2 + $0xc0] sm:$0xff] }
 0x479   : > { %v3578_v37 = vpop.f32.mrf.mxu2 }
 0x47a   : > { %v3747_v29 = vpop.f32.mrf.mxu3  ;;  %v3579_v10 = vadd.f32 %v3578_v37, %v7705_v49  ;;  %6299 = vmatmul.msk.bf16.vlgmr.msra.gmra.mxu1 %vm4458_vm2, %v4418_v42  ;;  %v6506_v42 = vld [vmem:[%s7025_s29 + $0x55c] sm:$0xf] }
 0x47b   : > { %v4199_v55 = vpop.f32.mrf.mxu0 }
 0x47c   : > { %v3748_v14 = vadd.f32 %v3747_v29, %v3579_v10  ;;  %v4200_v54 = vadd.f32 %v8238_v61, %v4199_v55  ;;  %v6510_v10 = vld [vmem:[%s7025_s29 + $0x574] sm:$0xf0] }
 0x47e   : > { %v3874_v53 = vadd.f32 %v3748_v14, %v410_v56  ;;  %6272 = vmatmul.msk.bf16.gmra.mxu0 %vm323_vm1, %v4057_v19  ;;  %v4356_v18 = vmax.f32 %v4200_v54, 0.0  ;;  %v5683_v56 = vld [vmem:[%s7025_s29 + $0x578] sm:$0xf0]  ;;  %v5682_v19 = vor.u32 %v6510_v10, %v5681_v32  ;;  %v414_v54 = vld [vmem:[#allocation2 + $0xd0] sm:$0xff] }
 0x47f   : > { %v4005_v3 = vld [vmem:[#allocation2 + $0xa8] sm:$0xff]  ;;  %v5686_v55 = vor.u32 %v6506_v42, %v5683_v56 }
 0x480   : > { %3939 = vst.msk [vmem:[#allocation2 + $0xb0] sm:$0xff] %vm323_vm1, %v3874_v53  ;;  %v4058_v21 = vpack.c.bf16 %v4005_v3, %v4004_v41  ;;  %v413_v53 = vld [vmem:[#allocation2 + $0xc8] sm:$0xff]  ;;  %v6514_v3 = vld [vmem:[%s7025_s29 + $0x59c] sm:$0xf] }
 0x481   : > { %v3580_v24 = vpop.f32.mrf.mxu2 }
 0x482   : > { %v3749_v26 = vpop.f32.mrf.mxu3  ;;  %v3581_v49 = vadd.f32 %v3580_v24, %v7712_v30 }
 0x483   : > { %v4201_v51 = vpop.f32.mrf.mxu0 }
 0x484   : > { %v3750_v1 = vadd.f32 %v3749_v26, %v3581_v49  ;;  %v4202_v5 = vadd.f32 %v8238_v61, %v4201_v51 }
 0x486   : > { %v3875_v9 = vadd.f32 %v3750_v1, %v411_v16  ;;  %3622 = vmatmul.bf16.gmra.mxu2 %v5650_v7  ;;  %v4357_v47 = vmax.f32 %v4202_v5, 0.0 }
 0x487   : > { %3791 = vmatmul.bf16.gmra.mxu3 %v5654_v12  ;;  %v4006_v51 = vld [vmem:[#allocation2 + $0xb0] sm:$0xff] }
 0x488   : > { %3940 = vst.msk [vmem:[#allocation2 + $0xb8] sm:$0xff] %vm323_vm1, %v3875_v9  ;;  %v4419_v2 = vpack.c.bf16 %v4357_v47, %v4356_v18 }
 0x489   : > { %v3583_v30 = vpop.f32.mrf.mxu2 }
 0x48a   : > { %v3752_v0 = vpop.f32.mrf.mxu3  ;;  %v3584_v63 = vadd.f32 %v3583_v30, %v7719_v48  ;;  %6300 = vmatmul.msk.bf16.gmra.mxu1 %vm4458_vm2, %v4419_v2  ;;  %v5713_v30 = vld [vmem:[%s7025_s29 + $0x598] sm:$0xf] }
 0x48b   : > { %v4204_v37 = vpop.f32.mrf.mxu0 }
 0x48c   : > { %v3753_v62 = vadd.f32 %v3752_v0, %v3584_v63  ;;  %v4205_v46 = vadd.f32 %v8238_v61, %v4204_v37  ;;  %v6518_v0 = vld [vmem:[%s7025_s29 + $0x5b4] sm:$0xf0]  ;;  %v5715_v63 = vld [vmem:[%s7025_s29 + $0x5b8] sm:$0xf0] }
 0x48d   : > { %v5714_v41 = vor.u32 %v6518_v0, %v5713_v30 }
 0x48e   : > { %v3876_v29 = vadd.f32 %v3753_v62, %v412_v27  ;;  %6273 = vmatmul.msk.bf16.gmra.mxu0 %vm323_vm1, %v4058_v21  ;;  %v4358_v26 = vmax.f32 %v4205_v46, 0.0  ;;  %v5718_v62 = vor.u32 %v6514_v3, %v5715_v63  ;;  %v415_v21 = vld [vmem:[#allocation2 + $0xd8] sm:$0xff] }
 0x48f   : > { %v4007_v12 = vld [vmem:[#allocation2 + $0xb8] sm:$0xff] }
 0x490   : > { %3941 = vst.msk [vmem:[#allocation2 + $0xc0] sm:$0xff] %vm323_vm1, %v3876_v29  ;;  %v4059_v5 = vpack.c.bf16 %v4007_v12, %v4006_v51  ;;  %v417_v51 = vld [vmem:[#allocation2 + $0xe8] sm:$0xff] }
 0x491   : > { %v3585_v34 = vpop.f32.mrf.mxu2 }
 0x492   : > { %v3754_v14 = vpop.f32.mrf.mxu3  ;;  %v3586_v48 = vadd.f32 %v3585_v34, %v7726_v33 }
 0x493   : > { %v4206_v23 = vpop.f32.mrf.mxu0 }
 0x494   : > { %v3755_v44 = vadd.f32 %v3754_v14, %v3586_v48  ;;  %v4207_v24 = vadd.f32 %v8238_v61, %v4206_v23 }
 0x496   : > { %v3877_v25 = vadd.f32 %v3755_v44, %v413_v53  ;;  %3627 = vmatmul.bf16.gmra.mxu2 %v5682_v19  ;;  %v4359_v49 = vmax.f32 %v4207_v24, 0.0  ;;  %v416_v53 = vld [vmem:[#allocation2 + $0xe0] sm:$0xff] }
 0x497   : > { %3796 = vmatmul.bf16.gmra.mxu3 %v5686_v55  ;;  %v4008_v44 = vld [vmem:[#allocation2 + $0xc0] sm:$0xff] }
 0x498   : > { %3942 = vst.msk [vmem:[#allocation2 + $0xc8] sm:$0xff] %vm323_vm1, %v3877_v25  ;;  %v4420_v1 = vpack.c.bf16 %v4359_v49, %v4358_v26  ;;  %v5745_v26 = vld [vmem:[%s7025_s29 + $0x5d8] sm:$0xf] }
 0x499   : > { %v3588_v33 = vpop.f32.mrf.mxu2  ;;  %v6526_v49 = vld [vmem:[%s7025_s29 + $0x5f4] sm:$0xf0] }
 0x49a   : > { %v3757_v7 = vpop.f32.mrf.mxu3  ;;  %v3589_v16 = vadd.f32 %v3588_v33, %v7733_v15  ;;  %6301 = vmatmul.msk.bf16.gmra.mxu1 %vm4458_vm2, %v4420_v1  ;;  %v6522_v33 = vld [vmem:[%s7025_s29 + $0x5dc] sm:$0xf]  ;;  %v5746_v1 = vor.u32 %v6526_v49, %v5745_v26 }
 0x49b   : > { %v4209_v18 = vpop.f32.mrf.mxu0 }
 0x49c   : > { %v3758_v9 = vadd.f32 %v3757_v7, %v3589_v16  ;;  %v4210_v29 = vadd.f32 %v8238_v61, %v4209_v18  ;;  %v5747_v7 = vld [vmem:[%s7025_s29 + $0x5f8] sm:$0xf0] }
 0x49e   : > { %v3878_v47 = vadd.f32 %v3758_v9, %v414_v54  ;;  %6274 = vmatmul.msk.bf16.gmra.mxu0 %vm323_vm1, %v4059_v5  ;;  %v4360_v56 = vmax.f32 %v4210_v29, 0.0  ;;  %v5750_v54 = vor.u32 %v6522_v33, %v5747_v7 }
 0x49f   : > { %v4009_v48 = vld [vmem:[#allocation2 + $0xc8] sm:$0xff] }
 0x4a0   : > { %3943 = vst.msk [vmem:[#allocation2 + $0xd0] sm:$0xff] %vm323_vm1, %v3878_v47  ;;  %v4060_v23 = vpack.c.bf16 %v4009_v48, %v4008_v44 }
 0x4a1   : > { %v3590_v2 = vpop.f32.mrf.mxu2 }
 0x4a2   : > { %v3759_v27 = vpop.f32.mrf.mxu3  ;;  %v3591_v15 = vadd.f32 %v3590_v2, %v7743_v43 }
 0x4a3   : > { %v4211_v32 = vpop.f32.mrf.mxu0 }
 0x4a4   : > { %v3760_v37 = vadd.f32 %v3759_v27, %v3591_v15  ;;  %v4212_v42 = vadd.f32 %v8238_v61, %v4211_v32 }
 0x4a6   : > { %v3879_v10 = vadd.f32 %v3760_v37, %v415_v21  ;;  %3632 = vmatmul.bf16.gmra.mxu2 %v5714_v41  ;;  %v4361_v34 = vmax.f32 %v4212_v42, 0.0  ;;  %v418_v41 = vld [vmem:[#allocation2 + $0xf0] sm:$0xff]  ;;  %v6534_v42 = vld [vmem:[%s7025_s29 + $0x634] sm:$0xf0] }
 0x4a7   : > { %3801 = vmatmul.bf16.gmra.mxu3 %v5718_v62  ;;  %v4010_v62 = vld [vmem:[#allocation2 + $0xd0] sm:$0xff] }
 0x4a8   : > { %3944 = vst.msk [vmem:[#allocation2 + $0xd8] sm:$0xff] %vm323_vm1, %v3879_v10  ;;  %v4421_v55 = vpack.c.bf16 %v4361_v34, %v4360_v56  ;;  %v5777_v10 = vld [vmem:[%s7025_s29 + $0x618] sm:$0xf]  ;;  %v6530_v56 = vld [vmem:[%s7025_s29 + $0x61c] sm:$0xf] }
 0x4a9   : > { %v3593_v43 = vpop.f32.mrf.mxu2  ;;  %v5779_v34 = vld [vmem:[%s7025_s29 + $0x638] sm:$0xf0]  ;;  %v5778_v48 = vor.u32 %v6534_v42, %v5777_v10 }
 0x4aa   : > { %v3762_v14 = vpop.f32.mrf.mxu3  ;;  %v3594_v19 = vadd.f32 %v3593_v43, %v7753_v60  ;;  %6302 = vmatmul.msk.bf16.gmra.mxu1 %vm4458_vm2, %v4421_v55  ;;  %v419_v55 = vld [vmem:[#allocation2 + $0xf8] sm:$0xff] }
 0x4ab   : > { %v4214_v25 = vpop.f32.mrf.mxu0 }
 0x4ac   : > { %v3763_v46 = vadd.f32 %v3762_v14, %v3594_v19  ;;  %v4215_v5 = vadd.f32 %v8238_v61, %v4214_v25  ;;  %v5782_v19 = vor.u32 %v6530_v56, %v5779_v34  ;;  %v422_v34 = vld [vmem:[#allocation2 + $0x110] sm:$0xff] }
 0x4ae   : > { %v3880_v24 = vadd.f32 %v3763_v46, %v416_v53  ;;  %6275 = vmatmul.msk.bf16.gmra.mxu0 %vm323_vm1, %v4060_v23  ;;  %v4362_v0 = vmax.f32 %v4215_v5, 0.0  ;;  %v5809_v5 = vld [vmem:[%s7025_s29 + $0x658] sm:$0xf] }
 0x4af   : > { %v4011_v2 = vld [vmem:[#allocation2 + $0xd8] sm:$0xff] }
 0x4b0   : > { %3945 = vst.msk [vmem:[#allocation2 + $0xe0] sm:$0xff] %vm323_vm1, %v3880_v24  ;;  %v4061_v37 = vpack.c.bf16 %v4011_v2, %v4010_v62  ;;  %v421_v2 = vld [vmem:[#allocation2 + $0x108] sm:$0xff] }
 0x4b1   : > { %v3595_v12 = vpop.f32.mrf.mxu2 }
 0x4b2   : > { %v3764_v16 = vpop.f32.mrf.mxu3  ;;  %v3596_v60 = vadd.f32 %v3595_v12, %v7760_v8 }
 0x4b3   : > { %v4216_v18 = vpop.f32.mrf.mxu0 }
 0x4b4   : > { %v3765_v9 = vadd.f32 %v3764_v16, %v3596_v60  ;;  %v4217_v30 = vadd.f32 %v8238_v61, %v4216_v18  ;;  %v420_v16 = vld [vmem:[#allocation2 + $0x100] sm:$0xff]  ;;  %v6542_v18 = vld [vmem:[%s7025_s29 + $0x674] sm:$0xf0] }
 0x4b6   : > { %v3881_v47 = vadd.f32 %v3765_v9, %v417_v51  ;;  %3637 = vmatmul.bf16.gmra.mxu2 %v5746_v1  ;;  %v4363_v3 = vmax.f32 %v4217_v30, 0.0  ;;  %v5811_v30 = vld [vmem:[%s7025_s29 + $0x678] sm:$0xf0] }
 0x4b7   : > { %3806 = vmatmul.bf16.gmra.mxu3 %v5750_v54  ;;  %v4012_v60 = vld [vmem:[#allocation2 + $0xe0] sm:$0xff] }
 0x4b8   : > { %3946 = vst.msk [vmem:[#allocation2 + $0xe8] sm:$0xff] %vm323_vm1, %v3881_v47  ;;  %v4422_v15 = vpack.c.bf16 %v4363_v3, %v4362_v0  ;;  %v6538_v47 = vld [vmem:[%s7025_s29 + $0x65c] sm:$0xf] }
 0x4b9   : > { %v3598_v8 = vpop.f32.mrf.mxu2 }
 0x4ba   : > { %v3767_v63 = vpop.f32.mrf.mxu3  ;;  %v3599_v27 = vadd.f32 %v3598_v8, %v7767_v59  ;;  %6303 = vmatmul.msk.bf16.gmra.mxu1 %vm4458_vm2, %v4422_v15  ;;  %v5810_v8 = vor.u32 %v6542_v18, %v5809_v5  ;;  %v424_v18 = vld [vmem:[#allocation2 + $0x120] sm:$0xff] }
 0x4bb   : > { %v4219_v29 = vpop.f32.mrf.mxu0 }
 0x4bc   : > { %v3768_v21 = vadd.f32 %v3767_v63, %v3599_v27  ;;  %v4220_v44 = vadd.f32 %v8238_v61, %v4219_v29  ;;  %v5814_v63 = vor.u32 %v6538_v47, %v5811_v30 }
 0x4be   : > { %v3882_v32 = vadd.f32 %v3768_v21, %v418_v41  ;;  %6276 = vmatmul.msk.bf16.gmra.mxu0 %vm323_vm1, %v4061_v37  ;;  %v4364_v24 = vmax.f32 %v4220_v44, 0.0  ;;  %v6546_v44 = vld [vmem:[%s7025_s29 + $0x69c] sm:$0xf] }
 0x4bf   : > { %v4013_v33 = vld [vmem:[#allocation2 + $0xe8] sm:$0xff] }
 0x4c0   : > { %3947 = vst.msk [vmem:[#allocation2 + $0xf0] sm:$0xff] %vm323_vm1, %v3882_v32  ;;  %v4062_v54 = vpack.c.bf16 %v4013_v33, %v4012_v60 }
 0x4c1   : > { %v3600_v43 = vpop.f32.mrf.mxu2 }
 0x4c2   : > { %v3769_v14 = vpop.f32.mrf.mxu3  ;;  %v3601_v59 = vadd.f32 %v3600_v43, %v7774_v39 }
 0x4c3   : > { %v4221_v46 = vpop.f32.mrf.mxu0 }
 0x4c4   : > { %v3770_v53 = vadd.f32 %v3769_v14, %v3601_v59  ;;  %v4222_v25 = vadd.f32 %v8238_v61, %v4221_v46  ;;  %v5843_v46 = vld [vmem:[%s7025_s29 + $0x6b8] sm:$0xf0] }
 0x4c6   : > { %v3883_v23 = vadd.f32 %v3770_v53, %v419_v55  ;;  %3642 = vmatmul.bf16.gmra.mxu2 %v5778_v48  ;;  %v4365_v26 = vmax.f32 %v4222_v25, 0.0  ;;  %v5841_v55 = vld [vmem:[%s7025_s29 + $0x698] sm:$0xf] }
 0x4c7   : > { %3811 = vmatmul.bf16.gmra.mxu3 %v5782_v19  ;;  %v4014_v43 = vld [vmem:[#allocation2 + $0xf0] sm:$0xff]  ;;  %v6550_v53 = vld [vmem:[%s7025_s29 + $0x6b4] sm:$0xf0] }
 0x4c8   : > { %3948 = vst.msk [vmem:[#allocation2 + $0xf8] sm:$0xff] %vm323_vm1, %v3883_v23  ;;  %v4423_v12 = vpack.c.bf16 %v4365_v26, %v4364_v24  ;;  %v5842_v24 = vor.u32 %v6550_v53, %v5841_v55  ;;  %v5846_v26 = vor.u32 %v6546_v44, %v5843_v46  ;;  %v426_v44 = vld [vmem:[#allocation2 + $0x130] sm:$0xff] }
 0x4c9   : > { %v3603_v39 = vpop.f32.mrf.mxu2 }
 0x4ca   : > { %v3772_v49 = vpop.f32.mrf.mxu3  ;;  %v3604_v7 = vadd.f32 %v3603_v39, %v7781_v58  ;;  %6304 = vmatmul.msk.bf16.gmra.mxu1 %vm4458_vm2, %v4423_v12  ;;  %v423_v39 = vld [vmem:[#allocation2 + $0x118] sm:$0xff] }
 0x4cb   : > { %v4224_v51 = vpop.f32.mrf.mxu0 }
 0x4cc   : > { %v3773_v1 = vadd.f32 %v3772_v49, %v3604_v7  ;;  %v4225_v15 = vadd.f32 %v8238_v61, %v4224_v51 }
 0x4ce   : > { %v3884_v9 = vadd.f32 %v3773_v1, %v420_v16  ;;  %6277 = vmatmul.msk.bf16.gmra.mxu0 %vm323_vm1, %v4062_v54  ;;  %v4366_v37 = vmax.f32 %v4225_v15, 0.0 }
 0x4cf   : > { %v4015_v10 = vld [vmem:[#allocation2 + $0xf8] sm:$0xff] }
 0x4d0   : > { %3949 = vst.msk [vmem:[#allocation2 + $0x100] sm:$0xff] %vm323_vm1, %v3884_v9  ;;  %v4063_v59 = vpack.c.bf16 %v4015_v10, %v4014_v43 }
 0x4d1   : > { %v3605_v0 = vpop.f32.mrf.mxu2 }
 0x4d2   : > { %v3774_v3 = vpop.f32.mrf.mxu3  ;;  %v3606_v58 = vadd.f32 %v3605_v0, %v7788_v4 }
 0x4d3   : > { %v4226_v41 = vpop.f32.mrf.mxu0 }
 0x4d4   : > { %v3775_v27 = vadd.f32 %v3774_v3, %v3606_v58  ;;  %v4227_v21 = vadd.f32 %v8238_v61, %v4226_v41  ;;  %v8338_v41 = vpop.f32.mrf.mxu1 }
 0x4d6   : > { %v3885_v62 = vadd.f32 %v3775_v27, %v421_v2  ;;  %3647 = vmatmul.bf16.gmra.mxu2 %v5810_v8  ;;  %v4367_v29 = vmax.f32 %v4227_v21, 0.0  ;;  %v5873_v8 = vld [vmem:[%s7025_s29 + $0x6d8] sm:$0xf]  ;;  %v6554_v2 = vld [vmem:[%s7025_s29 + $0x6dc] sm:$0xf] }
 0x4d7   : > { %3816 = vmatmul.bf16.gmra.mxu3 %v5814_v63  ;;  %v4016_v47 = vld [vmem:[#allocation2 + $0x100] sm:$0xff]  ;;  %v6558_v63 = vld [vmem:[%s7025_s29 + $0x6f4] sm:$0xf0]  ;;  %v5875_v27 = vld [vmem:[%s7025_s29 + $0x6f8] sm:$0xf0] }
 0x4d8   : > { %3950 = vst.msk [vmem:[#allocation2 + $0x108] sm:$0xff] %vm323_vm1, %v3885_v62  ;;  %v4424_v56 = vpack.c.bf16 %v4367_v29, %v4366_v37  ;;  %v5874_v21 = vor.u32 %v6558_v63, %v5873_v8  ;;  %v5878_v37 = vor.u32 %v6554_v2, %v5875_v27  ;;  %v425_v29 = vld [vmem:[#allocation2 + $0x128] sm:$0xff] }
 0x4d9   : > { %v3608_v4 = vpop.f32.mrf.mxu2 }
 0x4da   : > { %v3777_v32 = vpop.f32.mrf.mxu3  ;;  %v3609_v42 = vadd.f32 %v3608_v4, %v7795_v6  ;;  %6305 = vmatmul.msk.bf16.gmra.mxu1 %vm4458_vm2, %v4424_v56 }
 0x4db   : > { %v4229_v48 = vpop.f32.mrf.mxu0 }
 0x4dc   : > { %v3778_v14 = vadd.f32 %v3777_v32, %v3609_v42  ;;  %v4230_v33 = vadd.f32 %v8238_v61, %v4229_v48 }
 0x4de   : > { %v3886_v19 = vadd.f32 %v3778_v14, %v422_v34  ;;  %6278 = vmatmul.msk.bf16.gmra.mxu0 %vm323_vm1, %v4063_v59  ;;  %v4368_v60 = vmax.f32 %v4230_v33, 0.0  ;;  %v5907_v33 = vld [vmem:[%s7025_s29 + $0x738] sm:$0xf0] }
 0x4df   : > { %v4017_v51 = vld [vmem:[#allocation2 + $0x108] sm:$0xff] }
 0x4e0   : > { %3951 = vst.msk [vmem:[#allocation2 + $0x110] sm:$0xff] %vm323_vm1, %v3886_v19  ;;  %v4064_v0 = vpack.c.bf16 %v4017_v51, %v4016_v47 }
 0x4e1   : > { %v3610_v23 = vpop.f32.mrf.mxu2 }
 0x4e2   : > { %v3779_v25 = vpop.f32.mrf.mxu3  ;;  %v3611_v6 = vadd.f32 %v3610_v23, %v7805_v31 }
 0x4e3   : > { %v4231_v7 = vpop.f32.mrf.mxu0 }
 0x4e4   : > { %v3780_v49 = vadd.f32 %v3779_v25, %v3611_v6  ;;  %v4232_v16 = vadd.f32 %v8238_v61, %v4231_v7 }
 0x4e6   : > { %v3887_v12 = vadd.f32 %v3780_v49, %v423_v39  ;;  %3652 = vmatmul.bf16.gmra.mxu2 %v5842_v24  ;;  %v4369_v1 = vmax.f32 %v4232_v16, 0.0  ;;  %v6566_v39 = vld [vmem:[%s7025_s29 + $0x734] sm:$0xf0]  ;;  %v6562_v49 = vld [vmem:[%s7025_s29 + $0x71c] sm:$0xf] }
 0x4e7   : > { %3821 = vmatmul.bf16.gmra.mxu3 %v5846_v26  ;;  %v4018_v46 = vld [vmem:[#allocation2 + $0x110] sm:$0xff]  ;;  %v5905_v26 = vld [vmem:[%s7025_s29 + $0x718] sm:$0xf] }
 0x4e8   : > { %3952 = vst.msk [vmem:[#allocation2 + $0x118] sm:$0xff] %vm323_vm1, %v3887_v12  ;;  %v4425_v5 = vpack.c.bf16 %v4369_v1, %v4368_v60  ;;  %v5906_v60 = vor.u32 %v6566_v39, %v5905_v26  ;;  %v5910_v1 = vor.u32 %v6562_v49, %v5907_v33  ;;  %v8769_v33 = vld [vmem:[#allocation35_spill] sm:$0xff] }
 0x4e9   : > { %v3613_v31 = vpop.f32.mrf.mxu2 }
 0x4ea   : > { %v3782_v54 = vpop.f32.mrf.mxu3  ;;  %v3614_v9 = vadd.f32 %v3613_v31, %v7815_v36  ;;  %6306 = vmatmul.msk.bf16.gmra.mxu1 %vm4458_vm2, %v4425_v5 }
 0x4eb   : > { %v4234_v3 = vpop.f32.mrf.mxu0 }
 0x4ec   : > { %v3783_v30 = vadd.f32 %v3782_v54, %v3614_v9  ;;  %v4235_v32 = vadd.f32 %v8238_v61, %v4234_v3  ;;  %v427_v54 = vld [vmem:[#allocation2 + $0x138] sm:$0xff] }
 0x4ee   : > { %v3888_v58 = vadd.f32 %v3783_v30, %v424_v18  ;;  %6279 = vmatmul.msk.bf16.gmra.mxu0 %vm323_vm1, %v4064_v0  ;;  %v4370_v34 = vmax.f32 %v4235_v32, 0.0  ;;  %v5937_v32 = vld [vmem:[%s7025_s29 + $0x758] sm:$0xf] }
 0x4ef   : > { %v4019_v48 = vld [vmem:[#allocation2 + $0x118] sm:$0xff] }
 0x4f0   : > { %3953 = vst.msk [vmem:[#allocation2 + $0x120] sm:$0xff] %vm323_vm1, %v3888_v58  ;;  %v4065_v25 = vpack.c.bf16 %v4019_v48, %v4018_v46 }
 0x4f1   : > { %v3615_v36 = vpop.f32.mrf.mxu2 }
 0x4f2   : > { %v3784_v15 = vpop.f32.mrf.mxu3  ;;  %v3616_v62 = vadd.f32 %v3615_v36, %v7822_v11  ;;  %v428_v36 = vld [vmem:[#allocation2 + $0x140] sm:$0xff] }
 0x4f3   : > { %v4236_v10 = vpop.f32.mrf.mxu0 }
 0x4f4   : > { %v3785_v4 = vadd.f32 %v3784_v15, %v3616_v62  ;;  %v4237_v56 = vadd.f32 %v8238_v61, %v4236_v10  ;;  %v3288_v15 = vadd.f32 %v7839_v38, %v7854_v13  ;;  %v6574_v10 = vld [vmem:[%s7025_s29 + $0x774] sm:$0xf0] }
 0x4f6   : > { %v3889_v42 = vadd.f32 %v3785_v4, %v425_v29  ;;  %3657 = vmatmul.bf16.gmra.mxu2 %v5874_v21  ;;  %v4371_v43 = vmax.f32 %v4237_v56, 0.0  ;;  %v8768_v56 = vld [vmem:[#allocation33_spill] sm:$0xff] }
 0x4f7   : > { %3826 = vmatmul.bf16.gmra.mxu3 %v5878_v37  ;;  %v4564_v59 = vpop.f32.mrf.mxu1  ;;  %v4020_v62 = vld [vmem:[#allocation2 + $0x120] sm:$0xff] }
 0x4f8   : > { %3954 = vst.msk [vmem:[#allocation2 + $0x128] sm:$0xff] %vm323_vm1, %v3889_v42  ;;  %v4426_v55 = vpack.c.bf16 %v4371_v43, %v4370_v34  ;;  %v4724_v53 = vpack.c.bf16 %v4564_v59, %v4564_v59  ;;  %v6570_v42 = vld [vmem:[%s7025_s29 + $0x75c] sm:$0xf]  ;;  %v3457_v34 = vadd.f32 %v8768_v56, %v3288_v15 }
 0x4f9   : > { %v3618_v14 = vpop.f32.mrf.mxu2 }
 0x4fa   : > { %v3787_v11 = vpop.f32.mrf.mxu3  ;;  %v3619_v19 = vadd.f32 %v3618_v14, %v7829_v28  ;;  %4789 = vst.msk [vmem:[%s8347_s18] sm:$0xf] %vm4788_vm3, %v4724_v53  ;;  %6307 = vmatmul.msk.bf16.gmra.mxu1 %vm4458_vm2, %v4426_v55 }
 0x4fb   : > { %v4239_v6 = vpop.f32.mrf.mxu0 }
 0x4fc   : > { %v3788_v23 = vadd.f32 %v3787_v11, %v3619_v19  ;;  %v4240_v9 = vadd.f32 %v8238_v61, %v4239_v6  ;;  %v5938_v11 = vor.u32 %v6574_v10, %v5937_v32  ;;  %v429_v19 = vld [vmem:[#allocation2 + $0x148] sm:$0xff] }
 0x4fe   : > { %v3890_v24 = vadd.f32 %v3788_v23, %v426_v44  ;;  %6280 = vmatmul.msk.bf16.gmra.mxu0 %vm323_vm1, %v4065_v25  ;;  %v4372_v30 = vmax.f32 %v4240_v9, 0.0 }
 0x4ff   : > { %v4566_v12 = vpop.f32.mrf.mxu1  ;;  %v4021_v8 = vld [vmem:[#allocation2 + $0x128] sm:$0xff] }
 0x500   : > { %3955 = vst.msk [vmem:[#allocation2 + $0x130] sm:$0xff] %vm323_vm1, %v3890_v24  ;;  %v4725_v31 = vpack.c.bf16 %v4566_v12, %v4566_v12  ;;  %v4066_v37 = vpack.c.bf16 %v4021_v8, %v4020_v62 }
 0x501   : > { %v3620_v28 = vpop.f32.mrf.mxu2 }
 0x502   : > { %v3789_v7 = vpop.f32.mrf.mxu3  ;;  %v3621_v16 = vadd.f32 %v3620_v28, %v7836_v40  ;;  %4790 = vst.msk [vmem:[%s8347_s18 + $0x4] sm:$0xf] %vm4788_vm3, %v4725_v31 }
 0x503   : > { %v4241_v5 = vpop.f32.mrf.mxu0 }
 0x504   : > { %v3790_v51 = vadd.f32 %v3789_v7, %v3621_v16  ;;  %v4242_v47 = vadd.f32 %v8238_v61, %v4241_v5  ;;  %v430_v16 = vld [vmem:[#allocation2 + $0x150] sm:$0xff] }
 0x506   : > { %v3891_v18 = vadd.f32 %v3790_v51, %v427_v54  ;;  %3662 = vmatmul.bf16.gmra.mxu2 %v5906_v60  ;;  %v4373_v40 = vmax.f32 %v4242_v47, 0.0  ;;  %v8770_v60 = vld [vmem:[#allocation11_spill] sm:$0xff]  ;;  %v5969_v47 = vld [vmem:[%s7025_s29 + $0x798] sm:$0xf] }
 0x507   : > { %3831 = vmatmul.bf16.gmra.mxu3 %v5910_v1  ;;  %v4569_v58 = vpop.f32.mrf.mxu1  ;;  %v8771_v1 = vld [vmem:[#allocation10_spill] sm:$0xff]  ;;  %v4022_v54 = vld [vmem:[#allocation2 + $0x130] sm:$0xff] }
 0x508   : > { %3956 = vst.msk [vmem:[#allocation2 + $0x138] sm:$0xff] %vm323_vm1, %v3891_v18  ;;  %v4427_v2 = vpack.c.bf16 %v4373_v40, %v4372_v30  ;;  %v4726_v27 = vpack.c.bf16 %v4569_v58, %v4569_v58  ;;  %v3293_v31 = vadd.f32 %v8771_v1, %v8770_v60  ;;  %v6582_v30 = vld [vmem:[%s7025_s29 + $0x7b4] sm:$0xf0]  ;;  %v6578_v40 = vld [vmem:[%s7025_s29 + $0x79c] sm:$0xf] }
 0x509   : > { %v3623_v0 = vpop.f32.mrf.mxu2 }
 0x50a   : > { %v3792_v3 = vpop.f32.mrf.mxu3  ;;  %v3624_v63 = vadd.f32 %v3623_v0, %v7847_v50  ;;  %4791 = vst.msk [vmem:[%s8347_s18 + $0x8] sm:$0xf] %vm4788_vm3, %v4726_v27  ;;  %6308 = vmatmul.msk.bf16.gmra.mxu1 %vm4458_vm2, %v4427_v2  ;;  %v5939_v50 = vld [vmem:[%s7025_s29 + $0x778] sm:$0xf0] }
 0x50b   : > { %v4244_v29 = vpop.f32.mrf.mxu0  ;;  %v5942_v59 = vor.u32 %v6570_v42, %v5939_v50  ;;  %v5971_v0 = vld [vmem:[%s7025_s29 + $0x7b8] sm:$0xf0] }
 0x50c   : > { %v3793_v21 = vadd.f32 %v3792_v3, %v3624_v63  ;;  %v4245_v53 = vadd.f32 %v8238_v61, %v4244_v29  ;;  %v8772_v3 = vld [vmem:[#allocation34_spill] sm:$0xff]  ;;  %v5974_v15 = vor.u32 %v6578_v40, %v5971_v0 }
 0x50d   : > { %v3462_v58 = vadd.f32 %v8772_v3, %v3293_v31 }
 0x50e   : > { %v3892_v4 = vadd.f32 %v3793_v21, %v428_v36  ;;  %6281 = vmatmul.msk.bf16.gmra.mxu0 %vm323_vm1, %v4066_v37  ;;  %v4374_v25 = vmax.f32 %v4245_v53, 0.0  ;;  %v5970_v36 = vor.u32 %v6582_v30, %v5969_v47  ;;  %v431_v21 = vld [vmem:[#allocation2 + $0x158] sm:$0xff] }
 0x50f   : > { %v4571_v43 = vpop.f32.mrf.mxu1  ;;  %v4023_v49 = vld [vmem:[#allocation2 + $0x138] sm:$0xff] }
 0x510   : > { %3957 = vst.msk [vmem:[#allocation2 + $0x140] sm:$0xff] %vm323_vm1, %v3892_v4  ;;  %v4727_v48 = vpack.c.bf16 %v4571_v43, %v4571_v43  ;;  %v4067_v9 = vpack.c.bf16 %v4023_v49, %v4022_v54  ;;  %v8773_v43 = vld [vmem:[#allocation37_spill] sm:$0xff] }
 0x511   : > { %v3625_v38 = vpop.f32.mrf.mxu2  ;;  %v6003_v49 = vld [vmem:[%s7025_s29 + $0x7f8] sm:$0xf0] }
 0x512   : > { %v3794_v13 = vpop.f32.mrf.mxu3  ;;  %v3626_v14 = vadd.f32 %v3625_v38, %v3457_v34  ;;  %4792 = vst.msk [vmem:[%s8347_s18 + $0xc] sm:$0xf] %vm4788_vm3, %v4727_v48  ;;  %v432_v48 = vld [vmem:[#allocation2 + $0x160] sm:$0xff] }
 0x513   : > { %v4246_v44 = vpop.f32.mrf.mxu0 }
 0x514   : > { %v3795_v55 = vadd.f32 %v3794_v13, %v3626_v14  ;;  %v4247_v23 = vadd.f32 %v8238_v61, %v4246_v44 }
 0x516   : > { %v3893_v46 = vadd.f32 %v3795_v55, %v429_v19  ;;  %3667 = vmatmul.bf16.gmra.mxu2 %v5938_v11  ;;  %v4375_v6 = vmax.f32 %v4247_v23, 0.0  ;;  %v8774_v19 = vld [vmem:[#allocation13_spill] sm:$0xff]  ;;  %v8775_v55 = vld [vmem:[#allocation12_spill] sm:$0xff] }
 0x517   : > { %3836 = vmatmul.bf16.gmra.mxu3 %v5942_v59  ;;  %v4574_v39 = vpop.f32.mrf.mxu1  ;;  %v3298_v53 = vadd.f32 %v8775_v55, %v8774_v19  ;;  %v4024_v44 = vld [vmem:[#allocation2 + $0x140] sm:$0xff] }
 0x518   : > { %3958 = vst.msk [vmem:[#allocation2 + $0x148] sm:$0xff] %vm323_vm1, %v3893_v46  ;;  %v4428_v7 = vpack.c.bf16 %v4375_v6, %v4374_v25  ;;  %v4728_v12 = vpack.c.bf16 %v4574_v39, %v4574_v39  ;;  %v6586_v39 = vld [vmem:[%s7025_s29 + $0x7dc] sm:$0xf] }
 0x519   : > { %v3628_v24 = vpop.f32.mrf.mxu2  ;;  %v6006_v31 = vor.u32 %v6586_v39, %v6003_v49  ;;  %v8781_v39 = vld [vmem:[#allocation41_spill] sm:$0xff] }
 0x51a   : > { %v3797_v26 = vpop.f32.mrf.mxu3  ;;  %v3629_v28 = vadd.f32 %v3628_v24, %v8769_v33  ;;  %4793 = vst.msk [vmem:[%s8347_s18 + $0x10] sm:$0xf] %vm4788_vm3, %v4728_v12  ;;  %6309 = vmatmul.msk.bf16.gmra.mxu1 %vm4458_vm2, %v4428_v7  ;;  %v6001_v24 = vld [vmem:[%s7025_s29 + $0x7d8] sm:$0xf] }
 0x51b   : > { %v4249_v5 = vpop.f32.mrf.mxu0  ;;  %v8776_v33 = vld [vmem:[#allocation36_spill] sm:$0xff] }
 0x51c   : > { %v3798_v51 = vadd.f32 %v3797_v26, %v3629_v28  ;;  %v4250_v29 = vadd.f32 %v8238_v61, %v4249_v5  ;;  %v6590_v26 = vld [vmem:[%s7025_s29 + $0x7f4] sm:$0xf0]  ;;  %v3467_v28 = vadd.f32 %v8776_v33, %v3298_v53 }
 0x51d   : > { %v6002_v1 = vor.u32 %v6590_v26, %v6001_v24 }
 0x51e   : > { %v3894_v18 = vadd.f32 %v3798_v51, %v430_v16  ;;  %6282 = vmatmul.msk.bf16.gmra.mxu0 %vm323_vm1, %v4067_v9  ;;  %v4376_v42 = vmax.f32 %v4250_v29, 0.0  ;;  %v433_v51 = vld [vmem:[#allocation2 + $0x168] sm:$0xff] }
 0x51f   : > { %v4576_v2 = vpop.f32.mrf.mxu1  ;;  %v4025_v13 = vld [vmem:[#allocation2 + $0x148] sm:$0xff] }
 0x520   : > { %3959 = vst.msk [vmem:[#allocation2 + $0x150] sm:$0xff] %vm323_vm1, %v3894_v18  ;;  %v4729_v62 = vpack.c.bf16 %v4576_v2, %v4576_v2  ;;  %v4068_v23 = vpack.c.bf16 %v4025_v13, %v4024_v44  ;;  %v8777_v2 = vld [vmem:[#allocation39_spill] sm:$0xff] }
 0x521   : > { %v3630_v8 = vpop.f32.mrf.mxu2 }
 0x522   : > { %v3799_v63 = vpop.f32.mrf.mxu3  ;;  %v3631_v27 = vadd.f32 %v3630_v8, %v3462_v58  ;;  %4794 = vst.msk [vmem:[%s8347_s18 + $0x14] sm:$0xf] %vm4788_vm3, %v4729_v62  ;;  %v434_v62 = vld [vmem:[#allocation2 + $0x170] sm:$0xff] }
 0x523   : > { %v4251_v4 = vpop.f32.mrf.mxu0 }
 0x524   : > { %v3800_v37 = vadd.f32 %v3799_v63, %v3631_v27  ;;  %v4252_v10 = vadd.f32 %v8238_v61, %v4251_v4 }
 0x526   : > { %v3895_v32 = vadd.f32 %v3800_v37, %v431_v21  ;;  %3672 = vmatmul.bf16.gmra.mxu2 %v5970_v36  ;;  %v4377_v50 = vmax.f32 %v4252_v10, 0.0  ;;  %v8778_v21 = vld [vmem:[#allocation15_spill] sm:$0xff]  ;;  %v8779_v37 = vld [vmem:[#allocation14_spill] sm:$0xff] }
 0x527   : > { %3841 = vmatmul.bf16.gmra.mxu3 %v5974_v15  ;;  %v4579_v38 = vpop.f32.mrf.mxu1  ;;  %v3303_v29 = vadd.f32 %v8779_v37, %v8778_v21  ;;  %v4026_v4 = vld [vmem:[#allocation2 + $0x150] sm:$0xff] }
 0x528   : > { %3960 = vst.msk [vmem:[#allocation2 + $0x158] sm:$0xff] %vm323_vm1, %v3895_v32  ;;  %v4429_v11 = vpack.c.bf16 %v4377_v50, %v4376_v42  ;;  %v4730_v59 = vpack.c.bf16 %v4579_v38, %v4579_v38 }
 0x529   : > { %v3633_v56 = vpop.f32.mrf.mxu2 }
 0x52a   : > { %v3802_v34 = vpop.f32.mrf.mxu3  ;;  %v3634_v14 = vadd.f32 %v3633_v56, %v8773_v43  ;;  %4795 = vst.msk [vmem:[%s8347_s18 + $0x18] sm:$0xf] %vm4788_vm3, %v4730_v59  ;;  %6310 = vmatmul.msk.bf16.gmra.mxu1 %vm4458_vm2, %v4429_v11  ;;  %v8780_v56 = vld [vmem:[#allocation38_spill] sm:$0xff]  ;;  %v435_v59 = vld [vmem:[#allocation2 + $0x178] sm:$0xff] }
 0x52b   : > { %v4254_v25 = vpop.f32.mrf.mxu0 }
 0x52c   : > { %v3803_v46 = vadd.f32 %v3802_v34, %v3634_v14  ;;  %v4255_v5 = vadd.f32 %v8238_v61, %v4254_v25  ;;  %v3472_v34 = vadd.f32 %v8780_v56, %v3303_v29  ;;  %v438_v56 = vld [vmem:[#allocation2 + $0x190] sm:$0xff] }
 0x52e   : > { %v3896_v6 = vadd.f32 %v3803_v46, %v432_v48  ;;  %6283 = vmatmul.msk.bf16.gmra.mxu0 %vm323_vm1, %v4068_v23  ;;  %v4378_v40 = vmax.f32 %v4255_v5, 0.0 }
 0x52f   : > { %v4581_v16 = vpop.f32.mrf.mxu1  ;;  %v4027_v63 = vld [vmem:[#allocation2 + $0x158] sm:$0xff] }
 0x530   : > { %3961 = vst.msk [vmem:[#allocation2 + $0x160] sm:$0xff] %vm323_vm1, %v3896_v6  ;;  %v4731_v54 = vpack.c.bf16 %v4581_v16, %v4581_v16  ;;  %v4069_v10 = vpack.c.bf16 %v4027_v63, %v4026_v4  ;;  %v8783_v16 = vld [vmem:[#allocation16_spill] sm:$0xff] }
 0x531   : > { %v3635_v7 = vpop.f32.mrf.mxu2 }
 0x532   : > { %v3804_v12 = vpop.f32.mrf.mxu3  ;;  %v3636_v60 = vadd.f32 %v3635_v7, %v3467_v28  ;;  %4796 = vst.msk [vmem:[%s8347_s18 + $0x1c] sm:$0xf] %vm4788_vm3, %v4731_v54  ;;  %v436_v7 = vld [vmem:[#allocation2 + $0x180] sm:$0xff] }
 0x533   : > { %v4256_v18 = vpop.f32.mrf.mxu0 }
 0x534   : > { %v3805_v9 = vadd.f32 %v3804_v12, %v3636_v60  ;;  %v4257_v30 = vadd.f32 %v8238_v61, %v4256_v18  ;;  %v8782_v12 = vld [vmem:[#allocation17_spill] sm:$0xff] }
 0x535   : > { %v3308_v60 = vadd.f32 %v8783_v16, %v8782_v12 }
 0x536   : > { %v3897_v47 = vadd.f32 %v3805_v9, %v433_v51  ;;  %3677 = vmatmul.bf16.gmra.mxu2 %v6002_v1  ;;  %v4379_v0 = vmax.f32 %v4257_v30, 0.0  ;;  %v8784_v9 = vld [vmem:[#allocation40_spill] sm:$0xff] }
 0x537   : > { %3846 = vmatmul.bf16.gmra.mxu3 %v6006_v31  ;;  %v4584_v8 = vpop.f32.mrf.mxu1  ;;  %v4028_v1 = vld [vmem:[#allocation2 + $0x160] sm:$0xff]  ;;  %v3477_v5 = vadd.f32 %v8784_v9, %v3308_v60 }
 0x538   : > { %3962 = vst.msk [vmem:[#allocation2 + $0x168] sm:$0xff] %vm323_vm1, %v3897_v47  ;;  %v4430_v36 = vpack.c.bf16 %v4379_v0, %v4378_v40  ;;  %v4732_v15 = vpack.c.bf16 %v4584_v8, %v4584_v8  ;;  %v8442_v8 = vld [vmem:[#allocation7] ss:$0 sm:$0xff] }
 0x539   : > { %v3638_v3 = vpop.f32.mrf.mxu2  ;;  %v440_v9 = vld [vmem:[#allocation2 + $0x1a0] sm:$0xff] }
 0x53a   : > { %v3807_v58 = vpop.f32.mrf.mxu3  ;;  %v3639_v27 = vadd.f32 %v3638_v3, %v8777_v2  ;;  %4797 = vst.msk [vmem:[%s8347_s18 + $0x20] sm:$0xf] %vm4788_vm3, %v4732_v15  ;;  %6311 = vmatmul.msk.bf16.gmra.mxu1 %vm4458_vm2, %v4430_v36  ;;  %v437_v3 = vld [vmem:[#allocation2 + $0x188] sm:$0xff] }
 0x53b   : > { %v4259_v42 = vpop.f32.mrf.mxu0 }
 0x53c   : > { %v3808_v32 = vadd.f32 %v3807_v58, %v3639_v27  ;;  %v4260_v19 = vadd.f32 %v8238_v61, %v4259_v42 }
 0x53e   : > { %v3898_v50 = vadd.f32 %v3808_v32, %v434_v62  ;;  %6284 = vmatmul.msk.bf16.gmra.mxu0 %vm323_vm1, %v4069_v10  ;;  %v4380_v46 = vmax.f32 %v4260_v19, 0.0  ;;  %v8785_v32 = vld [vmem:[#allocation43_spill] sm:$0xff]  ;;  %v8788_v19 = vld [vmem:[#allocation42_spill] sm:$0xff] }
 0x53f   : > { %v4586_v43 = vpop.f32.mrf.mxu1  ;;  %v4029_v26 = vld [vmem:[#allocation2 + $0x168] sm:$0xff] }
 0x540   : > { %3963 = vst.msk [vmem:[#allocation2 + $0x170] sm:$0xff] %vm323_vm1, %v3898_v50  ;;  %v4733_v11 = vpack.c.bf16 %v4586_v43, %v4586_v43 }
 0x541   : > { %v3640_v38 = vpop.f32.mrf.mxu2 }
 0x542   : > { %v3809_v13 = vpop.f32.mrf.mxu3  ;;  %v3641_v14 = vadd.f32 %v3640_v38, %v3472_v34  ;;  %4798 = vst.msk [vmem:[%s8347_s18 + $0x24] sm:$0xf] %vm4788_vm3, %v4733_v11  ;;  %v8786_v34 = vld [vmem:[#allocation19_spill] sm:$0xff]  ;;  %v8787_v38 = vld [vmem:[#allocation18_spill] sm:$0xff] }
 0x543   : > { %v4261_v55 = vpop.f32.mrf.mxu0 }
 0x544   : > { %v3810_v48 = vadd.f32 %v3809_v13, %v3641_v14  ;;  %v4262_v44 = vadd.f32 %v8238_v61, %v4261_v55  ;;  %v4070_v61 = vpack.c.bf16 %v4029_v26, %v4028_v1  ;;  %v3313_v13 = vadd.f32 %v8787_v38, %v8786_v34 }
 0x546   : > { %v3899_v53 = vadd.f32 %v3810_v48, %v435_v59  ;;  %v4381_v23 = vmax.f32 %v4262_v44, 0.0  ;;  %v3482_v55 = vadd.f32 %v8788_v19, %v3313_v13  ;;  %v442_v19 = vld [vmem:[#allocation2 + $0x1b0] sm:$0xff] }
 0x547   : > { %v4589_v24 = vpop.f32.mrf.mxu1  ;;  %v4030_v43 = vld [vmem:[#allocation2 + $0x170] sm:$0xff] }
 0x548   : > { %3964 = vst.msk [vmem:[#allocation2 + $0x178] sm:$0xff] %vm323_vm1, %v3899_v53  ;;  %v4431_v33 = vpack.c.bf16 %v4381_v23, %v4380_v46  ;;  %v4734_v28 = vpack.c.bf16 %v4589_v24, %v4589_v24 }
 0x549   : > { %v3643_v25 = vpop.f32.mrf.mxu2 }
 0x54a   : > { %v3812_v6 = vpop.f32.mrf.mxu3  ;;  %v3644_v49 = vadd.f32 %v3643_v25, %v8781_v39  ;;  %4799 = vst.msk [vmem:[%s8347_s18 + $0x28] sm:$0xf] %vm4788_vm3, %v4734_v28  ;;  %6312 = vmatmul.msk.bf16.gmra.mxu1 %vm4458_vm2, %v4431_v33 }
 0x54b   : > { %v4264_v54 = vpop.f32.mrf.mxu0 }
 0x54c   : > { %v3813_v31 = vadd.f32 %v3812_v6, %v3644_v49  ;;  %v4265_v63 = vadd.f32 %v8442_v8, %v4264_v54  ;;  %v439_v6 = vld [vmem:[#allocation2 + $0x198] sm:$0xff] }
 0x54e   : > { %v3900_v51 = vadd.f32 %v3813_v31, %v436_v7  ;;  %6285 = vmatmul.msk.bf16.gmra.mxu0 %vm323_vm1, %v4070_v61  ;;  %v4382_v15 = vmax.f32 %v4265_v63, 0.0  ;;  %v8789_v31 = vld [vmem:[#allocation45_spill] sm:$0xff]  ;;  %v8792_v63 = vld [vmem:[#allocation44_spill] sm:$0xff] }
 0x54f   : > { %v4591_v30 = vpop.f32.mrf.mxu1  ;;  %v4031_v4 = vld [vmem:[#allocation2 + $0x178] sm:$0xff] }
 0x550   : > { %3965 = vst.msk [vmem:[#allocation2 + $0x180] sm:$0xff] %vm323_vm1, %v3900_v51  ;;  %v4735_v0 = vpack.c.bf16 %v4591_v30, %v4591_v30  ;;  %v4071_v11 = vpack.c.bf16 %v4031_v4, %v4030_v43 }
 0x551   : > { %v3645_v18 = vpop.f32.mrf.mxu2 }
 0x552   : > { %v3814_v47 = vpop.f32.mrf.mxu3  ;;  %v3646_v40 = vadd.f32 %v3645_v18, %v3477_v5  ;;  %4800 = vst.msk [vmem:[%s8347_s18 + $0x2c] sm:$0xf] %vm4788_vm3, %v4735_v0  ;;  %v8790_v5 = vld [vmem:[#allocation21_spill] sm:$0xff]  ;;  %v8791_v18 = vld [vmem:[#allocation20_spill] sm:$0xff] }
 0x553   : > { %v4266_v2 = vpop.f32.mrf.mxu0 }
 0x554   : > { %v3815_v58 = vadd.f32 %v3814_v47, %v3646_v40  ;;  %v4267_v36 = vadd.f32 %v8442_v8, %v4266_v2  ;;  %v3318_v47 = vadd.f32 %v8791_v18, %v8790_v5 }
 0x556   : > { %v3901_v27 = vadd.f32 %v3815_v58, %v437_v3  ;;  %v4383_v62 = vmax.f32 %v4267_v36, 0.0  ;;  %v3487_v2 = vadd.f32 %v8792_v63, %v3318_v47  ;;  %v444_v63 = vld [vmem:[#allocation2 + $0x1c0] sm:$0xff] }
 0x557   : > { %v4594_v29 = vpop.f32.mrf.mxu1  ;;  %v4032_v30 = vld [vmem:[#allocation2 + $0x180] sm:$0xff] }
 0x558   : > { %3966 = vst.msk [vmem:[#allocation2 + $0x188] sm:$0xff] %vm323_vm1, %v3901_v27  ;;  %v4432_v42 = vpack.c.bf16 %v4383_v62, %v4382_v15  ;;  %v4736_v50 = vpack.c.bf16 %v4594_v29, %v4594_v29 }
 0x559   : > { %v3648_v21 = vpop.f32.mrf.mxu2 }
 0x55a   : > { %v3817_v37 = vpop.f32.mrf.mxu3  ;;  %v3649_v10 = vadd.f32 %v3648_v21, %v8785_v32  ;;  %4801 = vst.msk [vmem:[%s8347_s18 + $0x30] sm:$0xf] %vm4788_vm3, %v4736_v50  ;;  %6313 = vmatmul.msk.bf16.gmra.mxu1 %vm4458_vm2, %v4432_v42 }
 0x55b   : > { %v4269_v59 = vpop.f32.mrf.mxu0 }
 0x55c   : > { %v3818_v14 = vadd.f32 %v3817_v37, %v3649_v10  ;;  %v4270_v26 = vadd.f32 %v8442_v8, %v4269_v59  ;;  %v441_v37 = vld [vmem:[#allocation2 + $0x1a8] sm:$0xff] }
 0x55e   : > { %v3902_v48 = vadd.f32 %v3818_v14, %v438_v56  ;;  %6286 = vmatmul.msk.bf16.gmra.mxu0 %vm323_vm1, %v4071_v11  ;;  %v4384_v28 = vmax.f32 %v4270_v26, 0.0  ;;  %v8793_v14 = vld [vmem:[#allocation47_spill] sm:$0xff]  ;;  %v8796_v26 = vld [vmem:[#allocation46_spill] sm:$0xff] }
 0x55f   : > { %v4596_v46 = vpop.f32.mrf.mxu1  ;;  %v4033_v1 = vld [vmem:[#allocation2 + $0x188] sm:$0xff] }
 0x560   : > { %3967 = vst.msk [vmem:[#allocation2 + $0x190] sm:$0xff] %vm323_vm1, %v3902_v48  ;;  %v4737_v25 = vpack.c.bf16 %v4596_v46, %v4596_v46  ;;  %v4072_v0 = vpack.c.bf16 %v4033_v1, %v4032_v30 }
 0x561   : > { %v3650_v53 = vpop.f32.mrf.mxu2 }
 0x562   : > { %v3819_v44 = vpop.f32.mrf.mxu3  ;;  %v3651_v23 = vadd.f32 %v3650_v53, %v3482_v55  ;;  %4802 = vst.msk [vmem:[%s8347_s18 + $0x34] sm:$0xf] %vm4788_vm3, %v4737_v25  ;;  %v8794_v55 = vld [vmem:[#allocation23_spill] sm:$0xff]  ;;  %v8795_v53 = vld [vmem:[#allocation22_spill] sm:$0xff] }
 0x563   : > { %v4271_v39 = vpop.f32.mrf.mxu0 }
 0x564   : > { %v3820_v24 = vadd.f32 %v3819_v44, %v3651_v23  ;;  %v4272_v33 = vadd.f32 %v8442_v8, %v4271_v39  ;;  %v3323_v44 = vadd.f32 %v8795_v53, %v8794_v55 }
 0x566   : > { %v3903_v49 = vadd.f32 %v3820_v24, %v439_v6  ;;  %v4385_v7 = vmax.f32 %v4272_v33, 0.0  ;;  %v3492_v39 = vadd.f32 %v8796_v26, %v3323_v44  ;;  %v3333_v26 = vadd.f32 %v7977_v20, %v7988_v52 }
 0x567   : > { %v4599_v60 = vpop.f32.mrf.mxu1  ;;  %v4034_v46 = vld [vmem:[#allocation2 + $0x190] sm:$0xff] }
 0x568   : > { %3968 = vst.msk [vmem:[#allocation2 + $0x198] sm:$0xff] %vm323_vm1, %v3903_v49  ;;  %v4433_v54 = vpack.c.bf16 %v4385_v7, %v4384_v28  ;;  %v4738_v51 = vpack.c.bf16 %v4599_v60, %v4599_v60 }
 0x569   : > { %v3653_v12 = vpop.f32.mrf.mxu2 }
 0x56a   : > { %v3822_v16 = vpop.f32.mrf.mxu3  ;;  %v3654_v61 = vadd.f32 %v3653_v12, %v8789_v31  ;;  %4803 = vst.msk [vmem:[%s8347_s18 + $0x38] sm:$0xf] %vm4788_vm3, %v4738_v51  ;;  %6314 = vmatmul.msk.bf16.gmra.mxu1 %vm4458_vm2, %v4433_v54 }
 0x56b   : > { %v4274_v3 = vpop.f32.mrf.mxu0 }
 0x56c   : > { %v3823_v40 = vadd.f32 %v3822_v16, %v3654_v61  ;;  %v4275_v4 = vadd.f32 %v8442_v8, %v4274_v3  ;;  %v443_v16 = vld [vmem:[#allocation2 + $0x1b8] sm:$0xff] }
 0x56e   : > { %v3904_v58 = vadd.f32 %v3823_v40, %v440_v9  ;;  %6287 = vmatmul.msk.bf16.gmra.mxu0 %vm323_vm1, %v4072_v0  ;;  %v4386_v50 = vmax.f32 %v4275_v4, 0.0  ;;  %v8797_v40 = vld [vmem:[#allocation49_spill] sm:$0xff]  ;;  %v8800_v4 = vld [vmem:[#allocation48_spill] sm:$0xff] }
 0x56f   : > { %v4601_v15 = vpop.f32.mrf.mxu1  ;;  %v4035_v43 = vld [vmem:[#allocation2 + $0x198] sm:$0xff] }
 0x570   : > { %3969 = vst.msk [vmem:[#allocation2 + $0x1a0] sm:$0xff] %vm323_vm1, %v3904_v58  ;;  %v4739_v21 = vpack.c.bf16 %v4601_v15, %v4601_v15  ;;  %v4073_v25 = vpack.c.bf16 %v4035_v43, %v4034_v46 }
 0x571   : > { %v3655_v27 = vpop.f32.mrf.mxu2 }
 0x572   : > { %v3824_v36 = vpop.f32.mrf.mxu3  ;;  %v3656_v62 = vadd.f32 %v3655_v27, %v3487_v2  ;;  %4804 = vst.msk [vmem:[%s8347_s18 + $0x3c] sm:$0xf] %vm4788_vm3, %v4739_v21  ;;  %v8798_v2 = vld [vmem:[#allocation25_spill] sm:$0xff]  ;;  %v8799_v27 = vld [vmem:[#allocation24_spill] sm:$0xff] }
 0x573   : > { %v4276_v32 = vpop.f32.mrf.mxu0 }
 0x574   : > { %v3825_v29 = vadd.f32 %v3824_v36, %v3656_v62  ;;  %v4277_v42 = vadd.f32 %v8442_v8, %v4276_v32  ;;  %v3328_v36 = vadd.f32 %v8799_v27, %v8798_v2  ;;  %v8801_v2 = vld [vmem:[#allocation26_spill] sm:$0xff] }
 0x575   : > { %v3338_v27 = vadd.f32 %v8801_v2, %v8030_v17 }
 0x576   : > { %v3905_v10 = vadd.f32 %v3825_v29, %v441_v37  ;;  %v4387_v56 = vmax.f32 %v4277_v42, 0.0  ;;  %v3497_v32 = vadd.f32 %v8800_v4, %v3328_v36 }
 0x577   : > { %v4604_v13 = vpop.f32.mrf.mxu1  ;;  %v4036_v15 = vld [vmem:[#allocation2 + $0x1a0] sm:$0xff] }
 0x578   : > { %3970 = vst.msk [vmem:[#allocation2 + $0x1a8] sm:$0xff] %vm323_vm1, %v3905_v10  ;;  %v4434_v59 = vpack.c.bf16 %v4387_v56, %v4386_v50  ;;  %v4740_v48 = vpack.c.bf16 %v4604_v13, %v4604_v13 }
 0x579   : > { %v3658_v34 = vpop.f32.mrf.mxu2 }
 0x57a   : > { %v3827_v38 = vpop.f32.mrf.mxu3  ;;  %v3659_v11 = vadd.f32 %v3658_v34, %v8793_v14  ;;  %4805 = vst.msk [vmem:[%s8347_s18 + $0x40] sm:$0xf] %vm4788_vm3, %v4740_v48  ;;  %6315 = vmatmul.msk.bf16.gmra.mxu1 %vm4458_vm2, %v4434_v59 }
 0x57b   : > { %v4279_v6 = vpop.f32.mrf.mxu0 }
 0x57c   : > { %v3828_v23 = vadd.f32 %v3827_v38, %v3659_v11  ;;  %v4280_v1 = vadd.f32 %v8442_v8, %v4279_v6  ;;  %v445_v38 = vld [vmem:[#allocation2 + $0x1c8] sm:$0xff] }
 0x57e   : > { %v3906_v24 = vadd.f32 %v3828_v23, %v442_v19  ;;  %6288 = vmatmul.msk.bf16.gmra.mxu0 %vm323_vm1, %v4073_v25  ;;  %v4388_v51 = vmax.f32 %v4280_v1, 0.0  ;;  %v447_v1 = vld [vmem:[#allocation2 + $0x1d8] sm:$0xff] }
 0x57f   : > { %v4606_v28 = vpop.f32.mrf.mxu1  ;;  %v4037_v30 = vld [vmem:[#allocation2 + $0x1a8] sm:$0xff] }
 0x580   : > { %3971 = vst.msk [vmem:[#allocation2 + $0x1b0] sm:$0xff] %vm323_vm1, %v3906_v24  ;;  %v4741_v12 = vpack.c.bf16 %v4606_v28, %v4606_v28  ;;  %v4074_v21 = vpack.c.bf16 %v4037_v30, %v4036_v15  ;;  %v446_v24 = vld [vmem:[#allocation2 + $0x1d0] sm:$0xff] }
 0x581   : > { %v3660_v49 = vpop.f32.mrf.mxu2 }
 0x582   : > { %v3829_v33 = vpop.f32.mrf.mxu3  ;;  %v3661_v7 = vadd.f32 %v3660_v49, %v3492_v39  ;;  %4806 = vst.msk [vmem:[%s8347_s18 + $0x44] sm:$0xf] %vm4788_vm3, %v4741_v12  ;;  %v3502_v12 = vadd.f32 %v7980_v35, %v3333_v26 }
 0x583   : > { %v4281_v31 = vpop.f32.mrf.mxu0 }
 0x584   : > { %v3830_v60 = vadd.f32 %v3829_v33, %v3661_v7  ;;  %v4282_v54 = vadd.f32 %v8442_v8, %v4281_v31 }
 0x586   : > { %v3907_v61 = vadd.f32 %v3830_v60, %v443_v16  ;;  %v4389_v9 = vmax.f32 %v4282_v54, 0.0 }
 0x587   : > { %v4609_v47 = vpop.f32.mrf.mxu1  ;;  %v4038_v39 = vld [vmem:[#allocation2 + $0x1b0] sm:$0xff] }
 0x588   : > { %3972 = vst.msk [vmem:[#allocation2 + $0x1b8] sm:$0xff] %vm323_vm1, %v3907_v61  ;;  %v4435_v3 = vpack.c.bf16 %v4389_v9, %v4388_v51  ;;  %v4742_v58 = vpack.c.bf16 %v4609_v47, %v4609_v47 }
 0x589   : > { %v3663_v5 = vpop.f32.mrf.mxu2 }
 0x58a   : > { %v3832_v18 = vpop.f32.mrf.mxu3  ;;  %v3664_v0 = vadd.f32 %v3663_v5, %v8797_v40  ;;  %4807 = vst.msk [vmem:[%s8347_s18 + $0x48] sm:$0xf] %vm4788_vm3, %v4742_v58  ;;  %6316 = vmatmul.msk.bf16.gmra.mxu1 %vm4458_vm2, %v4435_v3 }
 0x58b   : > { %v4284_v37 = vpop.f32.mrf.mxu0 }
 0x58c   : > { %v3833_v62 = vadd.f32 %v3832_v18, %v3664_v0  ;;  %v4285_v43 = vadd.f32 %v8442_v8, %v4284_v37 }
 0x58e   : > { %v3908_v29 = vadd.f32 %v3833_v62, %v444_v63  ;;  %6289 = vmatmul.msk.bf16.gmra.mxu0 %vm323_vm1, %v4074_v21  ;;  %v4390_v48 = vmax.f32 %v4285_v43, 0.0  ;;  %v448_v63 = vld [vmem:[#allocation2 + $0x1e0] sm:$0xff] }
 0x58f   : > { %v4611_v50 = vpop.f32.mrf.mxu1  ;;  %v4039_v46 = vld [vmem:[#allocation2 + $0x1b8] sm:$0xff] }
 0x590   : > { %3973 = vst.msk [vmem:[#allocation2 + $0x1c0] sm:$0xff] %vm323_vm1, %v3908_v29  ;;  %v4743_v34 = vpack.c.bf16 %v4611_v50, %v4611_v50  ;;  %v4075_v33 = vpack.c.bf16 %v4039_v46, %v4038_v39  ;;  %v8802_v29 = vld [vmem:[#allocation27_spill] sm:$0xff] }
 0x591   : > { %v3665_v10 = vpop.f32.mrf.mxu2  ;;  %v3507_v4 = vadd.f32 %v8802_v29, %v3338_v27  ;;  %v449_v50 = vld [vmem:[#allocation2 + $0x1e8] sm:$0xff] }
 0x592   : > { %v3834_v42 = vpop.f32.mrf.mxu3  ;;  %v3666_v56 = vadd.f32 %v3665_v10, %v3497_v32  ;;  %4808 = vst.msk [vmem:[%s8347_s18 + $0x4c] sm:$0xf] %vm4788_vm3, %v4743_v34 }
 0x593   : > { %v4286_v14 = vpop.f32.mrf.mxu0 }
 0x594   : > { %v3835_v13 = vadd.f32 %v3834_v42, %v3666_v56  ;;  %v4287_v59 = vadd.f32 %v8442_v8, %v4286_v14 }
 0x596   : > { %v3909_v11 = vadd.f32 %v3835_v13, %v445_v38  ;;  %v4391_v19 = vmax.f32 %v4287_v59, 0.0 }
 0x597   : > { %v4614_v44 = vpop.f32.mrf.mxu1  ;;  %v4040_v36 = vld [vmem:[#allocation2 + $0x1c0] sm:$0xff] }
 0x598   : > { %3974 = vst.msk [vmem:[#allocation2 + $0x1c8] sm:$0xff] %vm323_vm1, %v3909_v11  ;;  %v4436_v25 = vpack.c.bf16 %v4391_v19, %v4390_v48  ;;  %v4744_v6 = vpack.c.bf16 %v4614_v44, %v4614_v44 }
 0x599   : > { %v3668_v55 = vpop.f32.mrf.mxu2 }
 0x59a   : > { %v3837_v53 = vpop.f32.mrf.mxu3  ;;  %v3669_v23 = vadd.f32 %v3668_v55, %v7985_v45  ;;  %4809 = vst.msk [vmem:[%s8347_s18 + $0x50] sm:$0xf] %vm4788_vm3, %v4744_v6  ;;  %6317 = vmatmul.msk.bf16.gmra.mxu1 %vm4458_vm2, %v4436_v25  ;;  %v450_v25 = vld [vmem:[#allocation2 + $0x1f0] sm:$0xff]  ;;  %v8804_v6 = vld [vmem:[#allocation29_spill] sm:$0xff] }
 0x59b   : > { %v4289_v28 = vpop.f32.mrf.mxu0 }
 0x59c   : > { %v3838_v49 = vadd.f32 %v3837_v53, %v3669_v23  ;;  %v4290_v61 = vadd.f32 %v8442_v8, %v4289_v28  ;;  %v8803_v53 = vld [vmem:[#allocation28_spill] sm:$0xff] }
 0x59e   : > { %v3910_v7 = vadd.f32 %v3838_v49, %v446_v24  ;;  %6290 = vmatmul.msk.bf16.gmra.mxu0 %vm323_vm1, %v4075_v33  ;;  %v4392_v9 = vmax.f32 %v4290_v61, 0.0  ;;  %v3343_v24 = vadd.f32 %v8229_v22, %v8804_v6 }
 0x59f   : > { %v4616_v60 = vpop.f32.mrf.mxu1  ;;  %v4041_v40 = vld [vmem:[#allocation2 + $0x1c8] sm:$0xff] }
 0x5a0   : > { %3975 = vst.msk [vmem:[#allocation2 + $0x1d0] sm:$0xff] %vm323_vm1, %v3910_v7  ;;  %v4745_v20 = vpack.c.bf16 %v4616_v60, %v4616_v60  ;;  %v4076_v62 = vpack.c.bf16 %v4041_v40, %v4040_v36  ;;  %v3512_v7 = vadd.f32 %v8338_v41, %v3343_v24  ;;  %v451_v60 = vld [vmem:[#allocation2 + $0x1f8] sm:$0xff] }
 0x5a1   : > { %v3670_v45 = vpop.f32.mrf.mxu2 }
 0x5a2   : > { %v3839_v16 = vpop.f32.mrf.mxu3  ;;  %v3671_v52 = vadd.f32 %v3670_v45, %v3502_v12  ;;  %4810 = vst.msk [vmem:[%s8347_s18 + $0x54] sm:$0xf] %vm4788_vm3, %v4745_v20 }
 0x5a3   : > { %v4291_v54 = vpop.f32.mrf.mxu0 }
 0x5a4   : > { %v3840_v31 = vadd.f32 %v3839_v16, %v3671_v52  ;;  %v4292_v35 = vadd.f32 %v8442_v8, %v4291_v54 }
 0x5a6   : > { %v3911_v51 = vadd.f32 %v3840_v31, %v447_v1  ;;  %v4393_v5 = vmax.f32 %v4292_v35, 0.0 }
 0x5a7   : > { %v4619_v30 = vpop.f32.mrf.mxu1  ;;  %v4042_v26 = vld [vmem:[#allocation2 + $0x1d0] sm:$0xff] }
 0x5a8   : > { %3976 = vst.msk [vmem:[#allocation2 + $0x1d8] sm:$0xff] %vm323_vm1, %v3911_v51  ;;  %v4437_v3 = vpack.c.bf16 %v4393_v5, %v4392_v9  ;;  %v4746_v58 = vpack.c.bf16 %v4619_v30, %v4619_v30 }
 0x5a9   : > { %v3673_v18 = vpop.f32.mrf.mxu2 }
 0x5aa   : > { %v3842_v47 = vpop.f32.mrf.mxu3  ;;  %v3674_v0 = vadd.f32 %v3673_v18, %v8015_v57  ;;  %4811 = vst.msk [vmem:[%s8347_s18 + $0x58] sm:$0xf] %vm4788_vm3, %v4746_v58  ;;  %6318 = vmatmul.msk.bf16.gmra.mxu1 %vm4458_vm2, %v4437_v3 }
 0x5ab   : > { %v4294_v21 = vpop.f32.mrf.mxu0 }
 0x5ac   : > { %v3843_v15 = vadd.f32 %v3842_v47, %v3674_v0  ;;  %v4295_v34 = vadd.f32 %v8442_v8, %v4294_v21 }
 0x5ae   : > { %v3912_v37 = vadd.f32 %v3843_v15, %v448_v63  ;;  %6291 = vmatmul.msk.bf16.gmra.mxu0 %vm323_vm1, %v4076_v62  ;;  %v4394_v14 = vmax.f32 %v4295_v34, 0.0 }
 0x5af   : > { %v4621_v10 = vpop.f32.mrf.mxu1  ;;  %v4043_v55 = vld [vmem:[#allocation2 + $0x1d8] sm:$0xff] }
 0x5b0   : > { %3977 = vst.msk [vmem:[#allocation2 + $0x1e0] sm:$0xff] %vm323_vm1, %v3912_v37  ;;  %v4747_v42 = vpack.c.bf16 %v4621_v10, %v4621_v10  ;;  %v4077_v49 = vpack.c.bf16 %v4043_v55, %v4042_v26 }
 0x5b1   : > { %v3675_v57 = vpop.f32.mrf.mxu2 }
 0x5b2   : > { %v3844_v32 = vpop.f32.mrf.mxu3  ;;  %v3676_v17 = vadd.f32 %v3675_v57, %v3507_v4  ;;  %4812 = vst.msk [vmem:[%s8347_s18 + $0x5c] sm:$0xf] %vm4788_vm3, %v4747_v42 }
 0x5b3   : > { %v4296_v38 = vpop.f32.mrf.mxu0 }
 0x5b4   : > { %v3845_v56 = vadd.f32 %v3844_v32, %v3676_v17  ;;  %v4297_v43 = vadd.f32 %v8442_v8, %v4296_v38 }
 0x5b6   : > { %v3913_v13 = vadd.f32 %v3845_v56, %v449_v50  ;;  %v4395_v11 = vmax.f32 %v4297_v43, 0.0 }
 0x5b7   : > { %v4624_v19 = vpop.f32.mrf.mxu1  ;;  %v4044_v47 = vld [vmem:[#allocation2 + $0x1e0] sm:$0xff] }
 0x5b8   : > { %3978 = vst.msk [vmem:[#allocation2 + $0x1e8] sm:$0xff] %vm323_vm1, %v3913_v13  ;;  %v4438_v46 = vpack.c.bf16 %v4395_v11, %v4394_v14  ;;  %v4748_v23 = vpack.c.bf16 %v4624_v19, %v4624_v19 }
 0x5b9   : > { %v3678_v59 = vpop.f32.mrf.mxu2 }
 0x5ba   : > { %v3847_v48 = vpop.f32.mrf.mxu3  ;;  %v3679_v44 = vadd.f32 %v3678_v59, %v8803_v53  ;;  %4813 = vst.msk [vmem:[%s8347_s18 + $0x60] sm:$0xf] %vm4788_vm3, %v4748_v23  ;;  %6319 = vmatmul.msk.bf16.gmra.mxu1 %vm4458_vm2, %v4438_v46 }
 0x5bb   : > { %v4299_v33 = vpop.f32.mrf.mxu0 }
 0x5bc   : > { %v3848_v39 = vadd.f32 %v3847_v48, %v3679_v44  ;;  %v4300_v1 = vadd.f32 %v8442_v8, %v4299_v33 }
 0x5be   : > { %v3914_v28 = vadd.f32 %v3848_v39, %v450_v25  ;;  %6292 = vmatmul.msk.bf16.gmra.mxu0 %vm323_vm1, %v4077_v49  ;;  %v4396_v54 = vmax.f32 %v4300_v1, 0.0 }
 0x5bf   : > { %v4626_v45 = vpop.f32.mrf.mxu1  ;;  %v4045_v9 = vld [vmem:[#allocation2 + $0x1e8] sm:$0xff] }
 0x5c0   : > { %3979 = vst.msk [vmem:[#allocation2 + $0x1f0] sm:$0xff] %vm323_vm1, %v3914_v28  ;;  %v4749_v22 = vpack.c.bf16 %v4626_v45, %v4626_v45  ;;  %v4078_v30 = vpack.c.bf16 %v4045_v9, %v4044_v47 }
 0x5c1   : > { %v3680_v12 = vpop.f32.mrf.mxu2 }
 0x5c2   : > { %v3681_v16 = vadd.f32 %v3680_v12, %v3512_v7  ;;  %v3849_v52 = vpop.f32.mrf.mxu3  ;;  %4814 = vst.msk [vmem:[%s8347_s18 + $0x64] sm:$0xf] %vm4788_vm3, %v4749_v22 }
 0x5c3   : > { %v4301_v31 = vpop.f32.mrf.mxu0 }
 0x5c4   : > { %v3850_v20 = vadd.f32 %v3849_v52, %v3681_v16  ;;  %v4302_v41 = vadd.f32 %v8442_v8, %v4301_v31 }
 0x5c6   : > { %v3915_v61 = vadd.f32 %v3850_v20, %v451_v60  ;;  %v4397_v51 = vmax.f32 %v4302_v41, 0.0 }
 0x5c7   : > { %v4629_v35 = vpop.f32.mrf.mxu1  ;;  %v4046_v29 = vld [vmem:[#allocation2 + $0x1f0] sm:$0xff] }
 0x5c8   : > { %3980 = vst.msk [vmem:[#allocation2 + $0x1f8] sm:$0xff] %vm323_vm1, %v3915_v61  ;;  %v4439_v5 = vpack.c.bf16 %v4397_v51, %v4396_v54  ;;  %v4750_v18 = vpack.c.bf16 %v4629_v35, %v4629_v35 }
 0x5ca   : > { %4815 = vst.msk [vmem:[%s8347_s18 + $0x68] sm:$0xf] %vm4788_vm3, %v4750_v18  ;;  %6320 = vmatmul.msk.bf16.gmra.mxu1 %vm4458_vm2, %v4439_v5 }
 0x5cb   : > { %v4304_v40 = vpop.f32.mrf.mxu0 }
 0x5cc   : > { %v4305_v58 = vadd.f32 %v8442_v8, %v4304_v40 }
 0x5ce   : > { %6293 = vmatmul.msk.bf16.gmra.mxu0 %vm323_vm1, %v4078_v30  ;;  %v4398_v27 = vmax.f32 %v4305_v58, 0.0 }
 0x5cf   : > { %v4631_v0 = vpop.f32.mrf.mxu1  ;;  %v4047_v62 = vld [vmem:[#allocation2 + $0x1f8] sm:$0xff] }
 0x5d0   : > { %v4751_v3 = vpack.c.bf16 %v4631_v0, %v4631_v0  ;;  %v4079_v4 = vpack.c.bf16 %v4047_v62, %v4046_v29 }
 0x5d2   : > { %4816 = vst.msk [vmem:[%s8347_s18 + $0x6c] sm:$0xf] %vm4788_vm3, %v4751_v3 }
 0x5d3   : > { %v4306_v63 = vpop.f32.mrf.mxu0 }
 0x5d4   : > { %v4307_v2 = vadd.f32 %v8442_v8, %v4306_v63 }
 0x5d6   : > { %v4399_v36 = vmax.f32 %v4307_v2, 0.0 }
 0x5d7   : > { %v4634_v15 = vpop.f32.mrf.mxu1 }
 0x5d8   : > { %v4440_v21 = vpack.c.bf16 %v4399_v36, %v4398_v27  ;;  %v4752_v37 = vpack.c.bf16 %v4634_v15, %v4634_v15 }
 0x5da   : > { %4817 = vst.msk [vmem:[%s8347_s18 + $0x70] sm:$0xf] %vm4788_vm3, %v4752_v37  ;;  %6321 = vmatmul.msk.bf16.gmra.mxu1 %vm4458_vm2, %v4440_v21 }
 0x5db   : > { %v4309_v57 = vpop.f32.mrf.mxu0 }
 0x5dc   : > { %v4310_v17 = vadd.f32 %v8442_v8, %v4309_v57 }
 0x5de   : > { %6294 = vmatmul.msk.bf16.gmra.mxu0 %vm323_vm1, %v4079_v4  ;;  %v4400_v56 = vmax.f32 %v4310_v17, 0.0 }
 0x5df   : > { %v4636_v32 = vpop.f32.mrf.mxu1 }
 0x5e0   : > { %v4753_v10 = vpack.c.bf16 %v4636_v32, %v4636_v32 }
 0x5e2   : > { %4818 = vst.msk [vmem:[%s8347_s18 + $0x74] sm:$0xf] %vm4788_vm3, %v4753_v10 }
 0x5e3   : > { %v4311_v42 = vpop.f32.mrf.mxu0 }
 0x5e4   : > { %v4312_v50 = vadd.f32 %v8442_v8, %v4311_v42 }
 0x5e6   : > { %v4401_v34 = vmax.f32 %v4312_v50, 0.0 }
 0x5e7   : > { %v4639_v38 = vpop.f32.mrf.mxu1 }
 0x5e8   : > { %v4441_v13 = vpack.c.bf16 %v4401_v34, %v4400_v56  ;;  %v4754_v43 = vpack.c.bf16 %v4639_v38, %v4639_v38 }
 0x5ea   : > { %4819 = vst.msk [vmem:[%s8347_s18 + $0x78] sm:$0xf] %vm4788_vm3, %v4754_v43  ;;  %6322 = vmatmul.msk.bf16.gmra.mxu1 %vm4458_vm2, %v4441_v13 }
 0x5eb   : > { %v4314_v14 = vpop.f32.mrf.mxu0 }
 0x5ec   : > { %v4315_v48 = vadd.f32 %v8442_v8, %v4314_v14 }
 0x5ee   : > { %v4402_v53 = vmax.f32 %v4315_v48, 0.0 }
 0x5ef   : > { %v4641_v11 = vpop.f32.mrf.mxu1 }
 0x5f0   : > { %v4755_v59 = vpack.c.bf16 %v4641_v11, %v4641_v11 }
 0x5f2   : > { %4820 = vst.msk [vmem:[%s8347_s18 + $0x7c] sm:$0xf] %vm4788_vm3, %v4755_v59 }
 0x5f3   : > { %v4316_v19 = vpop.f32.mrf.mxu0 }
 0x5f4   : > { %v4317_v55 = vadd.f32 %v8442_v8, %v4316_v19 }
 0x5f6   : > { %v4403_v44 = vmax.f32 %v4317_v55, 0.0 }
 0x5f7   : > { %v4644_v46 = vpop.f32.mrf.mxu1 }
 0x5f8   : > { %v4442_v23 = vpack.c.bf16 %v4403_v44, %v4402_v53  ;;  %v4756_v25 = vpack.c.bf16 %v4644_v46, %v4644_v46 }
 0x5fa   : > { %4821 = vst.msk [vmem:[%s8347_s18 + $0x80] sm:$0xf] %vm4788_vm3, %v4756_v25  ;;  %6323 = vmatmul.msk.bf16.gmra.mxu1 %vm4458_vm2, %v4442_v23 }
 0x5fb   : > { %v4319_v6 = vpop.f32.mrf.mxu0 }
 0x5fc   : > { %v4320_v39 = vadd.f32 %v8442_v8, %v4319_v6 }
 0x5fe   : > { %v4404_v28 = vmax.f32 %v4320_v39, 0.0 }
 0x5ff   : > { %v4646_v24 = vpop.f32.mrf.mxu1 }
 0x600   : > { %v4757_v26 = vpack.c.bf16 %v4646_v24, %v4646_v24 }
 0x602   : > { %4822 = vst.msk [vmem:[%s8347_s18 + $0x84] sm:$0xf] %vm4788_vm3, %v4757_v26 }
 0x603   : > { %v4321_v49 = vpop.f32.mrf.mxu0 }
 0x604   : > { %v4322_v33 = vadd.f32 %v8442_v8, %v4321_v49 }
 0x606   : > { %v4405_v7 = vmax.f32 %v4322_v33, 0.0 }
 0x607   : > { %v4649_v12 = vpop.f32.mrf.mxu1 }
 0x608   : > { %v4443_v45 = vpack.c.bf16 %v4405_v7, %v4404_v28  ;;  %v4758_v16 = vpack.c.bf16 %v4649_v12, %v4649_v12 }
 0x60a   : > { %4823 = vst.msk [vmem:[%s8347_s18 + $0x88] sm:$0xf] %vm4788_vm3, %v4758_v16  ;;  %6324 = vmatmul.msk.bf16.gmra.mxu1 %vm4458_vm2, %v4443_v45 }
 0x60b   : > { %v4324_v22 = vpop.f32.mrf.mxu0 }
 0x60c   : > { %v4325_v20 = vadd.f32 %v8442_v8, %v4324_v22 }
 0x60e   : > { %v4406_v61 = vmax.f32 %v4325_v20, 0.0 }
 0x60f   : > { %v4651_v60 = vpop.f32.mrf.mxu1 }
 0x610   : > { %v4759_v52 = vpack.c.bf16 %v4651_v60, %v4651_v60 }
 0x612   : > { %4824 = vst.msk [vmem:[%s8347_s18 + $0x8c] sm:$0xf] %vm4788_vm3, %v4759_v52 }
 0x613   : > { %v4326_v1 = vpop.f32.mrf.mxu0 }
 0x614   : > { %v4327_v31 = vadd.f32 %v8442_v8, %v4326_v1 }
 0x616   : > { %v4407_v41 = vmax.f32 %v4327_v31, 0.0 }
 0x617   : > { %v4654_v54 = vpop.f32.mrf.mxu1 }
 0x618   : > { %v4444_v51 = vpack.c.bf16 %v4407_v41, %v4406_v61  ;;  %v4760_v35 = vpack.c.bf16 %v4654_v54, %v4654_v54 }
 0x61a   : > { %4825 = vst.msk [vmem:[%s8347_s18 + $0x90] sm:$0xf] %vm4788_vm3, %v4760_v35  ;;  %6325 = vmatmul.msk.bf16.gmra.mxu1 %vm4458_vm2, %v4444_v51 }
 0x61b   : > { %v4329_v9 = vpop.f32.mrf.mxu0 }
 0x61c   : > { %v4330_v47 = vadd.f32 %v8442_v8, %v4329_v9 }
 0x61e   : > { %v4408_v0 = vmax.f32 %v4330_v47, 0.0 }
 0x61f   : > { %v4656_v5 = vpop.f32.mrf.mxu1 }
 0x620   : > { %v4761_v18 = vpack.c.bf16 %v4656_v5, %v4656_v5 }
 0x622   : > { %4826 = vst.msk [vmem:[%s8347_s18 + $0x94] sm:$0xf] %vm4788_vm3, %v4761_v18 }
 0x623   : > { %v4331_v30 = vpop.f32.mrf.mxu0 }
 0x624   : > { %v4332_v40 = vadd.f32 %v8442_v8, %v4331_v30 }
 0x626   : > { %v4409_v3 = vmax.f32 %v4332_v40, 0.0 }
 0x627   : > { %v4659_v58 = vpop.f32.mrf.mxu1 }
 0x628   : > { %v4445_v63 = vpack.c.bf16 %v4409_v3, %v4408_v0  ;;  %v4762_v2 = vpack.c.bf16 %v4659_v58, %v4659_v58 }
 0x62a   : > { %4827 = vst.msk [vmem:[%s8347_s18 + $0x98] sm:$0xf] %vm4788_vm3, %v4762_v2  ;;  %6326 = vmatmul.msk.bf16.gmra.mxu1 %vm4458_vm2, %v4445_v63 }
 0x62b   : > { %v4334_v27 = vpop.f32.mrf.mxu0 }
 0x62c   : > { %v4335_v62 = vadd.f32 %v8442_v8, %v4334_v27 }
 0x62e   : > { %v4410_v29 = vmax.f32 %v4335_v62, 0.0 }
 0x62f   : > { %v4661_v36 = vpop.f32.mrf.mxu1 }
 0x630   : > { %v4763_v15 = vpack.c.bf16 %v4661_v36, %v4661_v36 }
 0x632   : > { %4828 = vst.msk [vmem:[%s8347_s18 + $0x9c] sm:$0xf] %vm4788_vm3, %v4763_v15 }
 0x633   : > { %v4336_v21 = vpop.f32.mrf.mxu0 }
 0x634   : > { %v4337_v37 = vadd.f32 %v8442_v8, %v4336_v21 }
 0x636   : > { %v4411_v4 = vmax.f32 %v4337_v37, 0.0 }
 0x637   : > { %v4664_v57 = vpop.f32.mrf.mxu1 }
 0x638   : > { %v4446_v32 = vpack.c.bf16 %v4411_v4, %v4410_v29  ;;  %v4764_v10 = vpack.c.bf16 %v4664_v57, %v4664_v57 }
 0x63a   : > { %4829 = vst.msk [vmem:[%s8347_s18 + $0xa0] sm:$0xf] %vm4788_vm3, %v4764_v10  ;;  %6327 = vmatmul.msk.bf16.gmra.mxu1 %vm4458_vm2, %v4446_v32 }
 0x63b   : > { %v4339_v17 = vpop.f32.mrf.mxu0 }
 0x63c   : > { %v4340_v56 = vadd.f32 %v8442_v8, %v4339_v17 }
 0x63e   : > { %v4412_v13 = vmax.f32 %v4340_v56, 0.0 }
 0x63f   : > { %v4666_v42 = vpop.f32.mrf.mxu1 }
 0x640   : > { %v4765_v50 = vpack.c.bf16 %v4666_v42, %v4666_v42 }
 0x642   : > { %4830 = vst.msk [vmem:[%s8347_s18 + $0xa4] sm:$0xf] %vm4788_vm3, %v4765_v50 }
 0x643   : > { %v4341_v34 = vpop.f32.mrf.mxu0 }
 0x644   : > { %v4342_v38 = vadd.f32 %v8442_v8, %v4341_v34 }
 0x646   : > { %v4413_v43 = vmax.f32 %v4342_v38, 0.0 }
 0x647   : > { %v4669_v14 = vpop.f32.mrf.mxu1 }
 0x648   : > { %v4447_v11 = vpack.c.bf16 %v4413_v43, %v4412_v13  ;;  %v4766_v59 = vpack.c.bf16 %v4669_v14, %v4669_v14 }
 0x64a   : > { %4831 = vst.msk [vmem:[%s8347_s18 + $0xa8] sm:$0xf] %vm4788_vm3, %v4766_v59  ;;  %6328 = vmatmul.msk.bf16.gmra.mxu1 %vm4458_vm2, %v4447_v11 }
 0x64b   : > { %v4344_v48 = vpop.f32.mrf.mxu0 }
 0x64c   : > { %v4345_v53 = vadd.f32 %v8442_v8, %v4344_v48 }
 0x64e   : > { %v4414_v23 = vmax.f32 %v4345_v53, 0.0 }
 0x64f   : > { %v4671_v19 = vpop.f32.mrf.mxu1 }
 0x650   : > { %v4767_v55 = vpack.c.bf16 %v4671_v19, %v4671_v19 }
 0x652   : > { %4832 = vst.msk [vmem:[%s8347_s18 + $0xac] sm:$0xf] %vm4788_vm3, %v4767_v55 }
 0x653   : > { %v4346_v44 = vpop.f32.mrf.mxu0 }
 0x654   : > { %v4347_v46 = vadd.f32 %v8442_v8, %v4346_v44 }
 0x656   : > { %v4415_v25 = vmax.f32 %v4347_v46, 0.0 }
 0x657   : > { %v4674_v6 = vpop.f32.mrf.mxu1 }
 0x658   : > { %v4448_v24 = vpack.c.bf16 %v4415_v25, %v4414_v23  ;;  %v4768_v26 = vpack.c.bf16 %v4674_v6, %v4674_v6 }
 0x65a   : > { %4833 = vst.msk [vmem:[%s8347_s18 + $0xb0] sm:$0xf] %vm4788_vm3, %v4768_v26  ;;  %6329 = vmatmul.msk.bf16.gmra.mxu1 %vm4458_vm2, %v4448_v24 }
 0x65b   : > { %v4349_v39 = vpop.f32.mrf.mxu0 }
 0x65c   : > { %v4350_v28 = vadd.f32 %v8442_v8, %v4349_v39 }
 0x65e   : > { %v4416_v45 = vmax.f32 %v4350_v28, 0.0 }
 0x65f   : > { %v4676_v49 = vpop.f32.mrf.mxu1 }
 0x660   : > { %v4769_v33 = vpack.c.bf16 %v4676_v49, %v4676_v49 }
 0x662   : > { %4834 = vst.msk [vmem:[%s8347_s18 + $0xb4] sm:$0xf] %vm4788_vm3, %v4769_v33 }
 0x663   : > { %v4351_v7 = vpop.f32.mrf.mxu0 }
 0x664   : > { %v4352_v12 = vadd.f32 %v8442_v8, %v4351_v7 }
 0x666   : > { %v4417_v16 = vmax.f32 %v4352_v12, 0.0 }
 0x667   : > { %v4679_v22 = vpop.f32.mrf.mxu1 }
 0x668   : > { %v4449_v60 = vpack.c.bf16 %v4417_v16, %v4416_v45  ;;  %v4770_v52 = vpack.c.bf16 %v4679_v22, %v4679_v22 }
 0x66a   : > { %4835 = vst.msk [vmem:[%s8347_s18 + $0xb8] sm:$0xf] %vm4788_vm3, %v4770_v52  ;;  %6330 = vmatmul.msk.bf16.gmra.mxu1 %vm4458_vm2, %v4449_v60 }
 0x66f   : > { %v4681_v20 = vpop.f32.mrf.mxu1 }
 0x670   : > { %v4771_v1 = vpack.c.bf16 %v4681_v20, %v4681_v20 }
 0x672   : > { %4836 = vst.msk [vmem:[%s8347_s18 + $0xbc] sm:$0xf] %vm4788_vm3, %v4771_v1 }
 0x677   : > { %v4684_v31 = vpop.f32.mrf.mxu1 }
 0x678   : > { %v4772_v61 = vpack.c.bf16 %v4684_v31, %v4684_v31 }
 0x67a   : > { %4837 = vst.msk [vmem:[%s8347_s18 + $0xc0] sm:$0xf] %vm4788_vm3, %v4772_v61 }
 0x67f   : > { %v4686_v8 = vpop.f32.mrf.mxu1 }
 0x680   : > { %v4773_v41 = vpack.c.bf16 %v4686_v8, %v4686_v8 }
 0x682   : > { %4838 = vst.msk [vmem:[%s8347_s18 + $0xc4] sm:$0xf] %vm4788_vm3, %v4773_v41 }
 0x687   : > { %v4689_v54 = vpop.f32.mrf.mxu1 }
 0x688   : > { %v4774_v51 = vpack.c.bf16 %v4689_v54, %v4689_v54 }
 0x68a   : > { %4839 = vst.msk [vmem:[%s8347_s18 + $0xc8] sm:$0xf] %vm4788_vm3, %v4774_v51 }
 0x68f   : > { %v4691_v35 = vpop.f32.mrf.mxu1 }
 0x690   : > { %v4775_v9 = vpack.c.bf16 %v4691_v35, %v4691_v35 }
 0x692   : > { %4840 = vst.msk [vmem:[%s8347_s18 + $0xcc] sm:$0xf] %vm4788_vm3, %v4775_v9 }
 0x697   : > { %v4694_v5 = vpop.f32.mrf.mxu1 }
 0x698   : > { %v4776_v18 = vpack.c.bf16 %v4694_v5, %v4694_v5 }
 0x69a   : > { %4841 = vst.msk [vmem:[%s8347_s18 + $0xd0] sm:$0xf] %vm4788_vm3, %v4776_v18 }
 0x69f   : > { %v4696_v47 = vpop.f32.mrf.mxu1 }
 0x6a0   : > { %v4777_v30 = vpack.c.bf16 %v4696_v47, %v4696_v47 }
 0x6a2   : > { %4842 = vst.msk [vmem:[%s8347_s18 + $0xd4] sm:$0xf] %vm4788_vm3, %v4777_v30 }
 0x6a7   : > { %v4699_v40 = vpop.f32.mrf.mxu1 }
 0x6a8   : > { %v4778_v0 = vpack.c.bf16 %v4699_v40, %v4699_v40 }
 0x6aa   : > { %4843 = vst.msk [vmem:[%s8347_s18 + $0xd8] sm:$0xf] %vm4788_vm3, %v4778_v0 }
 0x6af   : > { %v4701_v3 = vpop.f32.mrf.mxu1 }
 0x6b0   : > { %v4779_v58 = vpack.c.bf16 %v4701_v3, %v4701_v3 }
 0x6b2   : > { %4844 = vst.msk [vmem:[%s8347_s18 + $0xdc] sm:$0xf] %vm4788_vm3, %v4779_v58 }
 0x6b7   : > { %v4704_v63 = vpop.f32.mrf.mxu1 }
 0x6b8   : > { %v4780_v2 = vpack.c.bf16 %v4704_v63, %v4704_v63 }
 0x6ba   : > { %4845 = vst.msk [vmem:[%s8347_s18 + $0xe0] sm:$0xf] %vm4788_vm3, %v4780_v2 }
 0x6bf   : > { %v4706_v27 = vpop.f32.mrf.mxu1 }
 0x6c0   : > { %v4781_v36 = vpack.c.bf16 %v4706_v27, %v4706_v27 }
 0x6c2   : > { %4846 = vst.msk [vmem:[%s8347_s18 + $0xe4] sm:$0xf] %vm4788_vm3, %v4781_v36 }
 0x6c7   : > { %v4709_v15 = vpop.f32.mrf.mxu1 }
 0x6c8   : > { %v4782_v62 = vpack.c.bf16 %v4709_v15, %v4709_v15 }
 0x6ca   : > { %4847 = vst.msk [vmem:[%s8347_s18 + $0xe8] sm:$0xf] %vm4788_vm3, %v4782_v62 }
 0x6cf   : > { %v4711_v21 = vpop.f32.mrf.mxu1 }
 0x6d0   : > { %v4783_v37 = vpack.c.bf16 %v4711_v21, %v4711_v21 }
 0x6d2   : > { %4848 = vst.msk [vmem:[%s8347_s18 + $0xec] sm:$0xf] %vm4788_vm3, %v4783_v37 }
 0x6d7   : > { %v4714_v29 = vpop.f32.mrf.mxu1 }
 0x6d8   : > { %v4784_v4 = vpack.c.bf16 %v4714_v29, %v4714_v29 }
 0x6da   : > { %4849 = vst.msk [vmem:[%s8347_s18 + $0xf0] sm:$0xf] %vm4788_vm3, %v4784_v4 }
 0x6df   : > { %v4716_v57 = vpop.f32.mrf.mxu1 }
 0x6e0   : > { %v4785_v32 = vpack.c.bf16 %v4716_v57, %v4716_v57 }
 0x6e2   : > { %4850 = vst.msk [vmem:[%s8347_s18 + $0xf4] sm:$0xf] %vm4788_vm3, %v4785_v32 }
 0x6e7   : > { %v4719_v10 = vpop.f32.mrf.mxu1 }
 0x6e8   : > { %v4786_v17 = vpack.c.bf16 %v4719_v10, %v4719_v10 }
 0x6ea   : > { %4851 = vst.msk [vmem:[%s8347_s18 + $0xf8] sm:$0xf] %vm4788_vm3, %v4786_v17 }
 0x6ef   : > { %v4721_v42 = vpop.f32.mrf.mxu1 }
 0x6f0   : > { %v4787_v50 = vpack.c.bf16 %v4721_v42, %v4721_v42 }
 0x6f2   : > { %4852 = vst.msk [vmem:[%s8347_s18 + $0xfc] sm:$0xf] %vm4788_vm3, %v4787_v50 }
 0x6f3 PF: > { %s19_s23 = sadd.s32 1, %s6897_s23   ;;  %s8805_s18 = smov %s6881_s19 }
 0x6f4   : > { %p16_p2 = scmp.ge.s32.totalorder %s19_s23, 4   ;;  %s8806_s19 = smov %s6885_s20 }
 0x6f5   : > { %s8807_s20 = smov %s7018_s11  ;;  %s8808_s21 = smov %s6893_s22 }
 0x6f6   : > { %s8809_s22 = smov %s8811_s17  ;;  %18 = sbr.rel (!%p16_p2) target bundleno = 5 (0x5), region = 99 }
 0x6fb   :  { %4875 = vsyncpa [#allocation4], 1 }
 0x6fc   :  { %4877 = vsyncpa [#allocation4 + $0x1], 1 }
 0x6fd   :  { %4878 = vsyncpa [#allocation6], 1 }

</bundles_post_ra>
